<compile_context>
chip_gen: v7x
topology: tpu7x:2x2x1
jax: 0.10.0
libtpu: 0.0.40
codegen_flags: <defaults>
</compile_context>

<pallas_src>
import math
import functools

import numpy as np
import jax
import jax.numpy as jnp
from jax import lax
from jax.experimental import pallas as pl
from jax.experimental.pallas import tpu as pltpu

# ----------------------------- model config ---------------------------------
D_MODEL = 32
N_HEADS = 4
D_HEAD = D_MODEL // N_HEADS
N_LAYERS = 2
FF_MULT = 2
D_FF = D_MODEL * FF_MULT
VOCAB = 64
EMB_SIZE = 16
EMB_PAD = 128            # lane-dense padded emb_head output width
MAX_SEQ = 8
BATCH = 2
SEQ = 8
LN_EPS = 1e-5            # PyTorch nn.LayerNorm default


def precompute_freqs_cos_sin(seq_len, n_elem, base=500000.0):
    """Equivalent of precompute_freqs_cis, returned as separate cos/sin."""
    idx = jnp.arange(0, n_elem, 2, dtype=jnp.float32)[: n_elem // 2]
    freqs = 1.0 / (base ** (idx / n_elem))
    t = jnp.arange(seq_len, dtype=jnp.float32)
    ang = jnp.outer(t, freqs)                      # (seq_len, n_elem // 2)
    return jnp.cos(ang), jnp.sin(ang)


# ------------------------- slab row layouts ----------------------------------
def _w_offsets(d, n_layers, d_ff):
    """Row offsets inside the bf16 weight slab (width = 5*d)."""
    o, r = {}, 0
    o["wext"] = r; r += n_layers * d       # (d, 5d) per layer
    o["selq"] = r; r += 5 * d              # (5d, d)
    o["selk"] = r; r += 5 * d
    o["selv"] = r; r += 5 * d
    o["pool"] = r; r += d                  # (d, d)
    o["wo"]   = r; r += n_layers * d       # (d, d) per layer
    o["wg"]   = r; r += n_layers * d       # (d, d_ff) per layer
    o["wu"]   = r; r += n_layers * d
    o["wd"]   = r; r += n_layers * d_ff    # (d_ff, d) per layer
    o["wemb"] = r; r += d                  # (d, EMB_PAD)
    o["rows"] = r
    return o


def _f_offsets(n_tok, n_layers):
    """Row offsets inside the f32 slab (width = 5*D_MODEL)."""
    o, r = {}, 0
    o["cs"]   = r; r += n_tok              # (N, 5D)  [cos|cos|1|sin|sin]
    o["bqkv"] = r; r += n_layers * n_tok   # (N, 5D)  bias_qkv * cs, per layer
    o["bg"]   = r; r += n_layers * n_tok   # (N, d_ff)
    o["bu"]   = r; r += n_layers * n_tok
    o["bemb"] = r; r += n_tok              # (N, EMB_PAD)
    o["rows"] = r
    return o


# ------------------------------ Pallas kernel --------------------------------
def transformer_emb_kernel(x_ref, fs_ref, ws_ref, out_ref, *,
                           n_layers, d_model, d_ff, batch, seq, emb_pad):
    D = d_model
    B, S = batch, seq
    N = B * S
    D5 = 5 * D
    bf16 = jnp.bfloat16
    WO = _w_offsets(D, n_layers, d_ff)
    FO = _f_offsets(N, n_layers)

    h = x_ref[...]                                     # (N, D) f32 residual stream
    cs = fs_ref[FO["cs"]:FO["cs"] + N, :]              # (N, 5D) RoPE table

    # Layer-invariant operands (hoisted out of the unrolled layer loop).
    sel_q = ws_ref[WO["selq"]:WO["selq"] + D5, 0:D]    # (5D, D) bf16, exact 0/1
    sel_k = ws_ref[WO["selk"]:WO["selk"] + D5, 0:D]
    sel_v = ws_ref[WO["selv"]:WO["selv"] + D5, 0:D]
    pool  = ws_ref[WO["pool"]:WO["pool"] + D, 0:D]     # (D, D) bf16 head mask

    # Causal bias materialized ONCE at full broadcast shape (B, S, S, D).
    ri = lax.broadcasted_iota(jnp.int32, (B, S, S, D), 1)
    ci = lax.broadcasted_iota(jnp.int32, (B, S, S, D), 2)
    causal_bias = jnp.where(ci <= ri, 0.0, -1e30)

    def norm(x):   # LayerNorm with scale/bias folded into downstream weights
        mu = jnp.mean(x, axis=-1, keepdims=True)
        xc = x - mu
        var = jnp.mean(xc * xc, axis=-1, keepdims=True)
        return xc * lax.rsqrt(var + LN_EPS)

    for l in range(n_layers):                          # static unroll, no grid
        # ------------------------------ attention -----------------------------
        xh = norm(h)
        wext = ws_ref[WO["wext"] + l * D:WO["wext"] + (l + 1) * D, :]      # (D,5D)
        qkvx = jnp.dot(xh.astype(bf16), wext, preferred_element_type=jnp.float32)
        bcs = fs_ref[FO["bqkv"] + l * N:FO["bqkv"] + (l + 1) * N, :]       # (N,5D)
        qkvs = (qkvx * cs + bcs).astype(bf16)          # RoPE cos/sin applied, bf16

        # q/k/v recombination on the MXU (no lane shuffles).
        q3 = jnp.dot(qkvs, sel_q,
                     preferred_element_type=jnp.float32).astype(bf16).reshape(B, S, D)
        k3 = jnp.dot(qkvs, sel_k,
                     preferred_element_type=jnp.float32).astype(bf16).reshape(B, S, D)
        v3 = jnp.dot(qkvs, sel_v,
                     preferred_element_type=jnp.float32).reshape(B, S, D)

        # Per-head scores replicated across each head's lanes (bf16 MXU operands).
        prod = q3[:, :, None, :] * k3[:, None, :, :]                        # (B,S,S,D) bf16
        seg = jnp.dot(prod.reshape(B * S * S, D), pool,
                      preferred_element_type=jnp.float32).reshape(B, S, S, D)
        seg = seg + causal_bias

        # Deferred-normalization softmax (single reciprocal on the EUP).
        m = jnp.max(seg, axis=2, keepdims=True)
        p = jnp.exp(seg - m)                                                # unnormalized
        denom = jnp.sum(p, axis=2, keepdims=True)                           # (B,S,1,D)
        att_un = jnp.sum(p * v3[:, None, :, :], axis=2, keepdims=True)      # (B,S,1,D)
        att = (att_un * pl.reciprocal(denom, approx=True)).reshape(N, D)

        wo = ws_ref[WO["wo"] + l * D:WO["wo"] + (l + 1) * D, 0:D]
        h = h + jnp.dot(att.astype(bf16), wo, preferred_element_type=jnp.float32)

        # ----------------------------- feed-forward ---------------------------
        xh2 = norm(h).astype(bf16)
        wg = ws_ref[WO["wg"] + l * D:WO["wg"] + (l + 1) * D, 0:d_ff]
        wu = ws_ref[WO["wu"] + l * D:WO["wu"] + (l + 1) * D, 0:d_ff]
        bg = fs_ref[FO["bg"] + l * N:FO["bg"] + (l + 1) * N, 0:d_ff]
        bu = fs_ref[FO["bu"] + l * N:FO["bu"] + (l + 1) * N, 0:d_ff]
        yg = jnp.dot(xh2, wg, preferred_element_type=jnp.float32) + bg
        yu = jnp.dot(xh2, wu, preferred_element_type=jnp.float32) + bu
        act = yg * jax.nn.sigmoid(yg) * yu                                  # (N, d_ff)
        wd = ws_ref[WO["wd"] + l * d_ff:WO["wd"] + (l + 1) * d_ff, 0:D]
        h = h + jnp.dot(act.astype(bf16), wd, preferred_element_type=jnp.float32)

    # Final LN (scale/bias folded) + zero-padded lane-dense emb_head projection.
    xhf = norm(h).astype(bf16)
    wemb = ws_ref[WO["wemb"]:WO["wemb"] + D, 0:emb_pad]
    bemb = fs_ref[FO["bemb"]:FO["bemb"] + N, 0:emb_pad]
    out = jnp.dot(xhf, wemb, preferred_element_type=jnp.float32) + bemb
    out_ref[...] = out.astype(out_ref.dtype)


# --------------------- host-side one-time parameter prep ---------------------
def prepare_kernel_params(params, batch, seq):
    D, H, dh, L, dff = D_MODEL, N_HEADS, D_HEAD, N_LAYERS, D_FF
    N = batch * seq
    D5 = 5 * D
    dh2 = dh // 2
    scale = 1.0 / math.sqrt(dh)
    WO = _w_offsets(D, L, dff)
    FO = _f_offsets(N, L)

    # RoPE half-swap (+/- sign) as a (D, D) matrix, folded into extra QKV columns.
    P = np.zeros((D, D), np.float32)
    for hh in range(H):
        for c in range(dh2):
            P[hh * dh + c + dh2, hh * dh + c] = -1.0     # first half gets  -x2
            P[hh * dh + c, hh * dh + c + dh2] = 1.0      # second half gets +x1
    P = jnp.asarray(P)

    ln = params["ln"]                                    # (L, 4, D)
    n1w, n1b, n2w, n2b = ln[:, 0], ln[:, 1], ln[:, 2], ln[:, 3]
    outw, outb = params["out_ln"][0], params["out_ln"][1]

    # Extended QKV weight: [q*scale | k | v | (q*scale)@P | k@P], LN1 folded.
    wq = params["w_qkv"][:, :, 0:D] * scale
    wk = params["w_qkv"][:, :, D:2 * D]
    wv = params["w_qkv"][:, :, 2 * D:3 * D]
    wext_raw = jnp.concatenate(
        [wq, wk, wv,
         jnp.einsum("lij,jk->lik", wq, P),
         jnp.einsum("lij,jk->lik", wk, P)], axis=-1)     # (L, D, 5D)
    wext = n1w[:, :, None] * wext_raw
    bias_qkv = jnp.einsum("ld,ldk->lk", n1b, wext_raw)   # (L, 5D)

    # FF weights with LN2 folded; final emb head with out_ln folded.
    wg = n2w[:, :, None] * params["w_gate"]
    wu = n2w[:, :, None] * params["w_up"]
    bias_g = jnp.einsum("ld,ldk->lk", n2b, params["w_gate"])   # (L, dff)
    bias_u = jnp.einsum("ld,ldk->lk", n2b, params["w_up"])
    wo = params["w_o"]
    wd = params["w_down"]

    E = params["w_emb"].shape[-1]
    wemb_pad = jnp.zeros((D, EMB_PAD), jnp.float32).at[:, :E].set(params["w_emb"])
    wemb = outw[:, None] * wemb_pad
    bias_emb = outb @ wemb_pad                            # (EMB_PAD,)

    # Exact 0/1 selection matrices: q = qkvs@(I,0,0,I,0), k = ..., v = ...
    I = jnp.eye(D, dtype=jnp.float32)
    Z = jnp.zeros((D, D), jnp.float32)
    sel_q = jnp.concatenate([I, Z, Z, I, Z], axis=0)      # (5D, D)
    sel_k = jnp.concatenate([Z, I, Z, Z, I], axis=0)
    sel_v = jnp.concatenate([Z, Z, I, Z, Z], axis=0)

    hid = np.arange(D) // dh
    pool = jnp.asarray((hid[:, None] == hid[None, :]).astype(np.float32))   # (D, D)

    # RoPE cos/sin expanded to full width -> one wide table [cos|cos|1|sin|sin].
    cos, sin = precompute_freqs_cos_sin(MAX_SEQ, dh)
    cos, sin = cos[:seq], sin[:seq]                       # (S, dh/2)
    cosf = jnp.tile(jnp.tile(cos, (1, 2 * H)), (batch, 1))   # (N, D)
    sinf = jnp.tile(jnp.tile(sin, (1, 2 * H)), (batch, 1))
    cs = jnp.concatenate([cosf, cosf, jnp.ones((N, D), jnp.float32), sinf, sinf],
                         axis=1)                          # (N, 5D)

    # ---- bf16 weight slab: lane offset 0, 16-aligned row offsets -------------
    wslab = jnp.zeros((WO["rows"], D5), jnp.float32)
    for l in range(L):
        wslab = wslab.at[WO["wext"] + l * D:WO["wext"] + (l + 1) * D, :].set(wext[l])
        wslab = wslab.at[WO["wo"] + l * D:WO["wo"] + (l + 1) * D, 0:D].set(wo[l])
        wslab = wslab.at[WO["wg"] + l * D:WO["wg"] + (l + 1) * D, 0:dff].set(wg[l])
        wslab = wslab.at[WO["wu"] + l * D:WO["wu"] + (l + 1) * D, 0:dff].set(wu[l])
        wslab = wslab.at[WO["wd"] + l * dff:WO["wd"] + (l + 1) * dff, 0:D].set(wd[l])
    wslab = wslab.at[WO["selq"]:WO["selq"] + D5, 0:D].set(sel_q)
    wslab = wslab.at[WO["selk"]:WO["selk"] + D5, 0:D].set(sel_k)
    wslab = wslab.at[WO["selv"]:WO["selv"] + D5, 0:D].set(sel_v)
    wslab = wslab.at[WO["pool"]:WO["pool"] + D, 0:D].set(pool)
    wslab = wslab.at[WO["wemb"]:WO["wemb"] + D, 0:EMB_PAD].set(wemb)
    wslab = wslab.astype(jnp.bfloat16)

    # ---- f32 slab: RoPE table + pre-broadcast, LN-folded bias rows -----------
    fslab = jnp.zeros((FO["rows"], D5), jnp.float32)
    fslab = fslab.at[FO["cs"]:FO["cs"] + N, :].set(cs)
    for l in range(L):
        fslab = fslab.at[FO["bqkv"] + l * N:FO["bqkv"] + (l + 1) * N, :].set(
            bias_qkv[l][None, :] * cs)
        fslab = fslab.at[FO["bg"] + l * N:FO["bg"] + (l + 1) * N, 0:dff].set(
            jnp.broadcast_to(bias_g[l][None, :], (N, dff)))
        fslab = fslab.at[FO["bu"] + l * N:FO["bu"] + (l + 1) * N, 0:dff].set(
            jnp.broadcast_to(bias_u[l][None, :], (N, dff)))
    fslab = fslab.at[FO["bemb"]:FO["bemb"] + N, 0:EMB_PAD].set(
        jnp.broadcast_to(bias_emb[None, :], (N, EMB_PAD)))

    return {"tok_emb": params["tok_emb"], "wslab": wslab, "fslab": fslab,
            "emb_size": E}


# ------------------------------- wrapper -------------------------------------
def transformer_emb_forward(src, kp):
    # Glue: embedding gather in plain JAX (emb=None path of Transformer.forward).
    x = kp["tok_emb"][src].astype(jnp.float32)              # (B, S, D)
    B, S, D = x.shape
    N = B * S
    E = kp["emb_size"]

    kernel = functools.partial(
        transformer_emb_kernel,
        n_layers=N_LAYERS, d_model=D, d_ff=D_FF, batch=B, seq=S, emb_pad=EMB_PAD)

    # TODO(synk): for large batch/seq workloads, add a "parallel" grid over the
    # token dimension (multiples of 8/16 rows) so the MXU fills 128/256-row
    # passes, the x-tile DMA pipelines, and v7x's second TensorCore engages;
    # at B*S=16 a grid would only add serial overhead.
    out_flat = pl.pallas_call(
        kernel,
        out_shape=jax.ShapeDtypeStruct((N, EMB_PAD), jnp.float32),
        in_specs=[pl.BlockSpec(memory_space=pltpu.MemorySpace.VMEM)] * 3,
        out_specs=pl.BlockSpec(memory_space=pltpu.MemorySpace.VMEM),
    )(x.reshape(N, D), kp["fslab"], kp["wslab"])

    return out_flat[:, :E].reshape(B, S, E)


# ------------------------- pure-JAX reference --------------------------------
def reference_forward(src, params):
    x = params["tok_emb"][src].astype(jnp.float32)
    B, S, D = x.shape
    cos, sin = precompute_freqs_cos_sin(MAX_SEQ, D_HEAD)
    cos = cos[:S][None, :, None, :]
    sin = sin[:S][None, :, None, :]
    scale = 1.0 / math.sqrt(D_HEAD)
    mask = jnp.tril(jnp.ones((S, S), dtype=bool))

    def ln(x, w, b):
        mu = x.mean(-1, keepdims=True)
        var = ((x - mu) ** 2).mean(-1, keepdims=True)
        return (x - mu) / jnp.sqrt(var + LN_EPS) * w + b

    def rope(t):
        d = D_HEAD // 2
        x1, x2 = t[..., :d], t[..., d:]
        return jnp.concatenate([x1 * cos - x2 * sin, x2 * cos + x1 * sin], axis=-1)

    for li in range(N_LAYERS):
        n1w, n1b, n2w, n2b = params["ln"][li]
        xn = ln(x, n1w, n1b)
        qkv = xn @ params["w_qkv"][li]
        q, k, v = jnp.split(qkv, 3, axis=-1)
        q = rope(q.reshape(B, S, N_HEADS, D_HEAD))
        k = rope(k.reshape(B, S, N_HEADS, D_HEAD))
        v = v.reshape(B, S, N_HEADS, D_HEAD)
        scores = jnp.einsum("bqhd,bkhd->bhqk", q, k) * scale
        scores = jnp.where(mask[None, None], scores, -jnp.inf)
        p = jax.nn.softmax(scores, axis=-1)
        att = jnp.einsum("bhqk,bkhd->bqhd", p, v).reshape(B, S, D)
        x = x + att @ params["w_o"][li]
        xn2 = ln(x, n2w, n2b)
        ff = (jax.nn.silu(xn2 @ params["w_gate"][li]) * (xn2 @ params["w_up"][li])) \
             @ params["w_down"][li]
        x = x + ff
    x = ln(x, params["out_ln"][0], params["out_ln"][1])
    return x @ params["w_emb"]


# --------------------------------- main ---------------------------------------
if __name__ == "__main__":
    key = jax.random.PRNGKey(0)
    ks = jax.random.split(key, 12)

    ln_w = 1.0 + 0.1 * jax.random.normal(ks[6], (N_LAYERS, 2, D_MODEL), jnp.float32)
    ln_b = 0.1 * jax.random.normal(ks[7], (N_LAYERS, 2, D_MODEL), jnp.float32)
    ln = jnp.stack([ln_w[:, 0], ln_b[:, 0], ln_w[:, 1], ln_b[:, 1]], axis=1)  # (L, 4, D)
    out_ln = jnp.stack(
        [1.0 + 0.1 * jax.random.normal(ks[8], (D_MODEL,), jnp.float32),
         0.1 * jax.random.normal(ks[9], (D_MODEL,), jnp.float32)], axis=0)    # (2, D)

    params = {
        "tok_emb": jax.random.normal(ks[0], (VOCAB, D_MODEL), jnp.float32),
        "w_qkv":  0.02 * jax.random.normal(ks[1], (N_LAYERS, D_MODEL, 3 * D_MODEL), jnp.float32),
        "w_o":    0.02 * jax.random.normal(ks[2], (N_LAYERS, D_MODEL, D_MODEL), jnp.float32),
        "w_gate": 0.02 * jax.random.normal(ks[3], (N_LAYERS, D_MODEL, D_FF), jnp.float32),
        "w_up":   0.02 * jax.random.normal(ks[4], (N_LAYERS, D_MODEL, D_FF), jnp.float32),
        "w_down": 0.02 * jax.random.normal(ks[5], (N_LAYERS, D_FF, D_MODEL), jnp.float32),
        "ln": ln,
        "out_ln": out_ln,
        "w_emb": 0.02 * jax.random.normal(ks[10], (D_MODEL, EMB_SIZE), jnp.float32),
    }

    # TODO(synk): dropout (resid_dropout / drop_p) is a no-op in eval mode and is
    # not implemented; grad-checkpointing is training-only and irrelevant here.

    src = jax.random.randint(ks[11], (BATCH, SEQ), 0, VOCAB)

    kparams = prepare_kernel_params(params, BATCH, SEQ)   # one-time host-side prep
    out = transformer_emb_forward(src, kparams)
    out = jax.block_until_ready(out)

    ref = jax.block_until_ready(reference_forward(src, params))
    np.testing.assert_allclose(np.asarray(out), np.asarray(ref), rtol=2e-2, atol=2e-2)

    print("KERNEL_OK")
</pallas_src>

<mosaic_0001>
module attributes {stable_mosaic.version = 11 : i64} {
  func.func @transformer_emb_kernel(%arg0: memref<16x32xf32, #tpu.memory_space<vmem>>, %arg1: memref<128x160xf32, #tpu.memory_space<vmem>>, %arg2: memref<928x160xbf16, #tpu.memory_space<vmem>>, %arg3: memref<16x128xf32, #tpu.memory_space<vmem>>) attributes {dimension_semantics = [], scalar_prefetch = 0 : i64, scratch_operands = 0 : i64, tpu.core_type = #tpu.core_type<tc>} {
    %c0 = arith.constant 0 : index
    %c0_0 = arith.constant 0 : index
    %0 = vector.load %arg0[%c0, %c0_0] : memref<16x32xf32, #tpu.memory_space<vmem>>, vector<16x32xf32>
    %c0_1 = arith.constant 0 : index
    %c0_2 = arith.constant 0 : index
    %1 = vector.load %arg1[%c0_1, %c0_2] : memref<128x160xf32, #tpu.memory_space<vmem>>, vector<16x160xf32>
    %c64 = arith.constant 64 : index
    %c0_3 = arith.constant 0 : index
    %2 = vector.load %arg2[%c64, %c0_3] : memref<928x160xbf16, #tpu.memory_space<vmem>>, vector<160x32xbf16>
    %c224 = arith.constant 224 : index
    %c0_4 = arith.constant 0 : index
    %3 = vector.load %arg2[%c224, %c0_4] : memref<928x160xbf16, #tpu.memory_space<vmem>>, vector<160x32xbf16>
    %c384 = arith.constant 384 : index
    %c0_5 = arith.constant 0 : index
    %4 = vector.load %arg2[%c384, %c0_5] : memref<928x160xbf16, #tpu.memory_space<vmem>>, vector<160x32xbf16>
    %c544 = arith.constant 544 : index
    %c0_6 = arith.constant 0 : index
    %5 = vector.load %arg2[%c544, %c0_6] : memref<928x160xbf16, #tpu.memory_space<vmem>>, vector<32x32xbf16>
    %6 = tpu.iota {dimensions = array<i32: 1>} : vector<2x8x8x32xi32>
    %7 = tpu.iota {dimensions = array<i32: 2>} : vector<2x8x8x32xi32>
    %8 = arith.cmpi sle, %7, %6 : vector<2x8x8x32xi32>
    %cst = arith.constant 0.000000e+00 : f32
    %cst_7 = arith.constant -1.000000e+30 : f32
    %9 = vector.broadcast %cst : f32 to vector<2x8x8x32xf32>
    %10 = vector.broadcast %cst_7 : f32 to vector<2x8x8x32xf32>
    %11 = arith.select %8, %9, %10 : vector<2x8x8x32xi1>, vector<2x8x8x32xf32>
    %cst_8 = arith.constant dense<0.000000e+00> : vector<16xf32>
    %12 = vector.multi_reduction <add>, %0, %cst_8 [1] : vector<16x32xf32> to vector<16xf32>
    %13 = vector.shape_cast %12 : vector<16xf32> to vector<16x1xf32>
    %cst_9 = arith.constant 3.200000e+01 : f32
    %14 = vector.broadcast %cst_9 : f32 to vector<16x1xf32>
    %15 = arith.divf %13, %14 : vector<16x1xf32>
    %16 = vector.broadcast %15 : vector<16x1xf32> to vector<16x32xf32>
    %17 = arith.subf %0, %16 : vector<16x32xf32>
    %18 = arith.mulf %17, %17 : vector<16x32xf32>
    %cst_10 = arith.constant dense<0.000000e+00> : vector<16xf32>
    %19 = vector.multi_reduction <add>, %18, %cst_10 [1] : vector<16x32xf32> to vector<16xf32>
    %20 = vector.shape_cast %19 : vector<16xf32> to vector<16x1xf32>
    %cst_11 = arith.constant 3.200000e+01 : f32
    %21 = vector.broadcast %cst_11 : f32 to vector<16x1xf32>
    %22 = arith.divf %20, %21 : vector<16x1xf32>
    %cst_12 = arith.constant 9.99999974E-6 : f32
    %23 = vector.broadcast %cst_12 : f32 to vector<16x1xf32>
    %24 = arith.addf %22, %23 : vector<16x1xf32>
    %25 = math.rsqrt %24 : vector<16x1xf32>
    %26 = vector.broadcast %25 : vector<16x1xf32> to vector<16x32xf32>
    %27 = arith.mulf %17, %26 : vector<16x32xf32>
    %c0_13 = arith.constant 0 : index
    %c0_14 = arith.constant 0 : index
    %28 = vector.load %arg2[%c0_13, %c0_14] : memref<928x160xbf16, #tpu.memory_space<vmem>>, vector<32x160xbf16>
    %29 = arith.truncf %27 : vector<16x32xf32> to vector<16x32xbf16>
    %cst_15 = arith.constant dense<0.000000e+00> : vector<16x160xf32>
    %30 = tpu.matmul %29, %28, %cst_15 {dimension_numbers = #tpu.dot_dimension_numbers<[1], [0], [0], [1], [0, 0, 1, 1], [], []>} : vector<16x32xbf16>, vector<32x160xbf16>, vector<16x160xf32> -> vector<16x160xf32>
    %c16 = arith.constant 16 : index
    %c0_16 = arith.constant 0 : index
    %31 = vector.load %arg1[%c16, %c0_16] : memref<128x160xf32, #tpu.memory_space<vmem>>, vector<16x160xf32>
    %32 = arith.mulf %30, %1 : vector<16x160xf32>
    %33 = arith.addf %32, %31 : vector<16x160xf32>
    %34 = arith.truncf %33 : vector<16x160xf32> to vector<16x160xbf16>
    %cst_17 = arith.constant dense<0.000000e+00> : vector<16x32xf32>
    %35 = tpu.matmul %34, %2, %cst_17 {dimension_numbers = #tpu.dot_dimension_numbers<[1], [0], [0], [1], [0, 0, 1, 1], [], []>} : vector<16x160xbf16>, vector<160x32xbf16>, vector<16x32xf32> -> vector<16x32xf32>
    %36 = arith.truncf %35 : vector<16x32xf32> to vector<16x32xbf16>
    %37 = vector.shape_cast %36 : vector<16x32xbf16> to vector<2x8x32xbf16>
    %cst_18 = arith.constant dense<0.000000e+00> : vector<16x32xf32>
    %38 = tpu.matmul %34, %3, %cst_18 {dimension_numbers = #tpu.dot_dimension_numbers<[1], [0], [0], [1], [0, 0, 1, 1], [], []>} : vector<16x160xbf16>, vector<160x32xbf16>, vector<16x32xf32> -> vector<16x32xf32>
    %39 = arith.truncf %38 : vector<16x32xf32> to vector<16x32xbf16>
    %40 = vector.shape_cast %39 : vector<16x32xbf16> to vector<2x8x32xbf16>
    %cst_19 = arith.constant dense<0.000000e+00> : vector<16x32xf32>
    %41 = tpu.matmul %34, %4, %cst_19 {dimension_numbers = #tpu.dot_dimension_numbers<[1], [0], [0], [1], [0, 0, 1, 1], [], []>} : vector<16x160xbf16>, vector<160x32xbf16>, vector<16x32xf32> -> vector<16x32xf32>
    %42 = vector.shape_cast %41 : vector<16x32xf32> to vector<2x8x32xf32>
    %43 = vector.shape_cast %37 : vector<2x8x32xbf16> to vector<2x8x1x32xbf16>
    %44 = vector.shape_cast %40 : vector<2x8x32xbf16> to vector<2x1x8x32xbf16>
    %45 = vector.broadcast %43 : vector<2x8x1x32xbf16> to vector<2x8x8x32xbf16>
    %46 = vector.broadcast %44 : vector<2x1x8x32xbf16> to vector<2x8x8x32xbf16>
    %47 = arith.mulf %45, %46 : vector<2x8x8x32xbf16>
    %48 = vector.shape_cast %47 : vector<2x8x8x32xbf16> to vector<128x32xbf16>
    %cst_20 = arith.constant dense<0.000000e+00> : vector<128x32xf32>
    %49 = tpu.matmul %48, %5, %cst_20 {dimension_numbers = #tpu.dot_dimension_numbers<[1], [0], [0], [1], [0, 0, 1, 1], [], []>} : vector<128x32xbf16>, vector<32x32xbf16>, vector<128x32xf32> -> vector<128x32xf32>
    %50 = vector.shape_cast %49 : vector<128x32xf32> to vector<2x8x8x32xf32>
    %51 = arith.addf %50, %11 : vector<2x8x8x32xf32>
    %cst_21 = arith.constant dense<0xFF800000> : vector<2x8x32xf32>
    %52 = vector.multi_reduction <maximumf>, %51, %cst_21 [2] : vector<2x8x8x32xf32> to vector<2x8x32xf32>
    %53 = vector.shape_cast %52 : vector<2x8x32xf32> to vector<2x8x1x32xf32>
    %54 = vector.broadcast %53 : vector<2x8x1x32xf32> to vector<2x8x8x32xf32>
    %55 = arith.subf %51, %54 : vector<2x8x8x32xf32>
    %56 = math.exp %55 : vector<2x8x8x32xf32>
    %cst_22 = arith.constant dense<0.000000e+00> : vector<2x8x32xf32>
    %57 = vector.multi_reduction <add>, %56, %cst_22 [2] : vector<2x8x8x32xf32> to vector<2x8x32xf32>
    %58 = vector.shape_cast %57 : vector<2x8x32xf32> to vector<2x8x1x32xf32>
    %59 = vector.shape_cast %42 : vector<2x8x32xf32> to vector<2x1x8x32xf32>
    %60 = vector.broadcast %59 : vector<2x1x8x32xf32> to vector<2x8x8x32xf32>
    %61 = arith.mulf %56, %60 : vector<2x8x8x32xf32>
    %cst_23 = arith.constant dense<0.000000e+00> : vector<2x8x32xf32>
    %62 = vector.multi_reduction <add>, %61, %cst_23 [2] : vector<2x8x8x32xf32> to vector<2x8x32xf32>
    %63 = vector.shape_cast %62 : vector<2x8x32xf32> to vector<2x8x1x32xf32>
    %64 = tpu.reciprocal %58 {approx = true} : vector<2x8x1x32xf32> -> vector<2x8x1x32xf32>
    %65 = arith.mulf %63, %64 : vector<2x8x1x32xf32>
    %66 = vector.shape_cast %65 : vector<2x8x1x32xf32> to vector<16x32xf32>
    %c576 = arith.constant 576 : index
    %c0_24 = arith.constant 0 : index
    %67 = vector.load %arg2[%c576, %c0_24] : memref<928x160xbf16, #tpu.memory_space<vmem>>, vector<32x32xbf16>
    %68 = arith.truncf %66 : vector<16x32xf32> to vector<16x32xbf16>
    %cst_25 = arith.constant dense<0.000000e+00> : vector<16x32xf32>
    %69 = tpu.matmul %68, %67, %cst_25 {dimension_numbers = #tpu.dot_dimension_numbers<[1], [0], [0], [1], [0, 0, 1, 1], [], []>} : vector<16x32xbf16>, vector<32x32xbf16>, vector<16x32xf32> -> vector<16x32xf32>
    %70 = arith.addf %0, %69 : vector<16x32xf32>
    %cst_26 = arith.constant dense<0.000000e+00> : vector<16xf32>
    %71 = vector.multi_reduction <add>, %70, %cst_26 [1] : vector<16x32xf32> to vector<16xf32>
    %72 = vector.shape_cast %71 : vector<16xf32> to vector<16x1xf32>
    %cst_27 = arith.constant 3.200000e+01 : f32
    %73 = vector.broadcast %cst_27 : f32 to vector<16x1xf32>
    %74 = arith.divf %72, %73 : vector<16x1xf32>
    %75 = vector.broadcast %74 : vector<16x1xf32> to vector<16x32xf32>
    %76 = arith.subf %70, %75 : vector<16x32xf32>
    %77 = arith.mulf %76, %76 : vector<16x32xf32>
    %cst_28 = arith.constant dense<0.000000e+00> : vector<16xf32>
    %78 = vector.multi_reduction <add>, %77, %cst_28 [1] : vector<16x32xf32> to vector<16xf32>
    %79 = vector.shape_cast %78 : vector<16xf32> to vector<16x1xf32>
    %cst_29 = arith.constant 3.200000e+01 : f32
    %80 = vector.broadcast %cst_29 : f32 to vector<16x1xf32>
    %81 = arith.divf %79, %80 : vector<16x1xf32>
    %cst_30 = arith.constant 9.99999974E-6 : f32
    %82 = vector.broadcast %cst_30 : f32 to vector<16x1xf32>
    %83 = arith.addf %81, %82 : vector<16x1xf32>
    %84 = math.rsqrt %83 : vector<16x1xf32>
    %85 = vector.broadcast %84 : vector<16x1xf32> to vector<16x32xf32>
    %86 = arith.mulf %76, %85 : vector<16x32xf32>
    %87 = arith.truncf %86 : vector<16x32xf32> to vector<16x32xbf16>
    %c640 = arith.constant 640 : index
    %c0_31 = arith.constant 0 : index
    %88 = vector.load %arg2[%c640, %c0_31] : memref<928x160xbf16, #tpu.memory_space<vmem>>, vector<32x64xbf16>
    %c704 = arith.constant 704 : index
    %c0_32 = arith.constant 0 : index
    %89 = vector.load %arg2[%c704, %c0_32] : memref<928x160xbf16, #tpu.memory_space<vmem>>, vector<32x64xbf16>
    %c48 = arith.constant 48 : index
    %c0_33 = arith.constant 0 : index
    %90 = vector.load %arg1[%c48, %c0_33] : memref<128x160xf32, #tpu.memory_space<vmem>>, vector<16x64xf32>
    %c80 = arith.constant 80 : index
    %c0_34 = arith.constant 0 : index
    %91 = vector.load %arg1[%c80, %c0_34] : memref<128x160xf32, #tpu.memory_space<vmem>>, vector<16x64xf32>
    %cst_35 = arith.constant dense<0.000000e+00> : vector<16x64xf32>
    %92 = tpu.matmul %87, %88, %cst_35 {dimension_numbers = #tpu.dot_dimension_numbers<[1], [0], [0], [1], [0, 0, 1, 1], [], []>} : vector<16x32xbf16>, vector<32x64xbf16>, vector<16x64xf32> -> vector<16x64xf32>
    %93 = arith.addf %92, %90 : vector<16x64xf32>
    %cst_36 = arith.constant dense<0.000000e+00> : vector<16x64xf32>
    %94 = tpu.matmul %87, %89, %cst_36 {dimension_numbers = #tpu.dot_dimension_numbers<[1], [0], [0], [1], [0, 0, 1, 1], [], []>} : vector<16x32xbf16>, vector<32x64xbf16>, vector<16x64xf32> -> vector<16x64xf32>
    %95 = arith.addf %94, %91 : vector<16x64xf32>
    %96 = arith.negf %93 : vector<16x64xf32>
    %97 = math.exp %96 : vector<16x64xf32>
    %cst_37 = arith.constant 1.000000e+00 : f32
    %98 = vector.broadcast %cst_37 : f32 to vector<16x64xf32>
    %99 = arith.addf %98, %97 : vector<16x64xf32>
    %100 = arith.divf %98, %99 : vector<16x64xf32>
    %101 = arith.mulf %93, %100 : vector<16x64xf32>
    %102 = arith.mulf %101, %95 : vector<16x64xf32>
    %c768 = arith.constant 768 : index
    %c0_38 = arith.constant 0 : index
    %103 = vector.load %arg2[%c768, %c0_38] : memref<928x160xbf16, #tpu.memory_space<vmem>>, vector<64x32xbf16>
    %104 = arith.truncf %102 : vector<16x64xf32> to vector<16x64xbf16>
    %cst_39 = arith.constant dense<0.000000e+00> : vector<16x32xf32>
    %105 = tpu.matmul %104, %103, %cst_39 {dimension_numbers = #tpu.dot_dimension_numbers<[1], [0], [0], [1], [0, 0, 1, 1], [], []>} : vector<16x64xbf16>, vector<64x32xbf16>, vector<16x32xf32> -> vector<16x32xf32>
    %106 = arith.addf %70, %105 : vector<16x32xf32>
    %cst_40 = arith.constant dense<0.000000e+00> : vector<16xf32>
    %107 = vector.multi_reduction <add>, %106, %cst_40 [1] : vector<16x32xf32> to vector<16xf32>
    %108 = vector.shape_cast %107 : vector<16xf32> to vector<16x1xf32>
    %cst_41 = arith.constant 3.200000e+01 : f32
    %109 = vector.broadcast %cst_41 : f32 to vector<16x1xf32>
    %110 = arith.divf %108, %109 : vector<16x1xf32>
    %111 = vector.broadcast %110 : vector<16x1xf32> to vector<16x32xf32>
    %112 = arith.subf %106, %111 : vector<16x32xf32>
    %113 = arith.mulf %112, %112 : vector<16x32xf32>
    %cst_42 = arith.constant dense<0.000000e+00> : vector<16xf32>
    %114 = vector.multi_reduction <add>, %113, %cst_42 [1] : vector<16x32xf32> to vector<16xf32>
    %115 = vector.shape_cast %114 : vector<16xf32> to vector<16x1xf32>
    %cst_43 = arith.constant 3.200000e+01 : f32
    %116 = vector.broadcast %cst_43 : f32 to vector<16x1xf32>
    %117 = arith.divf %115, %116 : vector<16x1xf32>
    %cst_44 = arith.constant 9.99999974E-6 : f32
    %118 = vector.broadcast %cst_44 : f32 to vector<16x1xf32>
    %119 = arith.addf %117, %118 : vector<16x1xf32>
    %120 = math.rsqrt %119 : vector<16x1xf32>
    %121 = vector.broadcast %120 : vector<16x1xf32> to vector<16x32xf32>
    %122 = arith.mulf %112, %121 : vector<16x32xf32>
    %c32 = arith.constant 32 : index
    %c0_45 = arith.constant 0 : index
    %123 = vector.load %arg2[%c32, %c0_45] : memref<928x160xbf16, #tpu.memory_space<vmem>>, vector<32x160xbf16>
    %124 = arith.truncf %122 : vector<16x32xf32> to vector<16x32xbf16>
    %cst_46 = arith.constant dense<0.000000e+00> : vector<16x160xf32>
    %125 = tpu.matmul %124, %123, %cst_46 {dimension_numbers = #tpu.dot_dimension_numbers<[1], [0], [0], [1], [0, 0, 1, 1], [], []>} : vector<16x32xbf16>, vector<32x160xbf16>, vector<16x160xf32> -> vector<16x160xf32>
    %c32_47 = arith.constant 32 : index
    %c0_48 = arith.constant 0 : index
    %126 = vector.load %arg1[%c32_47, %c0_48] : memref<128x160xf32, #tpu.memory_space<vmem>>, vector<16x160xf32>
    %127 = arith.mulf %125, %1 : vector<16x160xf32>
    %128 = arith.addf %127, %126 : vector<16x160xf32>
    %129 = arith.truncf %128 : vector<16x160xf32> to vector<16x160xbf16>
    %cst_49 = arith.constant dense<0.000000e+00> : vector<16x32xf32>
    %130 = tpu.matmul %129, %2, %cst_49 {dimension_numbers = #tpu.dot_dimension_numbers<[1], [0], [0], [1], [0, 0, 1, 1], [], []>} : vector<16x160xbf16>, vector<160x32xbf16>, vector<16x32xf32> -> vector<16x32xf32>
    %131 = arith.truncf %130 : vector<16x32xf32> to vector<16x32xbf16>
    %132 = vector.shape_cast %131 : vector<16x32xbf16> to vector<2x8x32xbf16>
    %cst_50 = arith.constant dense<0.000000e+00> : vector<16x32xf32>
    %133 = tpu.matmul %129, %3, %cst_50 {dimension_numbers = #tpu.dot_dimension_numbers<[1], [0], [0], [1], [0, 0, 1, 1], [], []>} : vector<16x160xbf16>, vector<160x32xbf16>, vector<16x32xf32> -> vector<16x32xf32>
    %134 = arith.truncf %133 : vector<16x32xf32> to vector<16x32xbf16>
    %135 = vector.shape_cast %134 : vector<16x32xbf16> to vector<2x8x32xbf16>
    %cst_51 = arith.constant dense<0.000000e+00> : vector<16x32xf32>
    %136 = tpu.matmul %129, %4, %cst_51 {dimension_numbers = #tpu.dot_dimension_numbers<[1], [0], [0], [1], [0, 0, 1, 1], [], []>} : vector<16x160xbf16>, vector<160x32xbf16>, vector<16x32xf32> -> vector<16x32xf32>
    %137 = vector.shape_cast %136 : vector<16x32xf32> to vector<2x8x32xf32>
    %138 = vector.shape_cast %132 : vector<2x8x32xbf16> to vector<2x8x1x32xbf16>
    %139 = vector.shape_cast %135 : vector<2x8x32xbf16> to vector<2x1x8x32xbf16>
    %140 = vector.broadcast %138 : vector<2x8x1x32xbf16> to vector<2x8x8x32xbf16>
    %141 = vector.broadcast %139 : vector<2x1x8x32xbf16> to vector<2x8x8x32xbf16>
    %142 = arith.mulf %140, %141 : vector<2x8x8x32xbf16>
    %143 = vector.shape_cast %142 : vector<2x8x8x32xbf16> to vector<128x32xbf16>
    %cst_52 = arith.constant dense<0.000000e+00> : vector<128x32xf32>
    %144 = tpu.matmul %143, %5, %cst_52 {dimension_numbers = #tpu.dot_dimension_numbers<[1], [0], [0], [1], [0, 0, 1, 1], [], []>} : vector<128x32xbf16>, vector<32x32xbf16>, vector<128x32xf32> -> vector<128x32xf32>
    %145 = vector.shape_cast %144 : vector<128x32xf32> to vector<2x8x8x32xf32>
    %146 = arith.addf %145, %11 : vector<2x8x8x32xf32>
    %cst_53 = arith.constant dense<0xFF800000> : vector<2x8x32xf32>
    %147 = vector.multi_reduction <maximumf>, %146, %cst_53 [2] : vector<2x8x8x32xf32> to vector<2x8x32xf32>
    %148 = vector.shape_cast %147 : vector<2x8x32xf32> to vector<2x8x1x32xf32>
    %149 = vector.broadcast %148 : vector<2x8x1x32xf32> to vector<2x8x8x32xf32>
    %150 = arith.subf %146, %149 : vector<2x8x8x32xf32>
    %151 = math.exp %150 : vector<2x8x8x32xf32>
    %cst_54 = arith.constant dense<0.000000e+00> : vector<2x8x32xf32>
    %152 = vector.multi_reduction <add>, %151, %cst_54 [2] : vector<2x8x8x32xf32> to vector<2x8x32xf32>
    %153 = vector.shape_cast %152 : vector<2x8x32xf32> to vector<2x8x1x32xf32>
    %154 = vector.shape_cast %137 : vector<2x8x32xf32> to vector<2x1x8x32xf32>
    %155 = vector.broadcast %154 : vector<2x1x8x32xf32> to vector<2x8x8x32xf32>
    %156 = arith.mulf %151, %155 : vector<2x8x8x32xf32>
    %cst_55 = arith.constant dense<0.000000e+00> : vector<2x8x32xf32>
    %157 = vector.multi_reduction <add>, %156, %cst_55 [2] : vector<2x8x8x32xf32> to vector<2x8x32xf32>
    %158 = vector.shape_cast %157 : vector<2x8x32xf32> to vector<2x8x1x32xf32>
    %159 = tpu.reciprocal %153 {approx = true} : vector<2x8x1x32xf32> -> vector<2x8x1x32xf32>
    %160 = arith.mulf %158, %159 : vector<2x8x1x32xf32>
    %161 = vector.shape_cast %160 : vector<2x8x1x32xf32> to vector<16x32xf32>
    %c608 = arith.constant 608 : index
    %c0_56 = arith.constant 0 : index
    %162 = vector.load %arg2[%c608, %c0_56] : memref<928x160xbf16, #tpu.memory_space<vmem>>, vector<32x32xbf16>
    %163 = arith.truncf %161 : vector<16x32xf32> to vector<16x32xbf16>
    %cst_57 = arith.constant dense<0.000000e+00> : vector<16x32xf32>
    %164 = tpu.matmul %163, %162, %cst_57 {dimension_numbers = #tpu.dot_dimension_numbers<[1], [0], [0], [1], [0, 0, 1, 1], [], []>} : vector<16x32xbf16>, vector<32x32xbf16>, vector<16x32xf32> -> vector<16x32xf32>
    %165 = arith.addf %106, %164 : vector<16x32xf32>
    %cst_58 = arith.constant dense<0.000000e+00> : vector<16xf32>
    %166 = vector.multi_reduction <add>, %165, %cst_58 [1] : vector<16x32xf32> to vector<16xf32>
    %167 = vector.shape_cast %166 : vector<16xf32> to vector<16x1xf32>
    %cst_59 = arith.constant 3.200000e+01 : f32
    %168 = vector.broadcast %cst_59 : f32 to vector<16x1xf32>
    %169 = arith.divf %167, %168 : vector<16x1xf32>
    %170 = vector.broadcast %169 : vector<16x1xf32> to vector<16x32xf32>
    %171 = arith.subf %165, %170 : vector<16x32xf32>
    %172 = arith.mulf %171, %171 : vector<16x32xf32>
    %cst_60 = arith.constant dense<0.000000e+00> : vector<16xf32>
    %173 = vector.multi_reduction <add>, %172, %cst_60 [1] : vector<16x32xf32> to vector<16xf32>
    %174 = vector.shape_cast %173 : vector<16xf32> to vector<16x1xf32>
    %cst_61 = arith.constant 3.200000e+01 : f32
    %175 = vector.broadcast %cst_61 : f32 to vector<16x1xf32>
    %176 = arith.divf %174, %175 : vector<16x1xf32>
    %cst_62 = arith.constant 9.99999974E-6 : f32
    %177 = vector.broadcast %cst_62 : f32 to vector<16x1xf32>
    %178 = arith.addf %176, %177 : vector<16x1xf32>
    %179 = math.rsqrt %178 : vector<16x1xf32>
    %180 = vector.broadcast %179 : vector<16x1xf32> to vector<16x32xf32>
    %181 = arith.mulf %171, %180 : vector<16x32xf32>
    %182 = arith.truncf %181 : vector<16x32xf32> to vector<16x32xbf16>
    %c672 = arith.constant 672 : index
    %c0_63 = arith.constant 0 : index
    %183 = vector.load %arg2[%c672, %c0_63] : memref<928x160xbf16, #tpu.memory_space<vmem>>, vector<32x64xbf16>
    %c736 = arith.constant 736 : index
    %c0_64 = arith.constant 0 : index
    %184 = vector.load %arg2[%c736, %c0_64] : memref<928x160xbf16, #tpu.memory_space<vmem>>, vector<32x64xbf16>
    %c64_65 = arith.constant 64 : index
    %c0_66 = arith.constant 0 : index
    %185 = vector.load %arg1[%c64_65, %c0_66] : memref<128x160xf32, #tpu.memory_space<vmem>>, vector<16x64xf32>
    %c96 = arith.constant 96 : index
    %c0_67 = arith.constant 0 : index
    %186 = vector.load %arg1[%c96, %c0_67] : memref<128x160xf32, #tpu.memory_space<vmem>>, vector<16x64xf32>
    %cst_68 = arith.constant dense<0.000000e+00> : vector<16x64xf32>
    %187 = tpu.matmul %182, %183, %cst_68 {dimension_numbers = #tpu.dot_dimension_numbers<[1], [0], [0], [1], [0, 0, 1, 1], [], []>} : vector<16x32xbf16>, vector<32x64xbf16>, vector<16x64xf32> -> vector<16x64xf32>
    %188 = arith.addf %187, %185 : vector<16x64xf32>
    %cst_69 = arith.constant dense<0.000000e+00> : vector<16x64xf32>
    %189 = tpu.matmul %182, %184, %cst_69 {dimension_numbers = #tpu.dot_dimension_numbers<[1], [0], [0], [1], [0, 0, 1, 1], [], []>} : vector<16x32xbf16>, vector<32x64xbf16>, vector<16x64xf32> -> vector<16x64xf32>
    %190 = arith.addf %189, %186 : vector<16x64xf32>
    %191 = arith.negf %188 : vector<16x64xf32>
    %192 = math.exp %191 : vector<16x64xf32>
    %cst_70 = arith.constant 1.000000e+00 : f32
    %193 = vector.broadcast %cst_70 : f32 to vector<16x64xf32>
    %194 = arith.addf %193, %192 : vector<16x64xf32>
    %195 = arith.divf %193, %194 : vector<16x64xf32>
    %196 = arith.mulf %188, %195 : vector<16x64xf32>
    %197 = arith.mulf %196, %190 : vector<16x64xf32>
    %c832 = arith.constant 832 : index
    %c0_71 = arith.constant 0 : index
    %198 = vector.load %arg2[%c832, %c0_71] : memref<928x160xbf16, #tpu.memory_space<vmem>>, vector<64x32xbf16>
    %199 = arith.truncf %197 : vector<16x64xf32> to vector<16x64xbf16>
    %cst_72 = arith.constant dense<0.000000e+00> : vector<16x32xf32>
    %200 = tpu.matmul %199, %198, %cst_72 {dimension_numbers = #tpu.dot_dimension_numbers<[1], [0], [0], [1], [0, 0, 1, 1], [], []>} : vector<16x64xbf16>, vector<64x32xbf16>, vector<16x32xf32> -> vector<16x32xf32>
    %201 = arith.addf %165, %200 : vector<16x32xf32>
    %cst_73 = arith.constant dense<0.000000e+00> : vector<16xf32>
    %202 = vector.multi_reduction <add>, %201, %cst_73 [1] : vector<16x32xf32> to vector<16xf32>
    %203 = vector.shape_cast %202 : vector<16xf32> to vector<16x1xf32>
    %cst_74 = arith.constant 3.200000e+01 : f32
    %204 = vector.broadcast %cst_74 : f32 to vector<16x1xf32>
    %205 = arith.divf %203, %204 : vector<16x1xf32>
    %206 = vector.broadcast %205 : vector<16x1xf32> to vector<16x32xf32>
    %207 = arith.subf %201, %206 : vector<16x32xf32>
    %208 = arith.mulf %207, %207 : vector<16x32xf32>
    %cst_75 = arith.constant dense<0.000000e+00> : vector<16xf32>
    %209 = vector.multi_reduction <add>, %208, %cst_75 [1] : vector<16x32xf32> to vector<16xf32>
    %210 = vector.shape_cast %209 : vector<16xf32> to vector<16x1xf32>
    %cst_76 = arith.constant 3.200000e+01 : f32
    %211 = vector.broadcast %cst_76 : f32 to vector<16x1xf32>
    %212 = arith.divf %210, %211 : vector<16x1xf32>
    %cst_77 = arith.constant 9.99999974E-6 : f32
    %213 = vector.broadcast %cst_77 : f32 to vector<16x1xf32>
    %214 = arith.addf %212, %213 : vector<16x1xf32>
    %215 = math.rsqrt %214 : vector<16x1xf32>
    %216 = vector.broadcast %215 : vector<16x1xf32> to vector<16x32xf32>
    %217 = arith.mulf %207, %216 : vector<16x32xf32>
    %218 = arith.truncf %217 : vector<16x32xf32> to vector<16x32xbf16>
    %c896 = arith.constant 896 : index
    %c0_78 = arith.constant 0 : index
    %219 = vector.load %arg2[%c896, %c0_78] : memref<928x160xbf16, #tpu.memory_space<vmem>>, vector<32x128xbf16>
    %c112 = arith.constant 112 : index
    %c0_79 = arith.constant 0 : index
    %220 = vector.load %arg1[%c112, %c0_79] : memref<128x160xf32, #tpu.memory_space<vmem>>, vector<16x128xf32>
    %cst_80 = arith.constant dense<0.000000e+00> : vector<16x128xf32>
    %221 = tpu.matmul %218, %219, %cst_80 {dimension_numbers = #tpu.dot_dimension_numbers<[1], [0], [0], [1], [0, 0, 1, 1], [], []>} : vector<16x32xbf16>, vector<32x128xbf16>, vector<16x128xf32> -> vector<16x128xf32>
    %222 = arith.addf %221, %220 : vector<16x128xf32>
    %c0_81 = arith.constant 0 : index
    %c0_82 = arith.constant 0 : index
    %223 = vector.load %arg3[%c0_81, %c0_82] : memref<16x128xf32, #tpu.memory_space<vmem>>, vector<16x128xf32>
    tpu.vector_store %arg3[%c0_81, %c0_82], %222 {strides = array<i32>} : memref<16x128xf32, #tpu.memory_space<vmem>>, vector<16x128xf32>,
    return
  }
}

</mosaic_0001>

<bundles_post_ra>
// kernel: tpu_custom_call.1
= control target key start
LH: loop header
LB: loop body
LE: loop exit
PB: predicated region body
PF: predicated region fallthrough
CT: control target
= control target key end

     0   :  { %vm104_vm0 = vcmask 261120   ;;  %s5256_s0 = inlined_call_operand.vmem [shape: f32[16,32], index: 0, kind: input, shape index: {}]   ;;  %s5257_s1 = inlined_call_operand.vmem [shape: f32[128,160], index: 1, kind: input, shape index: {}]   ;;  %s5258_s2 = inlined_call_operand.vmem [shape: bf16[928,160], index: 2, kind: input, shape index: {}]   ;;  %s5259_s3 = inlined_call_operand.hbm [shape: f32[16,128], index: 3, kind: output, shape index: {}]  }
   0x1   :  { %v16_v0 = vld [vmem:[%s5256_s0] sm:$0xff]  ;;  %v17_v1 = vld [vmem:[%s5256_s0 + $0x8] sm:$0xff] }
   0x2   :  { %v105_v2 = vsel %vm104_vm0, %v16_v0, 0.0  ;;  %v108_v3 = vsel %vm104_vm0, %v17_v1, 0.0 }
   0x3   :  { %106 = vadd.xlane.f32.xlu0 %v105_v2 }
   0x7   :  { %109 = vadd.xlane.f32.xlu0 %v108_v3 }
   0x8   :  { %8 = vsyncpa [#allocation3], 0  ;;  %v3727_v14 = vld [vmem:[%s5258_s2 + $0x4] ss:$8 sps:$4 sm:$0xff]   ;;  %v3729_v15 = vld [vmem:[%s5258_s2] ss:$8 sps:$4 sm:$0xff]  }
   0x9   :  { %v3730_v16 = vld [vmem:[%s5258_s2 + $0x14] ss:$8 sps:$4 sm:$0xff]   ;;  %160 = vmatprep.subr.bf16.mxu0 %v3727_v14  ;;  %v4019_v17 = vmov 0   ;;  %v3732_v18 = vld [vmem:[%s5258_s2 + $0x10] ss:$8 sps:$4 sm:$0xff]   ;;  %v18_v50 = vld [vmem:[%s5257_s1] sm:$0xff] }
   0xa   :  { %192 = vmatprep.mubr.bf16.mxu0 %v4019_v17  ;;  %161 = vmatpush1.bf16.msra.mxu0 %v3729_v15  ;;  %v3733_v19 = vld [vmem:[%s5258_s2 + $0x40] ss:$8 sps:$4 sm:$0xff]   ;;  %v3735_v20 = vld [vmem:[%s5258_s2 + $0x50] ss:$8 sps:$4 sm:$0xff]   ;;  %vm1479_vm8 = vcmask 1041409   ;;  %vm4023_vm9 = vmmov 0  }
   0xb   :  { %280 = vmatprep.subr.bf16.mxu1 %v4019_v17  ;;  %162 = vmatprep.subr.bf16.mxu0 %v3730_v16  ;;  %v3737_v21 = vld [vmem:[%s5258_s2 + $0x60] ss:$8 sps:$4 sm:$0xff]   ;;  %v3739_v22 = vld [vmem:[%s5258_s2 + $0x70] ss:$8 sps:$4 sm:$0xff]   ;;  %vm1481_vm10 = vcmask 1042434   ;;  %vm1483_vm11 = vcmask 1043459  }
   0xc   :  { %281 = vmatpush1.bf16.msra.mxu1 %v3733_v19  ;;  %v3741_v23 = vld [vmem:[%s5258_s2 + $0x80] ss:$8 sps:$4 sm:$0xff]   ;;  %v3743_v24 = vld [vmem:[%s5258_s2 + $0x90] ss:$8 sps:$4 sm:$0xff]   ;;  %vm1485_vm12 = vcmask 1044484   ;;  %vm1487_vm13 = vcmask 1045509  }
   0xd   :  { %282 = vmatprep.subr.bf16.mxu1 %v4019_v17  ;;  %v3745_v25 = vld [vmem:[%s5258_s2 + $0xa0] ss:$8 sps:$4 sm:$0xff]   ;;  %v3747_v26 = vld [vmem:[%s5258_s2 + $0xb0] ss:$8 sps:$4 sm:$0xff]   ;;  %vm1489_vm14 = vcmask 1046534   ;;  %vm1491_vm15 = vcmask 1047559  }
   0xe   :  { %163 = vmatpush1.bf16.msra.mxu0 %v3732_v18  ;;  %v3734_v37 = vld [vmem:[%s5258_s2 + $0xe0] ss:$8 sps:$4 sm:$0xff]   ;;  %v3736_v39 = vld [vmem:[%s5258_s2 + $0xf0] ss:$8 sps:$4 sm:$0xff]  }
   0xf   :  { %382 = vmatprep.subr.bf16.mxu0 %v4019_v17  ;;  %v3738_v40 = vld [vmem:[%s5258_s2 + $0x100] ss:$8 sps:$4 sm:$0xff]   ;;  %v3740_v41 = vld [vmem:[%s5258_s2 + $0x110] ss:$8 sps:$4 sm:$0xff]  }
  0x10   :  { %283 = vmatpush1.bf16.msra.mxu1 %v3735_v20  ;;  %v3742_v42 = vld [vmem:[%s5258_s2 + $0x120] ss:$8 sps:$4 sm:$0xff]   ;;  %v3744_v43 = vld [vmem:[%s5258_s2 + $0x130] ss:$8 sps:$4 sm:$0xff]  }
  0x11   :  { %284 = vmatprep.subr.bf16.mxu1 %v4019_v17  ;;  %v3746_v44 = vld [vmem:[%s5258_s2 + $0x140] ss:$8 sps:$4 sm:$0xff]   ;;  %v3748_v45 = vld [vmem:[%s5258_s2 + $0x150] ss:$8 sps:$4 sm:$0xff]  }
  0x12   :  { %v3749_v46 = vld [vmem:[%s5258_s2 + $0xc0] ss:$8 sps:$4 sm:$0xff]   ;;  %v3751_v48 = vld [vmem:[%s5258_s2 + $0xd0] ss:$8 sps:$4 sm:$0xff]  }
  0x13   :  { %v3750_v47 = vld [vmem:[%s5258_s2 + $0x160] ss:$8 sps:$4 sm:$0xff]   ;;  %v3752_v49 = vld [vmem:[%s5258_s2 + $0x170] ss:$8 sps:$4 sm:$0xff]  }
  0x14   :  { %285 = vmatpush1.bf16.msra.mxu1 %v3737_v21  ;;  %v19_v51 = vld [vmem:[%s5257_s1 + $0x8] sm:$0xff]  ;;  %v20_v53 = vld [vmem:[%s5257_s1 + $0x10] sm:$0xff]  ;;  %v21_v56 = vld [vmem:[%s5257_s1 + $0x18] sm:$0xff]  ;;  %v86_v21 = vlaneseq }
  0x15   :  { %286 = vmatprep.subr.bf16.mxu1 %v4019_v17  ;;  %v203_v57 = vld [vmem:[%s5257_s1 + $0x20] sm:$0xff]  ;;  %v205_v60 = vld [vmem:[%s5257_s1 + $0x30] sm:$0xff]  ;;  %v204_v61 = vld [vmem:[%s5257_s1 + $0x28] sm:$0xff] }
  0x16   :  { %v3759_v14 = vld [vmem:[%s5258_s2 + $0x1e0] ss:$8 sps:$4 sm:$0xff]   ;;  %v3760_v15 = vld [vmem:[%s5258_s2 + $0x1f0] ss:$8 sps:$4 sm:$0xff]  }
  0x17   :  { %v3761_v16 = vld [vmem:[%s5258_s2 + $0x200] ss:$8 sps:$4 sm:$0xff]   ;;  %v3762_v18 = vld [vmem:[%s5258_s2 + $0x210] ss:$8 sps:$4 sm:$0xff]  }
  0x18   :  { %287 = vmatpush1.bf16.msra.mxu1 %v3739_v22  ;;  %v3763_v19 = vld [vmem:[%s5258_s2 + $0x220] ss:$8 sps:$4 sm:$0xff]   ;;  %v3764_v20 = vld [vmem:[%s5258_s2 + $0x230] ss:$8 sps:$4 sm:$0xff]   ;;  %v4020_v22 = vmov 1966171168  }
  0x19   :  { %288 = vmatprep.subr.bf16.mxu1 %v4019_v17 }
  0x1c   :  { %289 = vmatpush1.bf16.msra.mxu1 %v3741_v23  ;;  %v528_v23 = vunpack.c.l.s4 %v4020_v22 }
  0x1d   :  { %290 = vmatprep.subr.bf16.mxu1 %v4019_v17 }
  0x20   :  { %291 = vmatpush1.bf16.msra.mxu1 %v3743_v24  ;;  %v4224_v24 = vshrl.u32 %v86_v21, 7 }
  0x21   :  { %292 = vmatprep.subr.bf16.mxu1 %v4019_v17 }
  0x22   :  { %vm90_vm1 = vcmp.le.s32.totalorder %v4224_v24, 2  ;;  %vm88_vm2 = vcmp.le.s32.totalorder %v4224_v24, 0  ;;  %vm91_vm3 = vcmp.le.s32.totalorder %v4224_v24, 3  ;;  %vm89_vm4 = vcmp.le.s32.totalorder %v4224_v24, 1 }
  0x23   :  { %vm94_vm5 = vcmp.le.s32.totalorder %v4224_v24, 6  ;;  %vm92_vm6 = vcmp.le.s32.totalorder %v4224_v24, 4  ;;  %vm93_vm7 = vcmp.le.s32.totalorder %v4224_v24, 5 }
  0x24   :  { %293 = vmatpush1.bf16.msra.mxu1 %v3745_v25  ;;  %v529_v25 = vunpack.c.0.s8 %v528_v23 }
  0x25   :  { %294 = vmatprep.subr.bf16.mxu1 %v4019_v17 }
  0x28   :  { %295 = vmatpush1.bf16.msra.mxu1 %v3747_v26 }
  0x29   :  { %296 = vmatprep.subr.bf16.mxu1 %v4019_v17 }
  0x2c   :  { %297 = vmatpush1.bf16.msra.mxu1 %v3749_v46 }
  0x2d   :  { %298 = vmatprep.subr.bf16.mxu1 %v4019_v17 }
  0x30   :  { %299 = vmatpush1.bf16.msra.mxu1 %v3751_v48 }
  0x31   :  { %484 = vmatprep.subr.bf16.mxu1 %v4019_v17 }
  0x90   :  { %v107_v4 = vpop.xlane.xlu0 %106 }
  0x91   :  { %v112_v5 = vmul.f32 0.03125, %v107_v4 }
  0x93   :  { %v114_v6 = vsub.f32 %v16_v0, %v112_v5  ;;  %v206_v0 = vld [vmem:[%s5257_s1 + $0x38] sm:$0xff] }
  0x94   :  { %v110_v7 = vpop.xlane.xlu0 %109 }
  0x95   :  { %v113_v8 = vmul.f32 0.03125, %v110_v7  ;;  %v116_v9 = vmul.f32 %v114_v6, %v114_v6 }
  0x97   :  { %v115_v10 = vsub.f32 %v17_v1, %v113_v8  ;;  %v118_v11 = vsel %vm104_vm0, %v116_v9, 0.0  ;;  %v3753_v8 = vld [vmem:[%s5258_s2 + $0x180] ss:$8 sps:$4 sm:$0xff]   ;;  %v3754_v9 = vld [vmem:[%s5258_s2 + $0x190] ss:$8 sps:$4 sm:$0xff]  }
  0x98   :  { %119 = vadd.xlane.f32.xlu1 %v118_v11  ;;  %v3756_v11 = vld [vmem:[%s5258_s2 + $0x1b0] ss:$8 sps:$4 sm:$0xff]  }
  0x99   :  { %v117_v12 = vmul.f32 %v115_v10, %v115_v10 }
  0x9b   :  { %v121_v13 = vsel %vm104_vm0, %v117_v12, 0.0  ;;  %v3757_v12 = vld [vmem:[%s5258_s2 + $0x1c0] ss:$8 sps:$4 sm:$0xff]  }
  0x9c   :  { %122 = vadd.xlane.f32.xlu1 %v121_v13  ;;  %v3758_v13 = vld [vmem:[%s5258_s2 + $0x1d0] ss:$8 sps:$4 sm:$0xff]  }
 0x125   :  { %v120_v27 = vpop.xlane.xlu1 %119 }
 0x126   :  { %v124_v28 = vmul.f32 0.03125, %v120_v27 }
 0x128   :  { %v126_v29 = vadd.f32 1e-05, %v124_v28 }
 0x129   :  { %v123_v30 = vpop.xlane.xlu1 %122 }
 0x12a   :  { %v125_v31 = vmul.f32 0.03125, %v123_v30  ;;  %3793 = vrsqrt.f32 %v126_v29  ;;  %v4227_v30 = vsub.s32 %v529_v25, %v4224_v24 }
 0x12c   :  { %v127_v32 = vadd.f32 1e-05, %v125_v31 }
 0x12e   :  { %3795 = vrsqrt.f32 %v127_v32 }
 0x134   :  { %v3794_v33 = vpop.eup %3793 }
 0x135   :  { %v130_v35 = vmul.f32 %v3794_v33, %v114_v6 }
 0x138   :  { %v3796_v34 = vpop.eup %3795 }
 0x139   :  { %v131_v36 = vmul.f32 %v3796_v34, %v115_v10  ;;  %v3755_v10 = vld [vmem:[%s5258_s2 + $0x1a0] ss:$8 sps:$4 sm:$0xff]  }
 0x13b   :  { %v136_v38 = vpack.c.bf16 %v131_v36, %v130_v35 }
 0x13d   :  { %3411 = vmatmul.mubr.msk.bf16.vlgmr.msra.gmra.mrb[0].mxu0 %vm104_vm0, %v136_v38 }
 0x13e   :  { %383 = vmatpush1.bf16.msra.mxu0 %v3734_v37 }
 0x13f   :  { %384 = vmatprep.subr.bf16.mxu0 %v4019_v17 }
 0x142   :  { %385 = vmatpush1.bf16.msra.mxu0 %v3736_v39 }
 0x143   :  { %386 = vmatprep.subr.bf16.mxu0 %v4019_v17 }
 0x146   :  { %387 = vmatpush1.bf16.msra.mxu0 %v3738_v40 }
 0x147   :  { %388 = vmatprep.subr.bf16.mxu0 %v4019_v17 }
 0x14a   :  { %389 = vmatpush1.bf16.msra.mxu0 %v3740_v41 }
 0x14b   :  { %390 = vmatprep.subr.bf16.mxu0 %v4019_v17 }
 0x14e   :  { %391 = vmatpush1.bf16.msra.mxu0 %v3742_v42 }
 0x14f   :  { %392 = vmatprep.subr.bf16.mxu0 %v4019_v17 }
 0x152   :  { %393 = vmatpush1.bf16.msra.mxu0 %v3744_v43 }
 0x153   :  { %394 = vmatprep.subr.bf16.mxu0 %v4019_v17 }
 0x156   :  { %395 = vmatpush1.bf16.msra.mxu0 %v3746_v44  ;;  %v4236_v44 = vsub.s32 0, %v4224_v24 }
 0x157   :  { %396 = vmatprep.subr.bf16.mxu0 %v4019_v17 }
 0x15a   :  { %397 = vmatpush1.bf16.msra.mxu0 %v3748_v45 }
 0x15b   :  { %398 = vmatprep.subr.bf16.mxu0 %v4019_v17 }
 0x15e   :  { %399 = vmatpush1.bf16.msra.mxu0 %v3750_v47 }
 0x15f   :  { %400 = vmatprep.subr.bf16.mxu0 %v4019_v17 }
 0x162   :  { %401 = vmatpush1.bf16.msra.mxu0 %v3752_v49 }
 0x163   :  { %3599 = vmatprep.subr.bf16.mxu0 %v3763_v19 }
 0x210   :  { %v194_v52 = vpop.f32.mrb[0].mxu0 }
 0x211   :  { %v207_v54 = vmul.f32 %v194_v52, %v18_v50  ;;  %v196_v55 = vpop.f32.mrb[1].mxu0 }
 0x212   :  { %v208_v58 = vmul.f32 %v196_v55, %v19_v51  ;;  %v198_v59 = vpop.f32.mrb[2].mxu0 }
 0x213   :  { %v209_v62 = vmul.f32 %v198_v59, %v20_v53  ;;  %v200_v63 = vpop.f32.mrb[3].mxu0  ;;  %v211_v2 = vadd.f32 %v207_v54, %v203_v57 }
 0x214   :  { %v210_v1 = vmul.f32 %v200_v63, %v21_v56  ;;  %v212_v4 = vadd.f32 %v208_v58, %v204_v61 }
 0x215   :  { %v213_v3 = vadd.f32 %v209_v62, %v205_v60 }
 0x216   :  { %v214_v5 = vadd.f32 %v210_v1, %v206_v0 }
 0x217   :  { %v215_v6 = vpack.c.bf16 %v213_v3, %v211_v2 }
 0x218   :  { %v216_v7 = vpack.c.bf16 %v214_v5, %v212_v4 }
 0x21a   :  { %3422 = vmatprep.mubr.msk.bf16.mxu1 %vm104_vm0, %v216_v7  ;;  %3433 = vmatprep.mubr.msk.bf16.mxu0 %vm104_vm0, %v216_v7 }
 0x21b   :  { %313 = vmatmul.mubr.bf16.vlgmr.msra.gmra.mrb[0].mxu1 %v215_v6  ;;  %415 = vmatmul.mubr.bf16.vlgmr.msra.gmra.mrb[4].mxu0 %v215_v6 }
 0x21c   :  { %485 = vmatpush1.bf16.msra.mxu1 %v3753_v8  ;;  %3444 = vmatprep.mubr.msk.bf16.mxu1 %vm104_vm0, %v216_v7 }
 0x21d   :  { %486 = vmatprep.subr.bf16.mxu1 %v4019_v17  ;;  %3600 = vmatpush3.bf16.msra.mxu0 %v3763_v19 }
 0x21e   :  { %3601 = vmatprep.subr.bf16.mxu0 %v3764_v20 }
 0x220   :  { %487 = vmatpush1.bf16.msra.mxu1 %v3754_v9 }
 0x221   :  { %488 = vmatprep.subr.bf16.mxu1 %v4019_v17  ;;  %3602 = vmatpush3.bf16.msra.mxu0 %v3764_v20 }
 0x224   :  { %489 = vmatpush1.bf16.msra.mxu1 %v3755_v10 }
 0x225   :  { %490 = vmatprep.subr.bf16.mxu1 %v4019_v17 }
 0x228   :  { %491 = vmatpush1.bf16.msra.mxu1 %v3756_v11 }
 0x229   :  { %492 = vmatprep.subr.bf16.mxu1 %v4019_v17 }
 0x22c   :  { %493 = vmatpush1.bf16.msra.mxu1 %v3757_v12 }
 0x22d   :  { %494 = vmatprep.subr.bf16.mxu1 %v4019_v17 }
 0x230   :  { %495 = vmatpush1.bf16.msra.mxu1 %v3758_v13 }
 0x231   :  { %496 = vmatprep.subr.bf16.mxu1 %v4019_v17 }
 0x234   :  { %497 = vmatpush1.bf16.msra.mxu1 %v3759_v14 }
 0x235   :  { %498 = vmatprep.subr.bf16.mxu1 %v4019_v17 }
 0x238   :  { %499 = vmatpush1.bf16.msra.mxu1 %v3760_v15 }
 0x239   :  { %500 = vmatprep.subr.bf16.mxu1 %v4019_v17 }
 0x23c   :  { %501 = vmatpush1.bf16.msra.mxu1 %v3761_v16 }
 0x23d   :  { %502 = vmatprep.subr.bf16.mxu1 %v4019_v17 }
 0x240   :  { %503 = vmatpush1.bf16.msra.mxu1 %v3762_v18 }
 0x243   :  { %517 = vmatmul.mubr.bf16.vlgmr.msra.gmra.mrb[4].mxu1 %v215_v6 }
 0x2ee   :  { %v314_v26 = vpop.f32.mrb[0].mxu1  ;;  %v416_v27 = vpop.f32.mrb[4].mxu0 }
 0x2ef   :  { %v316_v28 = vpop.f32.mrb[1].mxu1  ;;  %v418_v29 = vpop.f32.mrb[5].mxu0  ;;  %v4233_v43 = vpack.c.bf16 %v416_v27, %v416_v27 }
 0x2f0   :  { %v317_v31 = vpop.f32.mrb[2].mxu1  ;;  %v419_v32 = vpop.f32.mrb[6].mxu0 }
 0x2f1   :  { %v321_v33 = vpack.c.bf16 %v317_v31, %v314_v26  ;;  %v3445_v34 = vpack.c.bf16 %v317_v31, %v317_v31  ;;  %v319_v35 = vpop.f32.mrb[3].mxu1  ;;  %v421_v36 = vpop.f32.mrb[7].mxu0  ;;  %v4238_v45 = vpack.c.bf16 %v419_v32, %v419_v32 }
 0x2f3   :  { %v533_v37 = vrot.slane %v321_v33, %v4227_v30  ;;  %v540_v38 = vrot.slane %v3445_v34, %v4227_v30 }
 0x2f5   :  { %v541_v39 = vcombine.high %v533_v37, %v533_v37  ;;  %v542_v40 = vcombine.high %v540_v38, %v540_v38  ;;  %v549_v41 = vrot.slane %v533_v37, %v4227_v30  ;;  %v556_v42 = vrot.slane %v540_v38, %v4227_v30 }
 0x2f7   :  { %v563_v46 = vrot.slane %v541_v39, %v4227_v30  ;;  %v4242_v47 = vrot.slane %v542_v40, %v4227_v30  ;;  %v571_v48 = vcombine.high %v549_v41, %v549_v41  ;;  %v4244_v49 = vcombine.high %v556_v42, %v556_v42 }
 0x2f8   :  { %v576_v50 = vunpack.i.h.s16 %v549_v41  ;;  %v584_v51 = vunpack.i.h.s16 %v556_v42  ;;  %v3448_v52 = vpack.i.b16 %v549_v41, %v549_v41  ;;  %v3452_v53 = vpack.i.b16 %v556_v42, %v556_v42 }
 0x2f9   :  { %v573_v54 = vcombine.high %v563_v46, %v563_v46  ;;  %v4248_v55 = vcombine.high %v4242_v47, %v4242_v47  ;;  %v578_v56 = vunpack.i.h.s16 %v563_v46  ;;  %v580_v57 = vunpack.i.h.s16 %v571_v48 }
 0x2fa   :  { %v586_v58 = vunpack.i.h.s16 %v4242_v47  ;;  %v588_v59 = vunpack.i.h.s16 %v4244_v49  ;;  %v599_v60 = vpack.i.b16 %v576_v50, %v576_v50  ;;  %v3449_v61 = vpack.i.b16 %v563_v46, %v563_v46 }
 0x2fb   :  { %v582_v62 = vunpack.i.h.s16 %v573_v54  ;;  %v590_v63 = vunpack.i.h.s16 %v4248_v55  ;;  %v601_v0 = vpack.i.b16 %v578_v56, %v578_v56  ;;  %v3450_v1 = vpack.i.b16 %v571_v48, %v571_v48 }
 0x2fc   :  { %v603_v2 = vpack.i.b16 %v580_v57, %v580_v57  ;;  %v3451_v3 = vpack.i.b16 %v573_v54, %v573_v54  ;;  %v607_v4 = vpack.i.b16 %v584_v51, %v584_v51  ;;  %v3453_v5 = vpack.i.b16 %v4242_v47, %v4242_v47 }
 0x2fd   :  { %v605_v6 = vpack.i.b16 %v582_v62, %v582_v62  ;;  %v609_v7 = vpack.i.b16 %v586_v58, %v586_v58  ;;  %v3454_v8 = vpack.i.b16 %v4244_v49, %v4244_v49  ;;  %v611_v9 = vpack.i.b16 %v588_v59, %v588_v59 }
 0x2fe   :  { %v3455_v10 = vpack.i.b16 %v4248_v55, %v4248_v55  ;;  %v613_v11 = vpack.i.b16 %v590_v63, %v590_v63  ;;  %v617_v12 = vrot.slane %v3448_v52, %v4236_v44  ;;  %v621_v13 = vrot.slane %v599_v60, %v4236_v44 }
 0x2ff   :  { %v625_v14 = vrot.slane %v3449_v61, %v4236_v44  ;;  %v629_v15 = vrot.slane %v601_v0, %v4236_v44  ;;  %v649_v16 = vrot.slane %v3452_v53, %v4236_v44  ;;  %v653_v18 = vrot.slane %v607_v4, %v4236_v44 }
 0x300   :  { %v679_v19 = vpack.i.b16 %v617_v12, %v617_v12  ;;  %v686_v20 = vpack.i.b16 %v621_v13, %v621_v13  ;;  %v633_v21 = vrot.slane %v3450_v1, %v4236_v44  ;;  %v637_v22 = vrot.slane %v603_v2, %v4236_v44 }
 0x301   :  { %v693_v23 = vpack.i.b16 %v625_v14, %v625_v14  ;;  %v700_v25 = vpack.i.b16 %v629_v15, %v629_v15  ;;  %v735_v26 = vpack.i.b16 %v649_v16, %v649_v16  ;;  %v742_v27 = vpack.i.b16 %v653_v18, %v653_v18 }
 0x302   :  { %v684_v28 = vrot.slane %v679_v19, %v4236_v44  ;;  %v691_v29 = vrot.slane %v686_v20, %v4236_v44  ;;  %v707_v31 = vpack.i.b16 %v633_v21, %v633_v21  ;;  %v714_v32 = vpack.i.b16 %v637_v22, %v637_v22 }
 0x303   :  { %v698_v33 = vrot.slane %v693_v23, %v4236_v44  ;;  %v705_v34 = vrot.slane %v700_v25, %v4236_v44  ;;  %v641_v35 = vrot.slane %v3451_v3, %v4236_v44  ;;  %v645_v36 = vrot.slane %v605_v6, %v4236_v44 }
 0x304   :  { %v790_v37 = vmul.bf16 %v4233_v43, %v684_v28  ;;  %v791_v38 = vmul.bf16 %v4233_v43, %v691_v29  ;;  %v712_v39 = vrot.slane %v707_v31, %v4236_v44  ;;  %v719_v40 = vrot.slane %v714_v32, %v4236_v44 }
 0x305   :  { %v792_v41 = vmul.bf16 %v4233_v43, %v698_v33  ;;  %v793_v42 = vmul.bf16 %v4233_v43, %v705_v34  ;;  %v721_v46 = vpack.i.b16 %v641_v35, %v641_v35  ;;  %v728_v47 = vpack.i.b16 %v645_v36, %v645_v36 }
 0x306   :  { %v3456_v48 = vcombine.low %v790_v37, %v791_v38  ;;  %v794_v49 = vmul.bf16 %v4233_v43, %v712_v39  ;;  %v795_v50 = vmul.bf16 %v4233_v43, %v719_v40  ;;  %v740_v51 = vrot.slane %v735_v26, %v4236_v44 }
 0x307   :  { %v3457_v52 = vcombine.low %v792_v41, %v793_v42  ;;  %v726_v53 = vrot.slane %v721_v46, %v4236_v44  ;;  %v733_v54 = vrot.slane %v728_v47, %v4236_v44  ;;  %v747_v55 = vrot.slane %v742_v27, %v4236_v44 }
 0x308   :  { %3603 = vmatprep.mubr.msk.bf16.mxu0 %vm104_vm0, %v3456_v48  ;;  %v3458_v56 = vcombine.low %v794_v49, %v795_v50  ;;  %v798_v57 = vmul.bf16 %v4238_v45, %v740_v51  ;;  %v657_v58 = vrot.slane %v3453_v5, %v4236_v44  ;;  %v661_v59 = vrot.slane %v609_v7, %v4236_v44 }
 0x309   :  { %3604 = vmatmul.mubr.msk.bf16.vlgmr.msra.gmra.mrb[8].mxu0 %vm104_vm0, %v3457_v52  ;;  %v796_v60 = vmul.bf16 %v4233_v43, %v726_v53  ;;  %v797_v61 = vmul.bf16 %v4233_v43, %v733_v54  ;;  %v799_v62 = vmul.bf16 %v4238_v45, %v747_v55  ;;  %v665_v63 = vrot.slane %v3454_v8, %v4236_v44 }
 0x30a   :  { %3607 = vmatprep.mubr.msk.bf16.mxu0 %vm104_vm0, %v3458_v56  ;;  %v749_v0 = vpack.i.b16 %v657_v58, %v657_v58  ;;  %v756_v1 = vpack.i.b16 %v661_v59, %v661_v59  ;;  %v669_v2 = vrot.slane %v611_v9, %v4236_v44  ;;  %v673_v3 = vrot.slane %v3455_v10, %v4236_v44 }
 0x30b   :  { %v3459_v4 = vcombine.low %v796_v60, %v797_v61  ;;  %v3460_v5 = vcombine.low %v798_v57, %v799_v62  ;;  %v763_v6 = vpack.i.b16 %v665_v63, %v665_v63  ;;  %v677_v7 = vrot.slane %v613_v11, %v4236_v44 }
 0x30c   :  { %v754_v12 = vrot.slane %v749_v0, %v4236_v44  ;;  %v761_v43 = vrot.slane %v756_v1, %v4236_v44  ;;  %v770_v13 = vpack.i.b16 %v669_v2, %v669_v2  ;;  %v777_v14 = vpack.i.b16 %v673_v3, %v673_v3 }
 0x30d   :  { %v768_v8 = vrot.slane %v763_v6, %v4236_v44  ;;  %v784_v15 = vpack.i.b16 %v677_v7, %v677_v7 }
 0x30e   :  { %v800_v16 = vmul.bf16 %v4238_v45, %v754_v12  ;;  %v801_v9 = vmul.bf16 %v4238_v45, %v761_v43  ;;  %v775_v10 = vrot.slane %v770_v13, %v4236_v44  ;;  %v782_v18 = vrot.slane %v777_v14, %v4236_v44 }
 0x30f   :  { %v802_v19 = vmul.bf16 %v4238_v45, %v768_v8  ;;  %v789_v11 = vrot.slane %v784_v15, %v4236_v44 }
 0x310   :  { %v3461_v20 = vcombine.low %v800_v16, %v801_v9  ;;  %v803_v21 = vmul.bf16 %v4238_v45, %v775_v10  ;;  %v804_v22 = vmul.bf16 %v4238_v45, %v782_v18 }
 0x311   :  { %3608 = vmatmul.mubr.msk.bf16.gmra.mrb[12].mxu0 %vm104_vm0, %v3459_v4  ;;  %v805_v23 = vmul.bf16 %v4238_v45, %v789_v11  ;;  %v4021_v45 = vmov -1e+30  }
 0x312   :  { %3611 = vmatprep.mubr.msk.bf16.mxu0 %vm104_vm0, %v3460_v5  ;;  %v3462_v25 = vcombine.low %v802_v19, %v803_v21  ;;  %v4322_v32 = vsel %vm90_vm1, 0.0, %v4021_v45  ;;  %v4325_v33 = vsel %vm88_vm2, 0.0, %v4021_v45  ;;  %v4327_v35 = vsel %vm91_vm3, 0.0, %v4021_v45 }
 0x313   :  { %v3463_v26 = vcombine.low %v804_v22, %v805_v23  ;;  %v4332_v38 = vsel %vm89_vm4, 0.0, %v4021_v45  ;;  %v4353_v55 = vsel %vm94_vm5, 0.0, %v4021_v45  ;;  %v4355_v58 = vsel %vm92_vm6, 0.0, %v4021_v45 }
 0x314   :  { %v4366_v6 = vsel %vm93_vm7, 0.0, %v4021_v45  ;;  %vm1756_vm1 = vcmask 523264  }
 0x316   :  { %v4312_v27 = vpop.f32.mrb[4].mxu1 }
 0x317   :  { %v520_v28 = vpop.f32.mrb[5].mxu1 }
 0x318   :  { %v4314_v29 = vpop.f32.mrb[6].mxu1 }
 0x319   :  { %3612 = vmatmul.mubr.msk.bf16.gmra.mrb[16].mxu0 %vm104_vm0, %v3461_v20  ;;  %v523_v31 = vpop.f32.mrb[7].mxu1 }
 0x31a   :  { %3615 = vmatprep.mubr.msk.bf16.mxu0 %vm104_vm0, %v3462_v25 }
 0x321   :  { %3616 = vmatmul.mubr.msk.bf16.gmra.mrb[20].mxu0 %vm104_vm0, %v3463_v26 }
 0x3dc   :  { %v3605_v34 = vpop.f32.mrb[8].mxu0 }
 0x3dd   :  { %v4330_v36 = vadd.f32 %v3605_v34, %v4322_v32  ;;  %v916_v37 = vpop.f32.mrb[9].mxu0 }
 0x3de   :  { %v4335_v39 = vadd.f32 %v916_v37, %v4325_v33  ;;  %v3606_v40 = vpop.f32.mrb[10].mxu0 }
 0x3df   :  { %v1009_v41 = vsel %vm104_vm0, %v4330_v36, -inf  ;;  %v4340_v42 = vadd.f32 %v3606_v40, %v4327_v35  ;;  %v919_v46 = vpop.f32.mrb[11].mxu0 }
 0x3e0   :  { %v1010_v47 = vrot.slane %v1009_v41, 4  ;;  %v995_v48 = vsel %vm104_vm0, %v4335_v39, -inf  ;;  %v4346_v49 = vadd.f32 %v919_v46, %v4332_v38 }
 0x3e1   :  { %v996_v50 = vrot.slane %v995_v48, 4  ;;  %v1016_v51 = vsel %vm104_vm0, %v4340_v42, -inf }
 0x3e2   :  { %v1011_v52 = vmax.f32 %v1009_v41, %v1010_v47  ;;  %v1017_v53 = vrot.slane %v1016_v51, 4  ;;  %v1002_v54 = vsel %vm104_vm0, %v4346_v49, -inf }
 0x3e3   :  { %v997_v56 = vmax.f32 %v995_v48, %v996_v50  ;;  %v1003_v57 = vrot.slane %v1002_v54, 4 }
 0x3e4   :  { %v1012_v59 = vrot.slane %v1011_v52, 2  ;;  %v1018_v60 = vmax.f32 %v1016_v51, %v1017_v53  ;;  %v3609_v61 = vpop.f32.mrb[12].mxu0 }
 0x3e5   :  { %v998_v62 = vrot.slane %v997_v56, 2  ;;  %v1004_v63 = vmax.f32 %v1002_v54, %v1003_v57  ;;  %v4359_v0 = vadd.f32 %v3609_v61, %v4353_v55  ;;  %v932_v1 = vpop.f32.mrb[13].mxu0 }
 0x3e6   :  { %v1013_v2 = vmax.f32 %v1011_v52, %v1012_v59  ;;  %v1019_v3 = vrot.slane %v1018_v60, 2  ;;  %v4362_v4 = vadd.f32 %v932_v1, %v4355_v58  ;;  %v4364_v5 = vpop.f32.mrb[14].mxu0 }
 0x3e7   :  { %v999_v7 = vmax.f32 %v997_v56, %v998_v62  ;;  %v1005_v24 = vrot.slane %v1004_v63, 2  ;;  %v1037_v12 = vsel %vm104_vm0, %v4359_v0, -inf  ;;  %v1044_v43 = vsel %vm104_vm0, %v4364_v5, -inf  ;;  %v935_v13 = vpop.f32.mrb[15].mxu0 }
 0x3e8   :  { %v1014_v14 = vrot.slane %v1013_v2, 1  ;;  %v1020_v8 = vmax.f32 %v1018_v60, %v1019_v3  ;;  %v1038_v15 = vrot.slane %v1037_v12, 4  ;;  %v1023_v16 = vsel %vm104_vm0, %v4362_v4, -inf }
 0x3e9   :  { %v1000_v9 = vrot.slane %v999_v7, 1  ;;  %v1006_v10 = vmax.f32 %v1004_v63, %v1005_v24  ;;  %v1024_v18 = vrot.slane %v1023_v16, 4  ;;  %v1045_v19 = vrot.slane %v1044_v43, 4 }
 0x3ea   :  { %v1015_v11 = vmax.f32 %v1013_v2, %v1014_v14  ;;  %v1021_v20 = vrot.slane %v1020_v8, 1  ;;  %v1039_v21 = vmax.f32 %v1037_v12, %v1038_v15  ;;  %v4375_v22 = vadd.f32 %v935_v13, %v4366_v6 }
 0x3eb   :  { %v1001_v23 = vmax.f32 %v999_v7, %v1000_v9  ;;  %v1007_v25 = vrot.slane %v1006_v10, 1  ;;  %v1025_v26 = vmax.f32 %v1023_v16, %v1024_v18  ;;  %v1046_v28 = vmax.f32 %v1044_v43, %v1045_v19 }
 0x3ec   :  { %v1109_v31 = vsub.f32 %v4330_v36, %v1015_v11  ;;  %v1022_v45 = vmax.f32 %v1020_v8, %v1021_v20  ;;  %v1040_v34 = vrot.slane %v1039_v21, 2  ;;  %v1030_v37 = vsel %vm104_vm0, %v4375_v22, -inf  ;;  %v3613_v40 = vpop.f32.mrb[16].mxu0 }
 0x3ed   :  { %v1107_v41 = vsub.f32 %v4335_v39, %v1001_v23  ;;  %v1008_v46 = vmax.f32 %v1006_v10, %v1007_v25  ;;  %v1026_v47 = vrot.slane %v1025_v26, 2  ;;  %v1047_v48 = vrot.slane %v1046_v28, 2  ;;  %v948_v50 = vpop.f32.mrb[17].mxu0 }
 0x3ee   :  { %v1127_v51 = vmul.f32 1.442695, %v1109_v31  ;;  %v1110_v52 = vsub.f32 %v4340_v42, %v1022_v45  ;;  %v1041_v53 = vmax.f32 %v1039_v21, %v1040_v34  ;;  %v1031_v54 = vrot.slane %v1030_v37, 4  ;;  %v3614_v56 = vpop.f32.mrb[18].mxu0 }
 0x3ef   :  { %v1123_v57 = vmul.f32 1.442695, %v1107_v41  ;;  %v1108_v36 = vsub.f32 %v4346_v49, %v1008_v46  ;;  %v1027_v59 = vmax.f32 %v1025_v26, %v1026_v47  ;;  %v1048_v60 = vmax.f32 %v1046_v28, %v1047_v48  ;;  %v951_v61 = vpop.f32.mrb[19].mxu0 }
 0x3f0   :  { %3797 = vpow2.f32 %v1127_v51  ;;  %v1129_v62 = vmul.f32 1.442695, %v1110_v52  ;;  %v1042_v63 = vrot.slane %v1041_v53, 1  ;;  %v1032_v39 = vmax.f32 %v1030_v37, %v1031_v54 }
 0x3f1   :  { %3799 = vpow2.f32 %v1123_v57  ;;  %v1125_v1 = vmul.f32 1.442695, %v1108_v36  ;;  %v1028_v2 = vrot.slane %v1027_v59, 1  ;;  %v1049_v3 = vrot.slane %v1048_v60, 1 }
 0x3f2   :  { %3801 = vpow2.f32 %v1129_v62  ;;  %v1043_v7 = vmax.f32 %v1041_v53, %v1042_v63  ;;  %v1033_v42 = vrot.slane %v1032_v39, 2  ;;  %v4384_v24 = vadd.f32 %v3613_v40, %v4322_v32 }
 0x3f3   :  { %3803 = vpow2.f32 %v1125_v1  ;;  %v1029_v12 = vmax.f32 %v1027_v59, %v1028_v2  ;;  %v1050_v49 = vmax.f32 %v1048_v60, %v1049_v3  ;;  %v4387_v43 = vadd.f32 %v948_v50, %v4325_v33 }
 0x3f4   :  { %v1113_v13 = vsub.f32 %v4359_v0, %v1043_v7  ;;  %v1034_v14 = vmax.f32 %v1032_v39, %v1033_v42  ;;  %v1065_v8 = vsel %vm104_vm0, %v4384_v24, -inf  ;;  %v4393_v15 = vadd.f32 %v3614_v56, %v4327_v35  ;;  %v4395_v16 = vpop.f32.mrb[20].mxu0 }
 0x3f5   :  { %v1111_v9 = vsub.f32 %v4362_v4, %v1029_v12  ;;  %v1114_v10 = vsub.f32 %v4364_v5, %v1050_v49  ;;  %v1066_v18 = vrot.slane %v1065_v8, 4  ;;  %v1051_v19 = vsel %vm104_vm0, %v4387_v43, -inf  ;;  %v4401_v11 = vpop.f32.mrb[21].mxu0 }
 0x3f6   :  { %v1135_v0 = vmul.f32 1.442695, %v1113_v13  ;;  %v1035_v20 = vrot.slane %v1034_v14, 1  ;;  %v1052_v21 = vrot.slane %v1051_v19, 4  ;;  %v1072_v23 = vsel %vm104_vm0, %v4393_v15, -inf  ;;  %v4405_v25 = vpop.f32.mrb[22].mxu0 }
 0x3f7   :  { %v1131_v26 = vmul.f32 1.442695, %v1111_v9  ;;  %v1137_v28 = vmul.f32 1.442695, %v1114_v10  ;;  %v1067_v31 = vmax.f32 %v1065_v8, %v1066_v18  ;;  %v1073_v4 = vrot.slane %v1072_v23, 4  ;;  %v4407_v45 = vpop.f32.mrb[23].mxu0 }
 0x3f8   :  { %3805 = vpow2.f32 %v1135_v0  ;;  %v4409_v5 = vmax.f32 %v1034_v14, %v1035_v20  ;;  %v4411_v34 = vmax.f32 %v1051_v19, %v1052_v21  ;;  %v4418_v47 = vadd.f32 %v951_v61, %v4332_v38 }
 0x3f9   :  { %3807 = vpow2.f32 %v1131_v26  ;;  %v1068_v37 = vrot.slane %v1067_v31, 2  ;;  %v4413_v40 = vmax.f32 %v1072_v23, %v1073_v4 }
 0x3fa   :  { %v3798_v41 = vpop.eup %3797  ;;  %3809 = vpow2.f32 %v1137_v28  ;;  %v1112_v46 = vsub.f32 %v4375_v22, %v4409_v5  ;;  %v1054_v53 = vrot.slane %v4411_v34, 2 }
 0x3fb   :  { %v3800_v48 = vpop.eup %3799  ;;  %v1169_v50 = vsel %vm104_vm0, %v3798_v41, 0.0  ;;  %v1269_v51 = vmul.f32 %v3798_v41, %v4312_v27  ;;  %v4422_v52 = vmax.f32 %v1067_v31, %v1068_v37  ;;  %v1075_v59 = vrot.slane %v4413_v40, 2 }
 0x3fc   :  { %v3802_v54 = vpop.eup %3801  ;;  %v1170_v56 = vrot.slane %v1169_v50, 4  ;;  %v1155_v57 = vsel %vm104_vm0, %v3800_v48, 0.0  ;;  %v1267_v36 = vmul.f32 %v3800_v48, %v4312_v27 }
 0x3fd   :  { %v3804_v60 = vpop.eup %3803  ;;  %v1297_v61 = vsel %vm104_vm0, %v1269_v51, 0.0  ;;  %v1156_v62 = vrot.slane %v1155_v57, 4  ;;  %v1176_v63 = vsel %vm104_vm0, %v3802_v54, 0.0  ;;  %v1270_v39 = vmul.f32 %v3802_v54, %v4312_v27 }
 0x3fe   :  { %v1171_v1 = vadd.f32 %v1170_v56, %v1169_v50  ;;  %v1298_v2 = vrot.slane %v1297_v61, 4  ;;  %v1283_v3 = vsel %vm104_vm0, %v1267_v36, 0.0  ;;  %v1177_v7 = vrot.slane %v1176_v63, 4 }
 0x3ff   :  { %v1157_v42 = vadd.f32 %v1156_v62, %v1155_v57  ;;  %v1284_v12 = vrot.slane %v1283_v3, 4  ;;  %v1304_v49 = vsel %vm104_vm0, %v1270_v39, 0.0  ;;  %v1162_v13 = vsel %vm104_vm0, %v3804_v60, 0.0 }
 0x400   :  { %v1172_v14 = vrot.slane %v1171_v1, 2  ;;  %v1299_v8 = vadd.f32 %v1298_v2, %v1297_v61  ;;  %v1178_v9 = vadd.f32 %v1177_v7, %v1176_v63  ;;  %v1305_v10 = vrot.slane %v1304_v49, 4 }
 0x401   :  { %v1158_v18 = vrot.slane %v1157_v42, 2  ;;  %v1285_v19 = vadd.f32 %v1284_v12, %v1283_v3  ;;  %v1163_v0 = vrot.slane %v1162_v13, 4  ;;  %v1268_v20 = vmul.f32 %v3804_v60, %v4312_v27 }
 0x402   :  { %v3806_v21 = vpop.eup %3805  ;;  %v1173_v23 = vadd.f32 %v1172_v14, %v1171_v1  ;;  %v1300_v26 = vrot.slane %v1299_v8, 2  ;;  %v1179_v28 = vrot.slane %v1178_v9, 2  ;;  %v1306_v31 = vadd.f32 %v1305_v10, %v1304_v49 }
 0x403   :  { %v3808_v4 = vpop.eup %3807  ;;  %v1159_v37 = vadd.f32 %v1158_v18, %v1157_v42  ;;  %v1286_v41 = vrot.slane %v1285_v19, 2  ;;  %v1164_v48 = vadd.f32 %v1163_v0, %v1162_v13  ;;  %v1290_v50 = vsel %vm104_vm0, %v1268_v20, 0.0 }
 0x404   :  { %v3810_v51 = vpop.eup %3809  ;;  %v1174_v54 = vrot.slane %v1173_v23, 1  ;;  %v1301_v56 = vadd.f32 %v1300_v26, %v1299_v8  ;;  %v1180_v57 = vadd.f32 %v1179_v28, %v1178_v9  ;;  %v1307_v36 = vrot.slane %v1306_v31, 2 }
 0x405   :  { %v1160_v61 = vrot.slane %v1159_v37, 1  ;;  %v1287_v62 = vadd.f32 %v1286_v41, %v1285_v19  ;;  %v1165_v63 = vrot.slane %v1164_v48, 2  ;;  %v1291_v60 = vrot.slane %v1290_v50, 4 }
 0x406   :  { %v1175_v39 = vadd.f32 %v1174_v54, %v1173_v23  ;;  %v1302_v1 = vrot.slane %v1301_v56, 1  ;;  %v1181_v2 = vrot.slane %v1180_v57, 1  ;;  %v1308_v3 = vadd.f32 %v1307_v36, %v1306_v31 }
 0x407   :  { %v1161_v7 = vadd.f32 %v1160_v61, %v1159_v37  ;;  %v1288_v12 = vrot.slane %v1287_v62, 1  ;;  %v1166_v42 = vadd.f32 %v1165_v63, %v1164_v48  ;;  %v1292_v49 = vadd.f32 %v1291_v60, %v1290_v50 }
 0x408   :  { %v1303_v13 = vadd.f32 %v1302_v1, %v1301_v56  ;;  %3811 = vrcp.f32 %v1175_v39  ;;  %v1182_v14 = vadd.f32 %v1181_v2, %v1180_v57  ;;  %v1133_v8 = vmul.f32 1.442695, %v1112_v46 }
 0x409   :  { %3813 = vrcp.f32 %v1161_v7  ;;  %v1309_v9 = vrot.slane %v1308_v3, 1  ;;  %v1167_v10 = vrot.slane %v1166_v42, 1  ;;  %v1293_v18 = vrot.slane %v1292_v49, 2 }
 0x40a   :  { %v1289_v19 = vadd.f32 %v1288_v12, %v1287_v62  ;;  %3815 = vrcp.f32 %v1182_v14  ;;  %v1197_v0 = vsel %vm104_vm0, %v3806_v21, 0.0  ;;  %v1273_v20 = vmul.f32 %v3806_v21, %v4312_v27 }
 0x40b   :  { %v1168_v23 = vadd.f32 %v1167_v10, %v1166_v42  ;;  %v1294_v26 = vadd.f32 %v1293_v18, %v1292_v49  ;;  %v1198_v28 = vrot.slane %v1197_v0, 4  ;;  %v1183_v31 = vsel %vm104_vm0, %v3808_v4, 0.0 }
 0x40c   :  { %v1325_v37 = vsel %vm104_vm0, %v1273_v20, 0.0  ;;  %v1184_v41 = vrot.slane %v1183_v31, 4  ;;  %v1271_v22 = vmul.f32 %v3808_v4, %v4312_v27  ;;  %v1204_v5 = vsel %vm104_vm0, %v3810_v51, 0.0 }
 0x40d   :  { %v1295_v46 = vrot.slane %v1294_v26, 1  ;;  %3817 = vrcp.f32 %v1168_v23  ;;  %v1199_v48 = vadd.f32 %v1198_v28, %v1197_v0  ;;  %v1326_v50 = vrot.slane %v1325_v37, 4 }
 0x40e   :  { %v1185_v54 = vadd.f32 %v1184_v41, %v1183_v31  ;;  %v1311_v56 = vsel %vm104_vm0, %v1271_v22, 0.0  ;;  %v1205_v21 = vrot.slane %v1204_v5, 4  ;;  %v1274_v57 = vmul.f32 %v3810_v51, %v4312_v27 }
 0x40f   :  { %v1310_v36 = vadd.f32 %v1309_v9, %v1308_v3  ;;  %v1200_v61 = vrot.slane %v1199_v48, 2  ;;  %v1327_v62 = vadd.f32 %v1326_v50, %v1325_v37  ;;  %v1312_v63 = vrot.slane %v1311_v56, 4 }
 0x410   :  { %v1186_v60 = vrot.slane %v1185_v54, 2  ;;  %v1206_v39 = vadd.f32 %v1205_v21, %v1204_v5  ;;  %v1332_v4 = vsel %vm104_vm0, %v1274_v57, 0.0  ;;  %3819 = vpow2.f32 %v1133_v8 }
 0x411   :  { %v1201_v1 = vadd.f32 %v1200_v61, %v1199_v48  ;;  %v1328_v2 = vrot.slane %v1327_v62, 2  ;;  %v1313_v7 = vadd.f32 %v1312_v63, %v1311_v56  ;;  %v1333_v12 = vrot.slane %v1332_v4, 4 }
 0x412   :  { %v3812_v42 = vpop.eup %3811  ;;  %v1296_v49 = vadd.f32 %v1295_v46, %v1294_v26  ;;  %v1187_v14 = vadd.f32 %v1186_v60, %v1185_v54  ;;  %v1207_v10 = vrot.slane %v1206_v39, 2  ;;  %v1070_v18 = vrot.slane %v4422_v52, 1 }
 0x413   :  { %v3814_v51 = vpop.eup %3813  ;;  %v4449_v3 = vmul.f32 %v3812_v42, %v1303_v13  ;;  %v1202_v9 = vrot.slane %v1201_v1, 1  ;;  %v1329_v0 = vadd.f32 %v1328_v2, %v1327_v62  ;;  %v1314_v20 = vrot.slane %v1313_v7, 2 }
 0x414   :  { %v3816_v23 = vpop.eup %3815  ;;  %v1411_v28 = vmul.f32 %v3814_v51, %v1289_v19  ;;  %v1188_v8 = vrot.slane %v1187_v14, 1  ;;  %v1208_v31 = vadd.f32 %v1207_v10, %v1206_v39  ;;  %v1055_v37 = vmax.f32 %v4411_v34, %v1054_v53 }
 0x415   :  { %v4454_v26 = vmul.f32 %v3816_v23, %v1310_v36  ;;  %v1203_v41 = vadd.f32 %v1202_v9, %v1201_v1  ;;  %v1330_v22 = vrot.slane %v1329_v0, 1  ;;  %v1334_v5 = vadd.f32 %v1333_v12, %v1332_v4 }
 0x416   :  { %v1431_v46 = vpack.c.bf16 %v1411_v28, %v1411_v28  ;;  %v1189_v13 = vadd.f32 %v1188_v8, %v1187_v14  ;;  %v1315_v48 = vadd.f32 %v1314_v20, %v1313_v7  ;;  %v1209_v50 = vrot.slane %v1208_v31, 1 }
 0x417   :  { %v3818_v54 = vpop.eup %3817  ;;  %v1433_v56 = vpack.c.bf16 %v4449_v3, %v4449_v3  ;;  %3821 = vrcp.f32 %v1203_v41  ;;  %v1058_v19 = vsel %vm104_vm0, %v4418_v47, -inf  ;;  %v4462_v34 = vadd.f32 %v4395_v16, %v4353_v55 }
 0x418   :  { %v1434_v53 = vpack.c.bf16 %v4454_v26, %v4454_v26  ;;  %v1412_v21 = vmul.f32 %v3818_v54, %v1296_v49  ;;  %v1331_v57 = vadd.f32 %v1330_v22, %v1329_v0  ;;  %3823 = vrcp.f32 %v1189_v13 }
 0x419   :  { %v1316_v36 = vrot.slane %v1315_v48, 1  ;;  %v1210_v61 = vadd.f32 %v1209_v50, %v1208_v31  ;;  %v1335_v62 = vrot.slane %v1334_v5, 2  ;;  %v1071_v63 = vmax.f32 %v4422_v52, %v1070_v18 }
 0x41a   :  { %v3820_v60 = vpop.eup %3819  ;;  %v1463_v39 = vunpack.c.l.b16 %v1431_v46  ;;  %v1432_v4 = vpack.c.bf16 %v1412_v21, %v1412_v21  ;;  %v1056_v1 = vrot.slane %v1055_v37, 1  ;;  %v1076_v16 = vmax.f32 %v4413_v40, %v1075_v59 }
 0x41b   :  { %v1336_v2 = vadd.f32 %v1335_v62, %v1334_v5  ;;  %3825 = vrcp.f32 %v1210_v61  ;;  %v1190_v7 = vsel %vm104_vm0, %v3820_v60, 0.0  ;;  %v1272_v12 = vmul.f32 %v3820_v60, %v4312_v27 }
 0x41c   :  { %v1464_v42 = vunpack.c.l.b16 %v1432_v4  ;;  %v1191_v49 = vrot.slane %v1190_v7, 4  ;;  %v1117_v14 = vsub.f32 %v4384_v24, %v1071_v63  ;;  %v1057_v10 = vmax.f32 %v1055_v37, %v1056_v1 }
 0x41d   :  { %v1317_v52 = vadd.f32 %v1316_v36, %v1315_v48  ;;  %v1318_v18 = vsel %vm104_vm0, %v1272_v12, 0.0  ;;  %v1077_v51 = vrot.slane %v1076_v16, 1  ;;  %v1059_v9 = vrot.slane %v1058_v19, 4 }
 0x41e   :  { %v4475_v0 = vsel %vm1479_vm8, %v1464_v42, %v1463_v39  ;;  %v1192_v40 = vadd.f32 %v1191_v49, %v1190_v7  ;;  %v1319_v59 = vrot.slane %v1318_v18, 4  ;;  %v1143_v20 = vmul.f32 1.442695, %v1117_v14 }
 0x41f   :  { %v1337_v23 = vrot.slane %v1336_v2, 1  ;;  %v1115_v28 = vsub.f32 %v4387_v43, %v1057_v10  ;;  %v1078_v27 = vmax.f32 %v1076_v16, %v1077_v51  ;;  %v1060_v8 = vmax.f32 %v1058_v19, %v1059_v9 }
 0x420   :  { %v1193_v31 = vrot.slane %v1192_v40, 2  ;;  %v1320_v41 = vadd.f32 %v1319_v59, %v1318_v18  ;;  %3827 = vpow2.f32 %v1143_v20  ;;  %v1093_v24 = vsel %vm104_vm0, %v4462_v34, -inf }
 0x421   :  { %v3822_v37 = vpop.eup %3821  ;;  %v1139_v22 = vmul.f32 1.442695, %v1115_v28  ;;  %v1118_v5 = vsub.f32 %v4393_v15, %v1078_v27  ;;  %v1061_v46 = vrot.slane %v1060_v8, 2  ;;  %v1094_v13 = vrot.slane %v1093_v24, 4 }
 0x422   :  { %v3824_v48 = vpop.eup %3823  ;;  %v4481_v50 = vmul.f32 %v3822_v37, %v1331_v57  ;;  %v1194_v54 = vadd.f32 %v1193_v31, %v1192_v40  ;;  %v1321_v21 = vrot.slane %v1320_v41, 2  ;;  %v4485_v43 = vadd.f32 %v4401_v11, %v4355_v58 }
 0x423   :  { %v1415_v19 = vmul.f32 %v3824_v48, %v1317_v52  ;;  %3829 = vpow2.f32 %v1139_v22  ;;  %v1145_v36 = vmul.f32 1.442695, %v1118_v5  ;;  %v1062_v61 = vmax.f32 %v1060_v8, %v1061_v46 }
 0x424   :  { %v1338_v62 = vadd.f32 %v1337_v23, %v1336_v2  ;;  %v1195_v63 = vrot.slane %v1194_v54, 1  ;;  %v1322_v60 = vadd.f32 %v1321_v21, %v1320_v41  ;;  %v1095_v39 = vmax.f32 %v1093_v24, %v1094_v13  ;;  %v3766_v41 = vld [vmem:[%s5258_s2 + $0x250] ss:$8 sps:$4 sm:$0xff]  }
 0x425   :  { %v3826_v15 = vpop.eup %3825  ;;  %3831 = vpow2.f32 %v1145_v36  ;;  %v1063_v4 = vrot.slane %v1062_v61, 1  ;;  %v1079_v57 = vsel %vm104_vm0, %v4485_v43, -inf  ;;  %v4492_v1 = vunpack.c.l.b16 %v1433_v56  ;;  %v3765_v56 = vld [vmem:[%s5258_s2 + $0x240] ss:$8 sps:$4 sm:$0xff]  }
 0x426   :  { %v1435_v11 = vpack.c.bf16 %v1415_v19, %v1415_v19  ;;  %v4494_v16 = vmul.f32 %v3826_v15, %v1338_v62  ;;  %v1196_v7 = vadd.f32 %v1195_v63, %v1194_v54  ;;  %v4499_v2 = vunpack.c.l.b16 %v1434_v53 }
 0x427   :  { %v1064_v12 = vmax.f32 %v1062_v61, %v1063_v4  ;;  %v1096_v42 = vrot.slane %v1095_v39, 2  ;;  %v1080_v49 = vrot.slane %v1079_v57, 4  ;;  %v1437_v14 = vpack.c.bf16 %v4481_v50, %v4481_v50 }
 0x428   :  { %v1323_v10 = vrot.slane %v1322_v60, 1  ;;  %3833 = vrcp.f32 %v1196_v7  ;;  %v1100_v3 = vsel %vm104_vm0, %v4405_v25, -inf  ;;  %v4509_v9 = vunpack.c.l.b16 %v1435_v11 }
 0x429   :  { %v1116_v52 = vsub.f32 %v4418_v47, %v1064_v12  ;;  %v1097_v26 = vmax.f32 %v1095_v39, %v1096_v42  ;;  %v1081_v53 = vmax.f32 %v1079_v57, %v1080_v49  ;;  %v1101_v18 = vrot.slane %v1100_v3, 4 }
 0x42a   :  { %v3828_v51 = vpop.eup %3827  ;;  %v4513_v40 = vadd.f32 %v4407_v45, %v4366_v6  ;;  %v4022_v27 = vmov 0.0   ;;  %v1438_v47 = vpack.c.bf16 %v4494_v16, %v4494_v16  ;;  %v1324_v8 = vadd.f32 %v1323_v10, %v1322_v60 }
 0x42b   :  { %v1225_v59 = vsel %vm104_vm0, %v3828_v51, 0.0  ;;  %v1277_v20 = vmul.f32 %v3828_v51, %v4314_v29  ;;  %v1141_v23 = vmul.f32 1.442695, %v1116_v52  ;;  %v1098_v28 = vrot.slane %v1097_v26, 1  ;;  %3619 = vmatprep.subr.bf16.mxu0 %v4022_v27  ;;  %3623 = vmatprep.mubr.msk.bf16.mxu0 %vm4023_vm9, %v4022_v27 }
 0x42c   :  { %v1226_v31 = vrot.slane %v1225_v59, 4  ;;  %v1082_v45 = vrot.slane %v1081_v53, 2  ;;  %3620 = vmatpush3.bf16.msra.mxu0 %v3765_v56  ;;  %3627 = vmatprep.subr.bf16.mxu1 %v4022_v27  ;;  %v1102_v5 = vmax.f32 %v1100_v3, %v1101_v18  ;;  %v4535_v62 = vsel %vm104_vm0, %v4513_v40, -inf }
 0x42d   :  { %v3830_v24 = vpop.eup %3829  ;;  %v1353_v37 = vsel %vm104_vm0, %v1277_v20, 0.0  ;;  %3835 = vpow2.f32 %v1141_v23  ;;  %v1099_v22 = vmax.f32 %v1097_v26, %v1098_v28  ;;  %3621 = vmatprep.subr.bf16.mxu0 %v4022_v27  ;;  %3631 = vmatprep.mubr.msk.bf16.mxu1 %vm4023_vm9, %v4022_v27 }
 0x42e   :  { %v1227_v46 = vadd.f32 %v1226_v31, %v1225_v59  ;;  %v1354_v13 = vrot.slane %v1353_v37, 4  ;;  %v1211_v48 = vsel %vm104_vm0, %v3830_v24, 0.0  ;;  %v1275_v54 = vmul.f32 %v3830_v24, %v4314_v29 }
 0x42f   :  { %v3832_v21 = vpop.eup %3831  ;;  %v1212_v19 = vrot.slane %v1211_v48, 4  ;;  %v1121_v36 = vsub.f32 %v4462_v34, %v1099_v22  ;;  %v1083_v61 = vmax.f32 %v1081_v53, %v1082_v45  ;;  %v1103_v24 = vrot.slane %v1102_v5, 2 }
 0x430   :  { %v1228_v63 = vrot.slane %v1227_v46, 2  ;;  %v1355_v60 = vadd.f32 %v1354_v13, %v1353_v37  ;;  %v1339_v39 = vsel %vm104_vm0, %v1275_v54, 0.0  ;;  %v1232_v15 = vsel %vm104_vm0, %v3832_v21, 0.0  ;;  %3622 = vmatpush3.bf16.msra.mxu0 %v3766_v41 }
 0x431   :  { %v1213_v4 = vadd.f32 %v1212_v19, %v1211_v48  ;;  %v1340_v57 = vrot.slane %v1339_v39, 4  ;;  %v1233_v11 = vrot.slane %v1232_v15, 4  ;;  %v1278_v7 = vmul.f32 %v3832_v21, %v4314_v29  ;;  %3635 = vmatprep.subr.bf16.mxu0 %v4022_v27 }
 0x432   :  { %v3834_v34 = vpop.eup %3833  ;;  %v1229_v12 = vadd.f32 %v1228_v63, %v1227_v46  ;;  %v1356_v42 = vrot.slane %v1355_v60, 2  ;;  %v1151_v49 = vmul.f32 1.442695, %v1121_v36  ;;  %v1084_v10 = vrot.slane %v1083_v61, 1 }
 0x433   :  { %v1416_v3 = vmul.f32 %v3834_v34, %v1324_v8  ;;  %v1214_v56 = vrot.slane %v1213_v4, 2  ;;  %v1341_v52 = vadd.f32 %v1340_v57, %v1339_v39  ;;  %v1234_v26 = vadd.f32 %v1233_v11, %v1232_v15 }
 0x434   :  { %v1230_v53 = vrot.slane %v1229_v12, 1  ;;  %v1357_v18 = vadd.f32 %v1356_v42, %v1355_v60  ;;  %v1360_v51 = vsel %vm104_vm0, %v1278_v7, 0.0  ;;  %3837 = vpow2.f32 %v1151_v49 }
 0x435   :  { %v1436_v59 = vpack.c.bf16 %v1416_v3, %v1416_v3  ;;  %v1215_v20 = vadd.f32 %v1214_v56, %v1213_v4  ;;  %v1342_v23 = vrot.slane %v1341_v52, 2  ;;  %v1235_v28 = vrot.slane %v1234_v26, 2 }
 0x436   :  { %v1231_v31 = vadd.f32 %v1230_v53, %v1229_v12  ;;  %v1361_v45 = vrot.slane %v1360_v51, 4  ;;  %v1085_v41 = vmax.f32 %v1083_v61, %v1084_v10  ;;  %v1358_v8 = vrot.slane %v1357_v18, 1 }
 0x437   :  { %v3836_v37 = vpop.eup %3835  ;;  %v1216_v22 = vrot.slane %v1215_v20, 1  ;;  %v1236_v46 = vadd.f32 %v1235_v28, %v1234_v26  ;;  %v1087_v13 = vrot.slane %v4535_v62, 4  ;;  %v1468_v48 = vunpack.c.l.b16 %v1436_v59 }
 0x438   :  { %3839 = vrcp.f32 %v1231_v31  ;;  %v1362_v54 = vadd.f32 %v1361_v45, %v1360_v51  ;;  %v1218_v21 = vsel %vm104_vm0, %v3836_v37, 0.0  ;;  %v1343_v36 = vadd.f32 %v1342_v23, %v1341_v52 }
 0x439   :  { %v1217_v19 = vadd.f32 %v1216_v22, %v1215_v20  ;;  %v1237_v63 = vrot.slane %v1236_v46, 1  ;;  %v1219_v60 = vrot.slane %v1218_v21, 4  ;;  %v1276_v61 = vmul.f32 %v3836_v37, %v4314_v29 }
 0x43a   :  { %v1363_v39 = vrot.slane %v1362_v54, 2  ;;  %v1119_v15 = vsub.f32 %v4485_v43, %v1085_v41  ;;  %v1104_v4 = vmax.f32 %v1102_v5, %v1103_v24  ;;  %v1359_v57 = vadd.f32 %v1358_v8, %v1357_v18 }
 0x43b   :  { %3841 = vrcp.f32 %v1217_v19  ;;  %v1238_v11 = vadd.f32 %v1237_v63, %v1236_v46  ;;  %v1220_v7 = vadd.f32 %v1219_v60, %v1218_v21  ;;  %v1346_v12 = vsel %vm104_vm0, %v1276_v61, 0.0 }
 0x43c   :  { %v1364_v34 = vadd.f32 %v1363_v39, %v1362_v54  ;;  %v1147_v42 = vmul.f32 1.442695, %v1119_v15  ;;  %v1105_v49 = vrot.slane %v1104_v4, 1  ;;  %v1347_v3 = vrot.slane %v1346_v12, 4 }
 0x43d   :  { %3843 = vrcp.f32 %v1238_v11  ;;  %v1221_v10 = vrot.slane %v1220_v7, 2  ;;  %v1088_v56 = vmax.f32 %v4535_v62, %v1087_v13  ;;  %v1344_v26 = vrot.slane %v1343_v36, 1 }
 0x43e   :  { %v3838_v52 = vpop.eup %3837  ;;  %3845 = vpow2.f32 %v1147_v42  ;;  %v1106_v43 = vmax.f32 %v1104_v4, %v1105_v49  ;;  %v1482_v5 = vsel %vm1481_vm10, %v4492_v1, %v4475_v0  ;;  %v1348_v18 = vadd.f32 %v1347_v3, %v1346_v12 }
 0x43f   :  { %v1222_v53 = vadd.f32 %v1221_v10, %v1220_v7  ;;  %v1253_v51 = vsel %vm104_vm0, %v3838_v52, 0.0  ;;  %v1281_v59 = vmul.f32 %v3838_v52, %v4314_v29  ;;  %v1365_v20 = vrot.slane %v1364_v34, 1 }
 0x440   :  { %v1254_v23 = vrot.slane %v1253_v51, 4  ;;  %v1122_v28 = vsub.f32 %v4405_v25, %v1106_v43  ;;  %v1089_v31 = vrot.slane %v1088_v56, 2  ;;  %v1349_v45 = vrot.slane %v1348_v18, 2 }
 0x441   :  { %v1223_v62 = vrot.slane %v1222_v53, 1  ;;  %v1381_v41 = vsel %vm104_vm0, %v1281_v59, 0.0  ;;  %v1484_v24 = vsel %vm1483_vm11, %v4499_v2, %v1482_v5  ;;  %v1345_v13 = vadd.f32 %v1344_v26, %v1343_v36 }
 0x442   :  { %v3840_v37 = vpop.eup %3839  ;;  %v1255_v0 = vadd.f32 %v1254_v23, %v1253_v51  ;;  %v1382_v1 = vrot.slane %v1381_v41, 4  ;;  %v1153_v8 = vmul.f32 1.442695, %v1122_v28  ;;  %v1090_v22 = vmax.f32 %v1088_v56, %v1089_v31 }
 0x443   :  { %v1421_v46 = vmul.f32 %v3840_v37, %v1359_v57  ;;  %v1224_v54 = vadd.f32 %v1223_v62, %v1222_v53  ;;  %v1486_v21 = vsel %vm1485_vm12, %v4509_v9, %v1484_v24  ;;  %v1469_v2 = vunpack.c.l.b16 %v1437_v14 }
 0x444   :  { %v1256_v25 = vrot.slane %v1255_v0, 2  ;;  %v1383_v19 = vadd.f32 %v1382_v1, %v1381_v41  ;;  %3847 = vpow2.f32 %v1153_v8  ;;  %v1091_v63 = vrot.slane %v1090_v22, 1 }
 0x445   :  { %v3842_v60 = vpop.eup %3841  ;;  %v1366_v39 = vadd.f32 %v1365_v20, %v1364_v34  ;;  %3849 = vrcp.f32 %v1224_v54  ;;  %v1488_v61 = vsel %vm1487_vm13, %v1468_v48, %v1486_v21  ;;  %v1350_v4 = vadd.f32 %v1349_v45, %v1348_v18 }
 0x446   :  { %v1419_v15 = vmul.f32 %v3842_v60, %v1345_v13  ;;  %v1257_v36 = vadd.f32 %v1256_v25, %v1255_v0  ;;  %v1092_v57 = vmax.f32 %v1090_v22, %v1091_v63  ;;  %v1470_v9 = vunpack.c.l.b16 %v1438_v47 }
 0x447   :  { %v3844_v11 = vpop.eup %3843  ;;  %v1490_v7 = vsel %vm1489_vm14, %v1469_v2, %v1488_v61  ;;  %v1384_v14 = vrot.slane %v1383_v19, 2  ;;  %v1351_v3 = vrot.slane %v1350_v4, 1  ;;  %v1441_v45 = vpack.c.bf16 %v1421_v46, %v1421_v46 }
 0x448   :  { %v3846_v12 = vpop.eup %3845  ;;  %v1422_v42 = vmul.f32 %v3844_v11, %v1366_v39  ;;  %v1258_v50 = vrot.slane %v1257_v36, 1  ;;  %v1120_v49 = vsub.f32 %v4513_v40, %v1092_v57  ;;  %v4571_v10 = vsel %vm1491_vm15, %v1470_v9, %v1490_v7 }
 0x449   :  { %v1239_v34 = vsel %vm104_vm0, %v3846_v12, 0.0  ;;  %v1279_v48 = vmul.f32 %v3846_v12, %v4314_v29  ;;  %v1385_v43 = vadd.f32 %v1384_v14, %v1383_v19  ;;  %v1352_v18 = vadd.f32 %v1351_v3, %v1350_v4 }
 0x44a   :  { %v1259_v56 = vadd.f32 %v1258_v50, %v1257_v36  ;;  %v1240_v16 = vrot.slane %v1239_v34, 4  ;;  %v1149_v52 = vmul.f32 1.442695, %v1120_v49  ;;  %v1439_v23 = vpack.c.bf16 %v1419_v15, %v1419_v15 }
 0x44b   :  { %v1367_v47 = vsel %vm104_vm0, %v1279_v48, 0.0  ;;  %v1386_v41 = vrot.slane %v1385_v43, 1  ;;  %v1442_v22 = vpack.c.bf16 %v1422_v42, %v1422_v42  ;;  %v1473_v63 = vunpack.c.l.b16 %v1441_v45 }
 0x44c   :  { %3851 = vrcp.f32 %v1259_v56  ;;  %v1368_v26 = vrot.slane %v1367_v47, 4  ;;  %v1241_v5 = vadd.f32 %v1240_v16, %v1239_v34  ;;  %v1471_v54 = vunpack.c.l.b16 %v1439_v23 }
 0x44d   :  { %3853 = vpow2.f32 %v1149_v52  ;;  %v1387_v60 = vadd.f32 %v1386_v41, %v1385_v43  ;;  %v1474_v36 = vunpack.c.l.b16 %v1442_v22 }
 0x44e   :  { %v3848_v53 = vpop.eup %3847  ;;  %v1242_v59 = vrot.slane %v1241_v5, 2  ;;  %v1369_v31 = vadd.f32 %v1368_v26, %v1367_v47 }
 0x44f   :  { %v3850_v51 = vpop.eup %3849  ;;  %v1260_v40 = vsel %vm104_vm0, %v3848_v53, 0.0  ;;  %v1282_v20 = vmul.f32 %v3848_v53, %v4314_v29 }
 0x450   :  { %v1420_v28 = vmul.f32 %v3850_v51, %v1352_v18  ;;  %v1261_v62 = vrot.slane %v1260_v40, 4  ;;  %v1243_v24 = vadd.f32 %v1242_v59, %v1241_v5  ;;  %v1370_v25 = vrot.slane %v1369_v31, 2 }
 0x451   :  { %v1388_v37 = vsel %vm104_vm0, %v1282_v20, 0.0 }
 0x452   :  { %v1440_v0 = vpack.c.bf16 %v1420_v28, %v1420_v28  ;;  %v1262_v1 = vadd.f32 %v1261_v62, %v1260_v40  ;;  %v1389_v8 = vrot.slane %v1388_v37, 4  ;;  %v1244_v13 = vrot.slane %v1243_v24, 1 }
 0x453   :  { %v1371_v9 = vadd.f32 %v1370_v25, %v1369_v31 }
 0x454   :  { %v1472_v21 = vunpack.c.l.b16 %v1440_v0  ;;  %v1263_v19 = vrot.slane %v1262_v1, 2  ;;  %v1245_v2 = vadd.f32 %v1244_v13, %v1243_v24  ;;  %v1390_v39 = vadd.f32 %v1389_v8, %v1388_v37 }
 0x455   :  { %v1372_v16 = vrot.slane %v1371_v9, 1 }
 0x456   :  { %v3852_v61 = vpop.eup %3851  ;;  %v1493_v46 = vsel %vm1479_vm8, %v1472_v21, %v1471_v54  ;;  %v1264_v15 = vadd.f32 %v1263_v19, %v1262_v1  ;;  %3855 = vrcp.f32 %v1245_v2  ;;  %v1391_v50 = vrot.slane %v1390_v39, 2 }
 0x457   :  { %v3854_v4 = vpop.eup %3853  ;;  %v1425_v57 = vmul.f32 %v3852_v61, %v1387_v60  ;;  %v1494_v11 = vsel %vm1481_vm10, %v1473_v63, %v1493_v46  ;;  %v1373_v5 = vadd.f32 %v1372_v16, %v1371_v9  ;;  %v3957_v61 = vld [vmem:[%s5256_s0] sm:$0xff] }
 0x458   :  { %v1265_v7 = vrot.slane %v1264_v15, 1  ;;  %v1246_v12 = vsel %vm104_vm0, %v3854_v4, 0.0  ;;  %v1280_v42 = vmul.f32 %v3854_v4, %v4314_v29  ;;  %v1495_v34 = vsel %vm1483_vm11, %v1474_v36, %v1494_v11  ;;  %v3958_v36 = vld [vmem:[%s5256_s0 + $0x8] sm:$0xff] }
 0x459   :  { %v1247_v14 = vrot.slane %v1246_v12, 4  ;;  %v1392_v47 = vadd.f32 %v1391_v50, %v1390_v39  ;;  %v1445_v8 = vpack.c.bf16 %v1425_v57, %v1425_v57  ;;  %v3767_v16 = vld [vmem:[%s5258_s2 + $0x280] ss:$8 sps:$4 sm:$0xff]  }
 0x45a   :  { %v1266_v48 = vadd.f32 %v1265_v7, %v1264_v15  ;;  %v1374_v49 = vsel %vm104_vm0, %v1280_v42, 0.0  ;;  %3628 = vmatpush3.bf16.msra.mxu1 %v3767_v16  ;;  %v3962_v16 = vld [vmem:[%s5258_s2 + $0x110] ss:$8 sps:$4 sm:$0xff]  }
 0x45b   :  { %v1248_v3 = vadd.f32 %v1247_v14, %v1246_v12  ;;  %v1375_v56 = vrot.slane %v1374_v49, 4  ;;  %v1393_v18 = vrot.slane %v1392_v47, 1  ;;  %v1477_v21 = vunpack.c.l.b16 %v1445_v8  ;;  %3629 = vmatprep.subr.bf16.mxu1 %v4022_v27 }
 0x45c   :  { %3857 = vrcp.f32 %v1266_v48 }
 0x45d   :  { %v1249_v52 = vrot.slane %v1248_v3, 2  ;;  %v1376_v26 = vadd.f32 %v1375_v56, %v1374_v49  ;;  %v1394_v23 = vadd.f32 %v1393_v18, %v1392_v47  ;;  %v3768_v47 = vld [vmem:[%s5258_s2 + $0x2c0] ss:$8 sps:$4 sm:$0xff]  }
 0x45f   :  { %v1250_v43 = vadd.f32 %v1249_v52, %v1248_v3  ;;  %v1377_v59 = vrot.slane %v1376_v26, 2  ;;  %v3769_v52 = vld [vmem:[%s5258_s2 + $0x290] ss:$8 sps:$4 sm:$0xff]  }
 0x460   :  { %v3856_v53 = vpop.eup %3855  ;;  %3630 = vmatpush3.bf16.msra.mxu1 %v3769_v52  ;;  %v3964_v52 = vld [vmem:[%s5258_s2 + $0x130] ss:$8 sps:$4 sm:$0xff]  }
 0x461   :  { %v1251_v51 = vrot.slane %v1250_v43, 1  ;;  %v1423_v29 = vmul.f32 %v3856_v53, %v1373_v5  ;;  %v1378_v62 = vadd.f32 %v1377_v59, %v1376_v26  ;;  %v3770_v26 = vld [vmem:[%s5258_s2 + $0x2d0] ss:$8 sps:$4 sm:$0xff]   ;;  %3643 = vmatprep.subr.bf16.mxu1 %v4022_v27 }
 0x463   :  { %v1252_v40 = vadd.f32 %v1251_v51, %v1250_v43  ;;  %v1443_v20 = vpack.c.bf16 %v1423_v29, %v1423_v29  ;;  %v1379_v24 = vrot.slane %v1378_v62, 1 }
 0x465   :  { %3859 = vrcp.f32 %v1252_v40  ;;  %v1475_v31 = vunpack.c.l.b16 %v1443_v20  ;;  %v1380_v37 = vadd.f32 %v1379_v24, %v1378_v62  ;;  %v3772_v62 = vld [vmem:[%s5258_s2 + $0x310] ss:$8 sps:$4 sm:$0xff]   ;;  %v1594_v24 = vld [vmem:[%s5257_s1 + $0x60] sm:$0xff] }
 0x466   :  { %v3858_v28 = vpop.eup %3857 }
 0x467   :  { %v1426_v45 = vmul.f32 %v3858_v28, %v1394_v23  ;;  %v1496_v41 = vsel %vm1485_vm12, %v1475_v31, %v1495_v34  ;;  %v3771_v31 = vld [vmem:[%s5258_s2 + $0x300] ss:$8 sps:$4 sm:$0xff]  }
 0x469   :  { %v1446_v22 = vpack.c.bf16 %v1426_v45, %v1426_v45  ;;  %v3773_v45 = vld [vmem:[%s5258_s2 + $0x320] ss:$8 sps:$4 sm:$0xff]  }
 0x46b   :  { %v1478_v25 = vunpack.c.l.b16 %v1446_v22 }
 0x46f   :  { %v3860_v0 = vpop.eup %3859 }
 0x470   :  { %v1424_v1 = vmul.f32 %v3860_v0, %v1380_v37 }
 0x472   :  { %v1444_v13 = vpack.c.bf16 %v1424_v1, %v1424_v1  ;;  %v1595_v1 = vld [vmem:[%s5257_s1 + $0x70] sm:$0xff] }
 0x474   :  { %v1476_v54 = vunpack.c.l.b16 %v1444_v13 }
 0x476   :  { %v1497_v19 = vsel %vm1487_vm13, %v1476_v54, %v1496_v41  ;;  %v3774_v41 = vld [vmem:[%s5258_s2 + $0x330] ss:$8 sps:$4 sm:$0xff]  }
 0x477   :  { %v1498_v63 = vsel %vm1489_vm14, %v1477_v21, %v1497_v19 }
 0x478   :  { %v1499_v60 = vsel %vm1491_vm15, %v1478_v25, %v1498_v63 }
 0x479   :  { %v1500_v2 = vpack.c.b16 %v1499_v60, %v4571_v10 }
 0x47b   :  { %3624 = vmatmul.mubr.msk.bf16.vlgmr.msra.gmra.mrb[24].mxu0 %vm104_vm0, %v1500_v2 }
 0x47c   :  { %3639 = vmatprep.mubr.msk.bf16.mxu0 %vm4023_vm9, %v4022_v27  ;;  %3636 = vmatpush3.bf16.msra.mxu0 %v3768_v47  ;;  %v3963_v47 = vld [vmem:[%s5258_s2 + $0x120] ss:$8 sps:$4 sm:$0xff]  }
 0x47d   :  { %3637 = vmatprep.subr.bf16.mxu0 %v4022_v27 }
 0x480   :  { %3638 = vmatpush3.bf16.msra.mxu0 %v3770_v26  ;;  %v3965_v26 = vld [vmem:[%s5258_s2 + $0x140] ss:$8 sps:$4 sm:$0xff]  }
 0x54e   :  { %v1550_v39 = vpop.f32.mrb[24].mxu0 }
 0x54f   :  { %v4594_v46 = vadd.f32 %v3957_v61, %v1550_v39  ;;  %v3625_v15 = vpop.f32.mrb[25].mxu0 }
 0x550   :  { %v1553_v4 = vpop.f32.mrb[26].mxu0 }
 0x551   :  { %v4599_v57 = vadd.f32 %v3958_v36, %v1553_v4  ;;  %v3626_v10 = vpop.f32.mrb[27].mxu0  ;;  %v1559_v11 = vsel %vm104_vm0, %v4594_v46, 0.0  ;;  %v1596_v36 = vld [vmem:[%s5257_s1 + $0xa0] sm:$0xff] }
 0x552   :  { %1560 = vadd.xlane.f32.xlu0 %v1559_v11  ;;  %v1597_v11 = vld [vmem:[%s5257_s1 + $0xb0] sm:$0xff] }
 0x553   :  { %v1562_v9 = vsel %vm104_vm0, %v4599_v57, 0.0 }
 0x554   :  { %1563 = vadd.xlane.f32.xlu1 %v1562_v9 }
 0x5df   :  { %v1561_v7 = vpop.xlane.xlu0 %1560 }
 0x5e0   :  { %v1565_v12 = vmul.f32 0.03125, %v1561_v7 }
 0x5e1   :  { %v1564_v42 = vpop.xlane.xlu1 %1563 }
 0x5e2   :  { %v1567_v50 = vsub.f32 %v4594_v46, %v1565_v12  ;;  %v1566_v14 = vmul.f32 0.03125, %v1564_v42 }
 0x5e4   :  { %v1568_v34 = vsub.f32 %v4599_v57, %v1566_v14  ;;  %v1569_v48 = vmul.f32 %v1567_v50, %v1567_v50 }
 0x5e6   :  { %v1571_v49 = vsel %vm104_vm0, %v1569_v48, 0.0  ;;  %v1570_v3 = vmul.f32 %v1568_v34, %v1568_v34 }
 0x5e7   :  { %1572 = vadd.xlane.f32.xlu0 %v1571_v49  ;;  %v3959_v49 = vld [vmem:[%s5258_s2 + $0xe0] ss:$8 sps:$4 sm:$0xff]  }
 0x5e8   :  { %v1574_v56 = vsel %vm104_vm0, %v1570_v3, 0.0  ;;  %v3960_v3 = vld [vmem:[%s5258_s2 + $0xf0] ss:$8 sps:$4 sm:$0xff]  }
 0x5e9   :  { %1575 = vadd.xlane.f32.xlu1 %v1574_v56  ;;  %v3961_v56 = vld [vmem:[%s5258_s2 + $0x100] ss:$8 sps:$4 sm:$0xff]  }
 0x674   :  { %v1573_v43 = vpop.xlane.xlu0 %1572 }
 0x675   :  { %v1577_v5 = vmul.f32 0.03125, %v1573_v43  ;;  %v3966_v43 = vld [vmem:[%s5258_s2 + $0x150] ss:$8 sps:$4 sm:$0xff]  }
 0x676   :  { %v1576_v53 = vpop.xlane.xlu1 %1575 }
 0x677   :  { %v1579_v18 = vadd.f32 1e-05, %v1577_v5  ;;  %v1578_v51 = vmul.f32 0.03125, %v1576_v53  ;;  %v3967_v5 = vld [vmem:[%s5258_s2 + $0x160] ss:$8 sps:$4 sm:$0xff]  }
 0x678   :  { %v3968_v53 = vld [vmem:[%s5258_s2 + $0x170] ss:$8 sps:$4 sm:$0xff]  }
 0x679   :  { %3861 = vrsqrt.f32 %v1579_v18  ;;  %v1580_v29 = vadd.f32 1e-05, %v1578_v51  ;;  %v4700_v18 = vld [vmem:[%s5258_s2 + $0x220] ss:$8 sps:$4 sm:$0xff]  }
 0x67b   :  { %3863 = vrsqrt.f32 %v1580_v29 }
 0x683   :  { %v3862_v59 = vpop.eup %3861 }
 0x684   :  { %v1583_v20 = vmul.f32 %v3862_v59, %v1567_v50 }
 0x685   :  { %v3864_v40 = vpop.eup %3863 }
 0x686   :  { %v1584_v23 = vmul.f32 %v3864_v40, %v1568_v34 }
 0x688   :  { %v1585_v28 = vpack.c.bf16 %v1584_v23, %v1583_v20 }
 0x68a   :  { %3632 = vmatmul.mubr.msk.bf16.vlgmr.msra.gmra.mrb[8].mxu1 %vm104_vm0, %v1585_v28  ;;  %3640 = vmatmul.mubr.msk.bf16.vlgmr.msra.gmra.mrb[28].mxu0 %vm104_vm0, %v1585_v28 }
 0x68b   :  { %3651 = vmatprep.mubr.msk.bf16.mxu1 %vm4023_vm9, %v4022_v27  ;;  %1889 = vmatprep.mubr.bf16.mxu0 %v4019_v17 }
 0x68c   :  { %3644 = vmatpush3.bf16.msra.mxu1 %v3771_v31 }
 0x68d   :  { %3645 = vmatprep.subr.bf16.mxu1 %v4022_v27 }
 0x690   :  { %3646 = vmatpush3.bf16.msra.mxu1 %v3772_v62 }
 0x691   :  { %3647 = vmatprep.subr.bf16.mxu1 %v4022_v27 }
 0x694   :  { %3648 = vmatpush3.bf16.msra.mxu1 %v3773_v45 }
 0x695   :  { %3649 = vmatprep.subr.bf16.mxu1 %v4022_v27 }
 0x698   :  { %3650 = vmatpush3.bf16.msra.mxu1 %v3774_v41 }
 0x699   :  { %1959 = vmatprep.subr.bf16.mxu1 %v4019_v17 }
 0x75d   :  { %v1647_v37 = vpop.f32.mrb[8].mxu1  ;;  %v1700_v0 = vpop.f32.mrb[28].mxu0 }
 0x75e   :  { %v1648_v8 = vadd.f32 %v1647_v37, %v1594_v24  ;;  %v3633_v22 = vpop.f32.mrb[9].mxu1  ;;  %v3641_v13 = vpop.f32.mrb[29].mxu0  ;;  %v1701_v7 = vadd.f32 %v1700_v0, %v1596_v36 }
 0x75f   :  { %v1650_v54 = vpop.f32.mrb[10].mxu1  ;;  %v1703_v21 = vpop.f32.mrb[30].mxu0  ;;  %v3777_v22 = vld [vmem:[%s5258_s2 + $0x24] ss:$8 sps:$4 sm:$0xff]   ;;  %v3775_v13 = vld [vmem:[%s5258_s2 + $0x20] ss:$8 sps:$4 sm:$0xff]  }
 0x760   :  { %v3483_v25 = vmul.f32 -1.442695, %v1648_v8  ;;  %v1651_v19 = vadd.f32 %v1650_v54, %v1595_v1  ;;  %v3634_v63 = vpop.f32.mrb[11].mxu1  ;;  %v3642_v60 = vpop.f32.mrb[31].mxu0  ;;  %v1704_v14 = vadd.f32 %v1703_v21, %v1597_v11  ;;  %1857 = vmatprep.subr.bf16.mxu0 %v3777_v22  ;;  %v3780_v54 = vld [vmem:[%s5258_s2 + $0x34] ss:$8 sps:$4 sm:$0xff]  }
 0x761   :  { %1858 = vmatpush1.bf16.msra.mxu0 %v3775_v13  ;;  %v3778_v21 = vld [vmem:[%s5258_s2 + $0x30] ss:$8 sps:$4 sm:$0xff]   ;;  %v3970_v11 = vld [vmem:[%s5258_s2 + $0x40] ss:$8 sps:$4 sm:$0xff]  }
 0x762   :  { %3865 = vpow2.f32 %v3483_v25  ;;  %v3484_v2 = vmul.f32 -1.442695, %v1651_v19  ;;  %1859 = vmatprep.subr.bf16.mxu0 %v3780_v54  ;;  %v3987_v22 = vld [vmem:[%s5258_s2 + $0x1a0] ss:$8 sps:$4 sm:$0xff]   ;;  %v3990_v54 = vld [vmem:[%s5258_s2 + $0x1d0] ss:$8 sps:$4 sm:$0xff]  }
 0x763   :  { %v3989_v13 = vld [vmem:[%s5258_s2 + $0x1c0] ss:$8 sps:$4 sm:$0xff]  }
 0x764   :  { %3867 = vpow2.f32 %v3484_v2 }
 0x765   :  { %1860 = vmatpush1.bf16.msra.mxu0 %v3778_v21  ;;  %v3991_v21 = vld [vmem:[%s5258_s2 + $0x1e0] ss:$8 sps:$4 sm:$0xff]  }
 0x766   :  { %1917 = vmatprep.subr.bf16.mxu0 %v4019_v17 }
 0x76c   :  { %v3866_v39 = vpop.eup %3865 }
 0x76d   :  { %v1713_v61 = vadd.f32 1.0, %v3866_v39 }
 0x76e   :  { %v3868_v15 = vpop.eup %3867 }
 0x76f   :  { %3869 = vrcp.f32 %v1713_v61  ;;  %v1714_v4 = vadd.f32 1.0, %v3868_v15 }
 0x771   :  { %3871 = vrcp.f32 %v1714_v4 }
 0x779   :  { %v3870_v10 = vpop.eup %3869 }
 0x77a   :  { %v1719_v9 = vmul.f32 %v3870_v10, %v1648_v8 }
 0x77b   :  { %v3872_v12 = vpop.eup %3871 }
 0x77c   :  { %v1721_v42 = vmul.f32 %v1719_v9, %v1701_v7  ;;  %v1720_v50 = vmul.f32 %v3872_v12, %v1651_v19  ;;  %v3971_v9 = vld [vmem:[%s5258_s2 + $0x50] ss:$8 sps:$4 sm:$0xff]   ;;  %v3972_v7 = vld [vmem:[%s5258_s2 + $0x60] ss:$8 sps:$4 sm:$0xff]  }
 0x77d   :  { %v3973_v12 = vld [vmem:[%s5258_s2 + $0x70] ss:$8 sps:$4 sm:$0xff]  }
 0x77e   :  { %v1722_v34 = vmul.f32 %v1720_v50, %v1704_v14  ;;  %v3975_v50 = vld [vmem:[%s5258_s2 + $0x90] ss:$8 sps:$4 sm:$0xff]   ;;  %v3976_v14 = vld [vmem:[%s5258_s2 + $0xa0] ss:$8 sps:$4 sm:$0xff]  }
 0x780   :  { %v1731_v48 = vpack.c.bf16 %v1722_v34, %v1721_v42  ;;  %v3974_v42 = vld [vmem:[%s5258_s2 + $0x80] ss:$8 sps:$4 sm:$0xff]   ;;  %v3977_v34 = vld [vmem:[%s5258_s2 + $0xb0] ss:$8 sps:$4 sm:$0xff]  }
 0x782   :  { %3652 = vmatmul.mubr.msk.bf16.vlgmr.msra.gmra.mrb[12].mxu1 %vm1756_vm1, %v1731_v48  ;;  %v3978_v48 = vld [vmem:[%s5258_s2 + $0xc0] ss:$8 sps:$4 sm:$0xff]  }
 0x783   :  { %1960 = vmatpush1.bf16.msra.mxu1 %v3959_v49  ;;  %v3979_v49 = vld [vmem:[%s5258_s2 + $0xd0] ss:$8 sps:$4 sm:$0xff]  }
 0x784   :  { %1961 = vmatprep.subr.bf16.mxu1 %v4019_v17 }
 0x787   :  { %1962 = vmatpush1.bf16.msra.mxu1 %v3960_v3 }
 0x788   :  { %1963 = vmatprep.subr.bf16.mxu1 %v4019_v17 }
 0x78b   :  { %1964 = vmatpush1.bf16.msra.mxu1 %v3961_v56  ;;  %v3980_v56 = vld [vmem:[%s5257_s1] sm:$0xff] }
 0x78c   :  { %1965 = vmatprep.subr.bf16.mxu1 %v4019_v17 }
 0x78f   :  { %1966 = vmatpush1.bf16.msra.mxu1 %v3962_v16 }
 0x790   :  { %1967 = vmatprep.subr.bf16.mxu1 %v4019_v17 }
 0x793   :  { %1968 = vmatpush1.bf16.msra.mxu1 %v3963_v47 }
 0x794   :  { %1969 = vmatprep.subr.bf16.mxu1 %v4019_v17 }
 0x797   :  { %1970 = vmatpush1.bf16.msra.mxu1 %v3964_v52  ;;  %v1900_v52 = vld [vmem:[%s5257_s1 + $0x40] sm:$0xff] }
 0x798   :  { %1971 = vmatprep.subr.bf16.mxu1 %v4019_v17 }
 0x79b   :  { %1972 = vmatpush1.bf16.msra.mxu1 %v3965_v26  ;;  %v3981_v26 = vld [vmem:[%s5257_s1 + $0x8] sm:$0xff] }
 0x79c   :  { %1973 = vmatprep.subr.bf16.mxu1 %v4019_v17 }
 0x79f   :  { %1974 = vmatpush1.bf16.msra.mxu1 %v3966_v43 }
 0x7a0   :  { %1975 = vmatprep.subr.bf16.mxu1 %v4019_v17 }
 0x7a3   :  { %1976 = vmatpush1.bf16.msra.mxu1 %v3967_v5 }
 0x7a4   :  { %1977 = vmatprep.subr.bf16.mxu1 %v4019_v17 }
 0x7a7   :  { %1978 = vmatpush1.bf16.msra.mxu1 %v3968_v53  ;;  %v1902_v53 = vld [vmem:[%s5257_s1 + $0x50] sm:$0xff] }
 0x7a8   :  { %3655 = vmatprep.subr.bf16.mxu1 %v4700_v18 }
 0x855   :  { %v1794_v51 = vpop.f32.mrb[12].mxu1 }
 0x856   :  { %v4704_v29 = vadd.f32 %v1794_v51, %v4594_v46  ;;  %v3653_v59 = vpop.f32.mrb[13].mxu1  ;;  %v1901_v51 = vld [vmem:[%s5257_s1 + $0x48] sm:$0xff] }
 0x857   :  { %v1797_v40 = vpop.f32.mrb[14].mxu1  ;;  %v3982_v59 = vld [vmem:[%s5257_s1 + $0x10] sm:$0xff] }
 0x858   :  { %v4707_v20 = vadd.f32 %v1797_v40, %v4599_v57  ;;  %v3654_v23 = vpop.f32.mrb[15].mxu1  ;;  %v1803_v28 = vsel %vm104_vm0, %v4704_v29, 0.0 }
 0x859   :  { %1804 = vadd.xlane.f32.xlu0 %v1803_v28  ;;  %v1903_v28 = vld [vmem:[%s5257_s1 + $0x58] sm:$0xff] }
 0x85a   :  { %v1806_v31 = vsel %vm104_vm0, %v4707_v20, 0.0 }
 0x85b   :  { %1807 = vadd.xlane.f32.xlu1 %v1806_v31  ;;  %v3983_v31 = vld [vmem:[%s5257_s1 + $0x18] sm:$0xff] }
 0x8e6   :  { %v1805_v62 = vpop.xlane.xlu0 %1804 }
 0x8e7   :  { %v1809_v45 = vmul.f32 0.03125, %v1805_v62 }
 0x8e8   :  { %v1808_v41 = vpop.xlane.xlu1 %1807 }
 0x8e9   :  { %v1811_v46 = vsub.f32 %v4704_v29, %v1809_v45  ;;  %v1810_v24 = vmul.f32 0.03125, %v1808_v41 }
 0x8eb   :  { %v1812_v37 = vsub.f32 %v4707_v20, %v1810_v24  ;;  %v1813_v0 = vmul.f32 %v1811_v46, %v1811_v46 }
 0x8ed   :  { %v1815_v57 = vsel %vm104_vm0, %v1813_v0, 0.0  ;;  %v1814_v1 = vmul.f32 %v1812_v37, %v1812_v37 }
 0x8ee   :  { %1816 = vadd.xlane.f32.xlu0 %v1815_v57  ;;  %v3984_v57 = vld [vmem:[%s5258_s2 + $0x180] ss:$8 sps:$4 sm:$0xff]  }
 0x8ef   :  { %v1818_v8 = vsel %vm104_vm0, %v1814_v1, 0.0  ;;  %v3985_v1 = vld [vmem:[%s5258_s2 + $0x230] ss:$8 sps:$4 sm:$0xff]  }
 0x8f0   :  { %1819 = vadd.xlane.f32.xlu1 %v1818_v8  ;;  %v3986_v8 = vld [vmem:[%s5258_s2 + $0x190] ss:$8 sps:$4 sm:$0xff]  }
 0x97b   :  { %v1817_v25 = vpop.xlane.xlu0 %1816 }
 0x97c   :  { %v1821_v19 = vmul.f32 0.03125, %v1817_v25  ;;  %v3992_v25 = vld [vmem:[%s5258_s2 + $0x1f0] ss:$8 sps:$4 sm:$0xff]  }
 0x97d   :  { %v1820_v63 = vpop.xlane.xlu1 %1819 }
 0x97e   :  { %v1823_v60 = vadd.f32 1e-05, %v1821_v19  ;;  %v1822_v2 = vmul.f32 0.03125, %v1820_v63  ;;  %v3993_v19 = vld [vmem:[%s5258_s2 + $0x200] ss:$8 sps:$4 sm:$0xff]  }
 0x97f   :  { %v3994_v63 = vld [vmem:[%s5258_s2 + $0x210] ss:$8 sps:$4 sm:$0xff]  }
 0x980   :  { %3873 = vrsqrt.f32 %v1823_v60  ;;  %v1824_v39 = vadd.f32 1e-05, %v1822_v2 }
 0x982   :  { %3875 = vrsqrt.f32 %v1824_v39 }
 0x98a   :  { %v3874_v61 = vpop.eup %3873 }
 0x98b   :  { %v1827_v4 = vmul.f32 %v3874_v61, %v1811_v46 }
 0x98c   :  { %v3876_v15 = vpop.eup %3875 }
 0x98d   :  { %v1828_v36 = vmul.f32 %v3876_v15, %v1812_v37 }
 0x98f   :  { %v1833_v10 = vpack.c.bf16 %v1828_v36, %v1827_v4 }
 0x991   :  { %3494 = vmatmul.mubr.msk.bf16.vlgmr.msra.gmra.mrb[32].mxu0 %vm104_vm0, %v1833_v10 }
 0x992   :  { %1918 = vmatpush1.bf16.msra.mxu0 %v3970_v11 }
 0x993   :  { %1919 = vmatprep.subr.bf16.mxu0 %v4019_v17 }
 0x996   :  { %1920 = vmatpush1.bf16.msra.mxu0 %v3971_v9 }
 0x997   :  { %1921 = vmatprep.subr.bf16.mxu0 %v4019_v17 }
 0x99a   :  { %1922 = vmatpush1.bf16.msra.mxu0 %v3972_v7 }
 0x99b   :  { %1923 = vmatprep.subr.bf16.mxu0 %v4019_v17 }
 0x99e   :  { %1924 = vmatpush1.bf16.msra.mxu0 %v3973_v12 }
 0x99f   :  { %1925 = vmatprep.subr.bf16.mxu0 %v4019_v17 }
 0x9a2   :  { %1926 = vmatpush1.bf16.msra.mxu0 %v3974_v42 }
 0x9a3   :  { %1927 = vmatprep.subr.bf16.mxu0 %v4019_v17 }
 0x9a6   :  { %1928 = vmatpush1.bf16.msra.mxu0 %v3975_v50 }
 0x9a7   :  { %1929 = vmatprep.subr.bf16.mxu0 %v4019_v17 }
 0x9aa   :  { %1930 = vmatpush1.bf16.msra.mxu0 %v3976_v14 }
 0x9ab   :  { %1931 = vmatprep.subr.bf16.mxu0 %v4019_v17 }
 0x9ae   :  { %1932 = vmatpush1.bf16.msra.mxu0 %v3977_v34 }
 0x9af   :  { %1933 = vmatprep.subr.bf16.mxu0 %v4019_v17 }
 0x9b2   :  { %1934 = vmatpush1.bf16.msra.mxu0 %v3978_v48 }
 0x9b3   :  { %1935 = vmatprep.subr.bf16.mxu0 %v4019_v17 }
 0x9b6   :  { %1936 = vmatpush1.bf16.msra.mxu0 %v3979_v49 }
 0x9b7   :  { %2001 = vmatprep.subr.bf16.mxu0 %v4019_v17 }
 0xa64   :  { %v1891_v3 = vpop.f32.mrb[32].mxu0 }
 0xa65   :  { %v1904_v16 = vmul.f32 %v3980_v56, %v1891_v3  ;;  %v1893_v47 = vpop.f32.mrb[33].mxu0 }
 0xa66   :  { %v1905_v43 = vmul.f32 %v3981_v26, %v1893_v47  ;;  %v1895_v5 = vpop.f32.mrb[34].mxu0 }
 0xa67   :  { %v1906_v40 = vmul.f32 %v3982_v59, %v1895_v5  ;;  %v1897_v23 = vpop.f32.mrb[35].mxu0  ;;  %v1908_v45 = vadd.f32 %v1904_v16, %v1900_v52 }
 0xa68   :  { %v1907_v62 = vmul.f32 %v3983_v31, %v1897_v23  ;;  %v1909_v46 = vadd.f32 %v1905_v43, %v1901_v51 }
 0xa69   :  { %v1910_v41 = vadd.f32 %v1906_v40, %v1902_v53 }
 0xa6a   :  { %v1911_v24 = vadd.f32 %v1907_v62, %v1903_v28 }
 0xa6b   :  { %v1912_v37 = vpack.c.bf16 %v1910_v41, %v1908_v45 }
 0xa6c   :  { %v1913_v0 = vpack.c.bf16 %v1911_v24, %v1909_v46 }
 0xa6e   :  { %3495 = vmatprep.mubr.msk.bf16.mxu0 %vm104_vm0, %v1913_v0  ;;  %3496 = vmatprep.mubr.msk.bf16.mxu1 %vm104_vm0, %v1913_v0 }
 0xa6f   :  { %1950 = vmatmul.mubr.bf16.vlgmr.msra.gmra.mrb[36].mxu0 %v1912_v37  ;;  %1992 = vmatmul.mubr.bf16.vlgmr.msra.gmra.mrb[16].mxu1 %v1912_v37 }
 0xa70   :  { %2002 = vmatpush1.bf16.msra.mxu0 %v3984_v57  ;;  %3497 = vmatprep.mubr.msk.bf16.mxu0 %vm104_vm0, %v1913_v0 }
 0xa71   :  { %2003 = vmatprep.subr.bf16.mxu0 %v4019_v17  ;;  %3656 = vmatpush3.bf16.msra.mxu1 %v4700_v18  ;;  %v3988_v18 = vld [vmem:[%s5258_s2 + $0x1b0] ss:$8 sps:$4 sm:$0xff]  }
 0xa72   :  { %3657 = vmatprep.subr.bf16.mxu1 %v3985_v1 }
 0xa74   :  { %2004 = vmatpush1.bf16.msra.mxu0 %v3986_v8 }
 0xa75   :  { %2005 = vmatprep.subr.bf16.mxu0 %v4019_v17  ;;  %3658 = vmatpush3.bf16.msra.mxu1 %v3985_v1 }
 0xa76   :  { %3675 = vmatprep.subr.bf16.mxu1 %v4022_v27 }
 0xa78   :  { %2006 = vmatpush1.bf16.msra.mxu0 %v3987_v22 }
 0xa79   :  { %2007 = vmatprep.subr.bf16.mxu0 %v4019_v17 }
 0xa7c   :  { %2008 = vmatpush1.bf16.msra.mxu0 %v3988_v18 }
 0xa7d   :  { %2009 = vmatprep.subr.bf16.mxu0 %v4019_v17 }
 0xa80   :  { %2010 = vmatpush1.bf16.msra.mxu0 %v3989_v13 }
 0xa81   :  { %2011 = vmatprep.subr.bf16.mxu0 %v4019_v17 }
 0xa84   :  { %2012 = vmatpush1.bf16.msra.mxu0 %v3990_v54 }
 0xa85   :  { %2013 = vmatprep.subr.bf16.mxu0 %v4019_v17 }
 0xa88   :  { %2014 = vmatpush1.bf16.msra.mxu0 %v3991_v21 }
 0xa89   :  { %2015 = vmatprep.subr.bf16.mxu0 %v4019_v17 }
 0xa8c   :  { %2016 = vmatpush1.bf16.msra.mxu0 %v3992_v25 }
 0xa8d   :  { %2017 = vmatprep.subr.bf16.mxu0 %v4019_v17 }
 0xa90   :  { %2018 = vmatpush1.bf16.msra.mxu0 %v3993_v19 }
 0xa91   :  { %2019 = vmatprep.subr.bf16.mxu0 %v4019_v17 }
 0xa94   :  { %2020 = vmatpush1.bf16.msra.mxu0 %v3994_v63 }
 0xa95   :  { %3683 = vmatprep.subr.bf16.mxu0 %v4022_v27 }
 0xa97   :  { %2034 = vmatmul.mubr.bf16.vlgmr.msra.gmra.mrb[40].mxu0 %v1912_v37 }
 0xa98   :  { %3687 = vmatprep.mubr.msk.bf16.mxu0 %vm4023_vm9, %v4022_v27 }
 0xb42   :  { %v1951_v60 = vpop.f32.mrb[36].mxu0  ;;  %v1993_v2 = vpop.f32.mrb[16].mxu1 }
 0xb43   :  { %v1953_v39 = vpop.f32.mrb[37].mxu0  ;;  %v1995_v61 = vpop.f32.mrb[17].mxu1  ;;  %v4849_v34 = vpack.c.bf16 %v1993_v2, %v1993_v2 }
 0xb44   :  { %v1954_v15 = vpop.f32.mrb[38].mxu0  ;;  %v1996_v4 = vpop.f32.mrb[18].mxu1 }
 0xb45   :  { %v1958_v36 = vpack.c.bf16 %v1954_v15, %v1951_v60  ;;  %v3498_v10 = vpack.c.bf16 %v1954_v15, %v1954_v15  ;;  %v1956_v17 = vpop.f32.mrb[39].mxu0  ;;  %v1998_v11 = vpop.f32.mrb[19].mxu1  ;;  %v4851_v48 = vpack.c.bf16 %v1996_v4, %v1996_v4 }
 0xb47   :  { %v2050_v9 = vrot.slane %v1958_v36, %v4227_v30  ;;  %v2057_v7 = vrot.slane %v3498_v10, %v4227_v30 }
 0xb49   :  { %v2058_v12 = vcombine.high %v2050_v9, %v2050_v9  ;;  %v2059_v42 = vcombine.high %v2057_v7, %v2057_v7  ;;  %v2066_v50 = vrot.slane %v2050_v9, %v4227_v30  ;;  %v2073_v14 = vrot.slane %v2057_v7, %v4227_v30 }
 0xb4b   :  { %v2080_v49 = vrot.slane %v2058_v12, %v4227_v30  ;;  %v4855_v3 = vrot.slane %v2059_v42, %v4227_v30  ;;  %v2088_v56 = vcombine.high %v2066_v50, %v2066_v50  ;;  %v4857_v16 = vcombine.high %v2073_v14, %v2073_v14 }
 0xb4c   :  { %v2093_v47 = vunpack.i.h.s16 %v2066_v50  ;;  %v2101_v52 = vunpack.i.h.s16 %v2073_v14  ;;  %v3501_v26 = vpack.i.b16 %v2066_v50, %v2066_v50  ;;  %v3505_v43 = vpack.i.b16 %v2073_v14, %v2073_v14 }
 0xb4d   :  { %v2090_v5 = vcombine.high %v2080_v49, %v2080_v49  ;;  %v4861_v53 = vcombine.high %v4855_v3, %v4855_v3  ;;  %v2095_v51 = vunpack.i.h.s16 %v2080_v49  ;;  %v2097_v59 = vunpack.i.h.s16 %v2088_v56 }
 0xb4e   :  { %v2103_v40 = vunpack.i.h.s16 %v4855_v3  ;;  %v2105_v23 = vunpack.i.h.s16 %v4857_v16  ;;  %v2116_v30 = vpack.i.b16 %v2093_v47, %v2093_v47  ;;  %v3502_v28 = vpack.i.b16 %v2080_v49, %v2080_v49 }
 0xb4f   :  { %v2099_v31 = vunpack.i.h.s16 %v2090_v5  ;;  %v2107_v62 = vunpack.i.h.s16 %v4861_v53  ;;  %v2118_v45 = vpack.i.b16 %v2095_v51, %v2095_v51  ;;  %v3503_v41 = vpack.i.b16 %v2088_v56, %v2088_v56 }
 0xb50   :  { %v2120_v46 = vpack.i.b16 %v2097_v59, %v2097_v59  ;;  %v3504_v24 = vpack.i.b16 %v2090_v5, %v2090_v5  ;;  %v2124_v37 = vpack.i.b16 %v2101_v52, %v2101_v52  ;;  %v3506_v0 = vpack.i.b16 %v4855_v3, %v4855_v3 }
 0xb51   :  { %v2122_v57 = vpack.i.b16 %v2099_v31, %v2099_v31  ;;  %v2126_v1 = vpack.i.b16 %v2103_v40, %v2103_v40  ;;  %v3507_v8 = vpack.i.b16 %v4857_v16, %v4857_v16  ;;  %v2128_v22 = vpack.i.b16 %v2105_v23, %v2105_v23 }
 0xb52   :  { %v3508_v18 = vpack.i.b16 %v4861_v53, %v4861_v53  ;;  %v2130_v13 = vpack.i.b16 %v2107_v62, %v2107_v62  ;;  %v2134_v54 = vrot.slane %v3501_v26, %v4236_v44  ;;  %v2138_v21 = vrot.slane %v2116_v30, %v4236_v44 }
 0xb53   :  { %v2142_v25 = vrot.slane %v3502_v28, %v4236_v44  ;;  %v2146_v19 = vrot.slane %v2118_v45, %v4236_v44  ;;  %v2166_v63 = vrot.slane %v3505_v43, %v4236_v44  ;;  %v2170_v60 = vrot.slane %v2124_v37, %v4236_v44 }
 0xb54   :  { %v2196_v2 = vpack.i.b16 %v2134_v54, %v2134_v54  ;;  %v2203_v39 = vpack.i.b16 %v2138_v21, %v2138_v21  ;;  %v2150_v61 = vrot.slane %v3503_v41, %v4236_v44  ;;  %v2154_v15 = vrot.slane %v2120_v46, %v4236_v44 }
 0xb55   :  { %v2210_v4 = vpack.i.b16 %v2142_v25, %v2142_v25  ;;  %v2217_v36 = vpack.i.b16 %v2146_v19, %v2146_v19  ;;  %v2252_v10 = vpack.i.b16 %v2166_v63, %v2166_v63  ;;  %v2259_v17 = vpack.i.b16 %v2170_v60, %v2170_v60 }
 0xb56   :  { %v2201_v11 = vrot.slane %v2196_v2, %v4236_v44  ;;  %v2208_v9 = vrot.slane %v2203_v39, %v4236_v44  ;;  %v2224_v7 = vpack.i.b16 %v2150_v61, %v2150_v61  ;;  %v2231_v12 = vpack.i.b16 %v2154_v15, %v2154_v15 }
 0xb57   :  { %v2215_v42 = vrot.slane %v2210_v4, %v4236_v44  ;;  %v2222_v50 = vrot.slane %v2217_v36, %v4236_v44  ;;  %v2158_v14 = vrot.slane %v3504_v24, %v4236_v44  ;;  %v2162_v49 = vrot.slane %v2122_v57, %v4236_v44 }
 0xb58   :  { %v2307_v3 = vmul.bf16 %v4849_v34, %v2201_v11  ;;  %v2308_v56 = vmul.bf16 %v4849_v34, %v2208_v9  ;;  %v2229_v16 = vrot.slane %v2224_v7, %v4236_v44  ;;  %v2236_v47 = vrot.slane %v2231_v12, %v4236_v44 }
 0xb59   :  { %v2309_v52 = vmul.bf16 %v4849_v34, %v2215_v42  ;;  %v2310_v26 = vmul.bf16 %v4849_v34, %v2222_v50  ;;  %v2238_v43 = vpack.i.b16 %v2158_v14, %v2158_v14  ;;  %v2245_v5 = vpack.i.b16 %v2162_v49, %v2162_v49 }
 0xb5a   :  { %v3509_v53 = vcombine.low %v2307_v3, %v2308_v56  ;;  %v2311_v51 = vmul.bf16 %v4849_v34, %v2229_v16  ;;  %v2312_v59 = vmul.bf16 %v4849_v34, %v2236_v47  ;;  %v2257_v40 = vrot.slane %v2252_v10, %v4236_v44 }
 0xb5b   :  { %v3510_v23 = vcombine.low %v2309_v52, %v2310_v26  ;;  %v2243_v30 = vrot.slane %v2238_v43, %v4236_v44  ;;  %v2250_v28 = vrot.slane %v2245_v5, %v4236_v44  ;;  %v2264_v31 = vrot.slane %v2259_v17, %v4236_v44 }
 0xb5c   :  { %3659 = vmatprep.mubr.msk.bf16.mxu1 %vm104_vm0, %v3509_v53  ;;  %v3511_v62 = vcombine.low %v2311_v51, %v2312_v59  ;;  %v2315_v45 = vmul.bf16 %v4851_v48, %v2257_v40  ;;  %v2174_v41 = vrot.slane %v3506_v0, %v4236_v44  ;;  %v2178_v46 = vrot.slane %v2126_v1, %v4236_v44 }
 0xb5d   :  { %3660 = vmatmul.mubr.msk.bf16.vlgmr.msra.gmra.mrb[20].mxu1 %vm104_vm0, %v3510_v23  ;;  %v2313_v24 = vmul.bf16 %v4849_v34, %v2243_v30  ;;  %v2314_v37 = vmul.bf16 %v4849_v34, %v2250_v28  ;;  %v2316_v57 = vmul.bf16 %v4851_v48, %v2264_v31  ;;  %v2182_v54 = vrot.slane %v3507_v8, %v4236_v44 }
 0xb5e   :  { %3663 = vmatprep.mubr.msk.bf16.mxu1 %vm104_vm0, %v3511_v62  ;;  %v2266_v21 = vpack.i.b16 %v2174_v41, %v2174_v41  ;;  %v2273_v25 = vpack.i.b16 %v2178_v46, %v2178_v46  ;;  %v2186_v19 = vrot.slane %v2128_v22, %v4236_v44  ;;  %v2190_v0 = vrot.slane %v3508_v18, %v4236_v44 }
 0xb5f   :  { %v3512_v63 = vcombine.low %v2313_v24, %v2314_v37  ;;  %v3513_v1 = vcombine.low %v2315_v45, %v2316_v57  ;;  %v2280_v60 = vpack.i.b16 %v2182_v54, %v2182_v54  ;;  %v2194_v2 = vrot.slane %v2130_v13, %v4236_v44 }
 0xb60   :  { %v2271_v39 = vrot.slane %v2266_v21, %v4236_v44  ;;  %v2278_v34 = vrot.slane %v2273_v25, %v4236_v44  ;;  %v2287_v61 = vpack.i.b16 %v2186_v19, %v2186_v19  ;;  %v2294_v15 = vpack.i.b16 %v2190_v0, %v2190_v0 }
 0xb61   :  { %v2285_v8 = vrot.slane %v2280_v60, %v4236_v44  ;;  %v2301_v4 = vpack.i.b16 %v2194_v2, %v2194_v2 }
 0xb62   :  { %v2317_v36 = vmul.bf16 %v4851_v48, %v2271_v39  ;;  %v2318_v22 = vmul.bf16 %v4851_v48, %v2278_v34  ;;  %v2292_v18 = vrot.slane %v2287_v61, %v4236_v44  ;;  %v2299_v10 = vrot.slane %v2294_v15, %v4236_v44 }
 0xb63   :  { %v2319_v17 = vmul.bf16 %v4851_v48, %v2285_v8  ;;  %v2306_v13 = vrot.slane %v2301_v4, %v4236_v44 }
 0xb64   :  { %v3514_v11 = vcombine.low %v2317_v36, %v2318_v22  ;;  %v2320_v9 = vmul.bf16 %v4851_v48, %v2292_v18  ;;  %v2321_v7 = vmul.bf16 %v4851_v48, %v2299_v10 }
 0xb65   :  { %3664 = vmatmul.mubr.msk.bf16.gmra.mrb[24].mxu1 %vm104_vm0, %v3512_v63  ;;  %v2322_v12 = vmul.bf16 %v4851_v48, %v2306_v13 }
 0xb66   :  { %3667 = vmatprep.mubr.msk.bf16.mxu1 %vm104_vm0, %v3513_v1  ;;  %v3515_v42 = vcombine.low %v2319_v17, %v2320_v9 }
 0xb67   :  { %v3516_v50 = vcombine.low %v2321_v7, %v2322_v12 }
 0xb6a   :  { %v4925_v14 = vpop.f32.mrb[40].mxu0 }
 0xb6b   :  { %v2037_v49 = vpop.f32.mrb[41].mxu0 }
 0xb6c   :  { %v4927_v3 = vpop.f32.mrb[42].mxu0 }
 0xb6d   :  { %3668 = vmatmul.mubr.msk.bf16.gmra.mrb[28].mxu1 %vm104_vm0, %v3514_v11  ;;  %v2040_v44 = vpop.f32.mrb[43].mxu0 }
 0xb6e   :  { %3671 = vmatprep.mubr.msk.bf16.mxu1 %vm104_vm0, %v3515_v42 }
 0xb75   :  { %3672 = vmatmul.mubr.msk.bf16.gmra.mrb[32].mxu1 %vm104_vm0, %v3516_v50 }
 0xb76   :  { %3679 = vmatprep.mubr.msk.bf16.mxu1 %vm4023_vm9, %v4022_v27 }
 0xc30   :  { %v3661_v48 = vpop.f32.mrb[20].mxu1 }
 0xc31   :  { %v2486_v56 = vadd.f32 %v3661_v48, %v4322_v32  ;;  %v2421_v16 = vpop.f32.mrb[21].mxu1 }
 0xc32   :  { %v2484_v47 = vadd.f32 %v2421_v16, %v4325_v33  ;;  %v3662_v52 = vpop.f32.mrb[22].mxu1 }
 0xc33   :  { %v2514_v26 = vsel %vm104_vm0, %v2486_v56, -inf  ;;  %v4938_v43 = vadd.f32 %v3662_v52, %v4327_v35  ;;  %v2424_v5 = vpop.f32.mrb[23].mxu1 }
 0xc34   :  { %v2515_v53 = vrot.slane %v2514_v26, 4  ;;  %v2500_v51 = vsel %vm104_vm0, %v2484_v47, -inf  ;;  %v4942_v59 = vadd.f32 %v2424_v5, %v4332_v38 }
 0xc35   :  { %v2501_v40 = vrot.slane %v2500_v51, 4  ;;  %v2521_v23 = vsel %vm104_vm0, %v4938_v43, -inf }
 0xc36   :  { %v2516_v30 = vmax.f32 %v2514_v26, %v2515_v53  ;;  %v2522_v28 = vrot.slane %v2521_v23, 4  ;;  %v2507_v31 = vsel %vm104_vm0, %v4942_v59, -inf }
 0xc37   :  { %v2502_v62 = vmax.f32 %v2500_v51, %v2501_v40  ;;  %v2508_v45 = vrot.slane %v2507_v31, 4 }
 0xc38   :  { %v2517_v41 = vrot.slane %v2516_v30, 2  ;;  %v2523_v46 = vmax.f32 %v2521_v23, %v2522_v28  ;;  %v3665_v24 = vpop.f32.mrb[24].mxu1 }
 0xc39   :  { %v2503_v37 = vrot.slane %v2502_v62, 2  ;;  %v2509_v57 = vmax.f32 %v2507_v31, %v2508_v45  ;;  %v4949_v54 = vadd.f32 %v3665_v24, %v4353_v55  ;;  %v2437_v21 = vpop.f32.mrb[25].mxu1 }
 0xc3a   :  { %v2518_v25 = vmax.f32 %v2516_v30, %v2517_v41  ;;  %v2524_v19 = vrot.slane %v2523_v46, 2  ;;  %v4952_v0 = vadd.f32 %v2437_v21, %v4355_v58  ;;  %v4954_v63 = vpop.f32.mrb[26].mxu1 }
 0xc3b   :  { %v2504_v1 = vmax.f32 %v2502_v62, %v2503_v37  ;;  %v2510_v60 = vrot.slane %v2509_v57, 2  ;;  %v2542_v2 = vsel %vm104_vm0, %v4949_v54, -inf  ;;  %v2549_v39 = vsel %vm104_vm0, %v4954_v63, -inf  ;;  %v2440_v34 = vpop.f32.mrb[27].mxu1 }
 0xc3c   :  { %v2519_v61 = vrot.slane %v2518_v25, 1  ;;  %v2525_v15 = vmax.f32 %v2523_v46, %v2524_v19  ;;  %v2543_v8 = vrot.slane %v2542_v2, 4  ;;  %v2528_v4 = vsel %vm104_vm0, %v4952_v0, -inf }
 0xc3d   :  { %v2505_v36 = vrot.slane %v2504_v1, 1  ;;  %v2511_v22 = vmax.f32 %v2509_v57, %v2510_v60  ;;  %v2529_v18 = vrot.slane %v2528_v4, 4  ;;  %v2550_v10 = vrot.slane %v2549_v39, 4 }
 0xc3e   :  { %v2520_v17 = vmax.f32 %v2518_v25, %v2519_v61  ;;  %v2526_v13 = vrot.slane %v2525_v15, 1  ;;  %v2544_v11 = vmax.f32 %v2542_v2, %v2543_v8  ;;  %v4963_v9 = vadd.f32 %v2440_v34, %v4366_v6 }
 0xc3f   :  { %v2506_v7 = vmax.f32 %v2504_v1, %v2505_v36  ;;  %v2512_v12 = vrot.slane %v2511_v22, 1  ;;  %v2530_v42 = vmax.f32 %v2528_v4, %v2529_v18  ;;  %v2551_v50 = vmax.f32 %v2549_v39, %v2550_v10  ;;  %v3782_v36 = vld [vmem:[%s5258_s2 + $0x270] ss:$8 sps:$4 sm:$0xff]  }
 0xc40   :  { %v2614_v49 = vsub.f32 %v2486_v56, %v2520_v17  ;;  %v2527_v44 = vmax.f32 %v2525_v15, %v2526_v13  ;;  %v2545_v48 = vrot.slane %v2544_v11, 2  ;;  %v2535_v16 = vsel %vm104_vm0, %v4963_v9, -inf  ;;  %v3669_v52 = vpop.f32.mrb[28].mxu1 }
 0xc41   :  { %v2612_v26 = vsub.f32 %v2484_v47, %v2506_v7  ;;  %v2513_v5 = vmax.f32 %v2511_v22, %v2512_v12  ;;  %v2531_v53 = vrot.slane %v2530_v42, 2  ;;  %v2552_v51 = vrot.slane %v2551_v50, 2  ;;  %v2453_v40 = vpop.f32.mrb[29].mxu1 }
 0xc42   :  { %v2632_v23 = vmul.f32 1.442695, %v2614_v49  ;;  %v2615_v30 = vsub.f32 %v4938_v43, %v2527_v44  ;;  %v2546_v28 = vmax.f32 %v2544_v11, %v2545_v48  ;;  %v2536_v31 = vrot.slane %v2535_v16, 4  ;;  %v3670_v62 = vpop.f32.mrb[30].mxu1 }
 0xc43   :  { %v2628_v45 = vmul.f32 1.442695, %v2612_v26  ;;  %v2613_v56 = vsub.f32 %v4942_v59, %v2513_v5  ;;  %v2532_v41 = vmax.f32 %v2530_v42, %v2531_v53  ;;  %v2553_v46 = vmax.f32 %v2551_v50, %v2552_v51  ;;  %v2456_v24 = vpop.f32.mrb[31].mxu1  ;;  %v3781_v59 = vld [vmem:[%s5258_s2 + $0x260] ss:$8 sps:$4 sm:$0xff]  }
 0xc44   :  { %3877 = vpow2.f32 %v2632_v23  ;;  %v2634_v37 = vmul.f32 1.442695, %v2615_v30  ;;  %v2547_v57 = vrot.slane %v2546_v28, 1  ;;  %v2537_v47 = vmax.f32 %v2535_v16, %v2536_v31  ;;  %3676 = vmatpush3.bf16.msra.mxu1 %v3781_v59 }
 0xc45   :  { %3879 = vpow2.f32 %v2628_v45  ;;  %v2630_v21 = vmul.f32 1.442695, %v2613_v56  ;;  %v2533_v25 = vrot.slane %v2532_v41, 1  ;;  %v2554_v19 = vrot.slane %v2553_v46, 1  ;;  %3677 = vmatprep.subr.bf16.mxu1 %v4022_v27 }
 0xc46   :  { %3881 = vpow2.f32 %v2634_v37  ;;  %v2548_v1 = vmax.f32 %v2546_v28, %v2547_v57  ;;  %v2538_v43 = vrot.slane %v2537_v47, 2  ;;  %v4970_v60 = vadd.f32 %v3669_v52, %v4322_v32 }
 0xc47   :  { %3883 = vpow2.f32 %v2630_v21  ;;  %v2534_v2 = vmax.f32 %v2532_v41, %v2533_v25  ;;  %v2555_v39 = vmax.f32 %v2553_v46, %v2554_v19  ;;  %v4976_v34 = vadd.f32 %v2453_v40, %v4325_v33 }
 0xc48   :  { %v2618_v61 = vsub.f32 %v4949_v54, %v2548_v1  ;;  %v2539_v15 = vmax.f32 %v2537_v47, %v2538_v43  ;;  %v2570_v8 = vsel %vm104_vm0, %v4970_v60, -inf  ;;  %v4982_v4 = vadd.f32 %v3670_v62, %v4327_v35  ;;  %v4984_v32 = vpop.f32.mrb[32].mxu1  ;;  %3678 = vmatpush3.bf16.msra.mxu1 %v3782_v36 }
 0xc49   :  { %v2616_v22 = vsub.f32 %v4952_v0, %v2534_v2  ;;  %v2619_v33 = vsub.f32 %v4954_v63, %v2555_v39  ;;  %v2571_v18 = vrot.slane %v2570_v8, 4  ;;  %v2556_v54 = vsel %vm104_vm0, %v4976_v34, -inf  ;;  %v4993_v10 = vpop.f32.mrb[33].mxu1  ;;  %3691 = vmatprep.subr.bf16.mxu1 %v4022_v27 }
 0xc4a   :  { %v2640_v35 = vmul.f32 1.442695, %v2618_v61  ;;  %v2540_v17 = vrot.slane %v2539_v15, 1  ;;  %v2557_v13 = vrot.slane %v2556_v54, 4  ;;  %v2577_v11 = vsel %vm104_vm0, %v4982_v4, -inf  ;;  %v4998_v7 = vpop.f32.mrb[34].mxu1 }
 0xc4b   :  { %v2636_v12 = vmul.f32 1.442695, %v2616_v22  ;;  %v2642_v0 = vmul.f32 1.442695, %v2619_v33  ;;  %v2572_v42 = vmax.f32 %v2570_v8, %v2571_v18  ;;  %v2578_v63 = vrot.slane %v2577_v11, 4  ;;  %v5000_v50 = vpop.f32.mrb[35].mxu1 }
 0xc4c   :  { %3885 = vpow2.f32 %v2640_v35  ;;  %v5002_v49 = vmax.f32 %v2539_v15, %v2540_v17  ;;  %v5004_v44 = vmax.f32 %v2556_v54, %v2557_v13  ;;  %v5012_v5 = vadd.f32 %v2456_v24, %v4332_v38 }
 0xc4d   :  { %3887 = vpow2.f32 %v2636_v12  ;;  %v2573_v48 = vrot.slane %v2572_v42, 2  ;;  %v5006_v16 = vmax.f32 %v2577_v11, %v2578_v63 }
 0xc4e   :  { %v3878_v52 = vpop.eup %3877  ;;  %3889 = vpow2.f32 %v2642_v0  ;;  %v2617_v26 = vsub.f32 %v4963_v9, %v5002_v49  ;;  %v2559_v30 = vrot.slane %v5004_v44, 2 }
 0xc4f   :  { %v3880_v53 = vpop.eup %3879  ;;  %v2674_v51 = vsel %vm104_vm0, %v3878_v52, 0.0  ;;  %v2774_v40 = vmul.f32 %v3878_v52, %v4925_v14  ;;  %v5016_v23 = vmax.f32 %v2572_v42, %v2573_v48  ;;  %v2580_v56 = vrot.slane %v5006_v16, 2 }
 0xc50   :  { %v3882_v28 = vpop.eup %3881  ;;  %v2675_v31 = vrot.slane %v2674_v51, 4  ;;  %v2660_v62 = vsel %vm104_vm0, %v3880_v53, 0.0  ;;  %v2772_v45 = vmul.f32 %v3880_v53, %v4925_v14 }
 0xc51   :  { %v3884_v41 = vpop.eup %3883  ;;  %v2802_v38 = vsel %vm104_vm0, %v2774_v40, 0.0  ;;  %v2661_v46 = vrot.slane %v2660_v62, 4  ;;  %v2681_v24 = vsel %vm104_vm0, %v3882_v28, 0.0  ;;  %v2775_v37 = vmul.f32 %v3882_v28, %v4925_v14 }
 0xc52   :  { %v2676_v57 = vadd.f32 %v2675_v31, %v2674_v51  ;;  %v2803_v47 = vrot.slane %v2802_v38, 4  ;;  %v2788_v21 = vsel %vm104_vm0, %v2772_v45, 0.0  ;;  %v2682_v25 = vrot.slane %v2681_v24, 4 }
 0xc53   :  { %v2662_v19 = vadd.f32 %v2661_v46, %v2660_v62  ;;  %v2789_v1 = vrot.slane %v2788_v21, 4  ;;  %v2809_v43 = vsel %vm104_vm0, %v2775_v37, 0.0  ;;  %v2667_v59 = vsel %vm104_vm0, %v3884_v41, 0.0 }
 0xc54   :  { %v2677_v2 = vrot.slane %v2676_v57, 2  ;;  %v2804_v39 = vadd.f32 %v2803_v47, %v2802_v38  ;;  %v2683_v61 = vadd.f32 %v2682_v25, %v2681_v24  ;;  %v2810_v15 = vrot.slane %v2809_v43, 4 }
 0xc55   :  { %v2663_v8 = vrot.slane %v2662_v19, 2  ;;  %v2790_v36 = vadd.f32 %v2789_v1, %v2788_v21  ;;  %v2668_v22 = vrot.slane %v2667_v59, 4  ;;  %v2773_v33 = vmul.f32 %v3884_v41, %v4925_v14 }
 0xc56   :  { %v3886_v18 = vpop.eup %3885  ;;  %v2678_v54 = vadd.f32 %v2677_v2, %v2676_v57  ;;  %v2805_v35 = vrot.slane %v2804_v39, 2  ;;  %v2684_v17 = vrot.slane %v2683_v61, 2  ;;  %v2811_v13 = vadd.f32 %v2810_v15, %v2809_v43 }
 0xc57   :  { %v3888_v11 = vpop.eup %3887  ;;  %v2664_v12 = vadd.f32 %v2663_v8, %v2662_v19  ;;  %v2791_v0 = vrot.slane %v2790_v36, 2  ;;  %v2669_v42 = vadd.f32 %v2668_v22, %v2667_v59  ;;  %v2795_v63 = vsel %vm104_vm0, %v2773_v33, 0.0 }
 0xc58   :  { %v3890_v48 = vpop.eup %3889  ;;  %v2679_v52 = vrot.slane %v2678_v54, 1  ;;  %v2806_v53 = vadd.f32 %v2805_v35, %v2804_v39  ;;  %v2685_v51 = vadd.f32 %v2684_v17, %v2683_v61  ;;  %v2812_v40 = vrot.slane %v2811_v13, 2 }
 0xc59   :  { %v2665_v28 = vrot.slane %v2664_v12, 1  ;;  %v2792_v31 = vadd.f32 %v2791_v0, %v2790_v36  ;;  %v2670_v62 = vrot.slane %v2669_v42, 2  ;;  %v2796_v45 = vrot.slane %v2795_v63, 4 }
 0xc5a   :  { %v2680_v41 = vadd.f32 %v2679_v52, %v2678_v54  ;;  %v2807_v38 = vrot.slane %v2806_v53, 1  ;;  %v2686_v46 = vrot.slane %v2685_v51, 1  ;;  %v2813_v24 = vadd.f32 %v2812_v40, %v2811_v13 }
 0xc5b   :  { %v2666_v37 = vadd.f32 %v2665_v28, %v2664_v12  ;;  %v2793_v57 = vrot.slane %v2792_v31, 1  ;;  %v2671_v47 = vadd.f32 %v2670_v62, %v2669_v42  ;;  %v2797_v21 = vadd.f32 %v2796_v45, %v2795_v63 }
 0xc5c   :  { %v2808_v25 = vadd.f32 %v2807_v38, %v2806_v53  ;;  %3891 = vrcp.f32 %v2680_v41  ;;  %v2687_v19 = vadd.f32 %v2686_v46, %v2685_v51  ;;  %v2638_v1 = vmul.f32 1.442695, %v2617_v26 }
 0xc5d   :  { %3893 = vrcp.f32 %v2666_v37  ;;  %v2814_v43 = vrot.slane %v2813_v24, 1  ;;  %v2672_v59 = vrot.slane %v2671_v47, 1  ;;  %v2798_v2 = vrot.slane %v2797_v21, 2 }
 0xc5e   :  { %v2794_v39 = vadd.f32 %v2793_v57, %v2792_v31  ;;  %3895 = vrcp.f32 %v2687_v19  ;;  %v2702_v61 = vsel %vm104_vm0, %v3886_v18, 0.0  ;;  %v2778_v15 = vmul.f32 %v3886_v18, %v4925_v14 }
 0xc5f   :  { %v2673_v8 = vadd.f32 %v2672_v59, %v2671_v47  ;;  %v2799_v36 = vadd.f32 %v2798_v2, %v2797_v21  ;;  %v2703_v22 = vrot.slane %v2702_v61, 4  ;;  %v2688_v33 = vsel %vm104_vm0, %v3888_v11, 0.0 }
 0xc60   :  { %v2830_v54 = vsel %vm104_vm0, %v2778_v15, 0.0  ;;  %v2689_v35 = vrot.slane %v2688_v33, 4  ;;  %v2776_v9 = vmul.f32 %v3888_v11, %v4925_v14  ;;  %v2709_v49 = vsel %vm104_vm0, %v3890_v48, 0.0 }
 0xc61   :  { %v2800_v26 = vrot.slane %v2799_v36, 1  ;;  %3897 = vrcp.f32 %v2673_v8  ;;  %v2704_v17 = vadd.f32 %v2703_v22, %v2702_v61  ;;  %v2831_v13 = vrot.slane %v2830_v54, 4 }
 0xc62   :  { %v2690_v12 = vadd.f32 %v2689_v35, %v2688_v33  ;;  %v2816_v0 = vsel %vm104_vm0, %v2776_v9, 0.0  ;;  %v2710_v18 = vrot.slane %v2709_v49, 4  ;;  %v2779_v42 = vmul.f32 %v3890_v48, %v4925_v14 }
 0xc63   :  { %v2815_v63 = vadd.f32 %v2814_v43, %v2813_v24  ;;  %v2705_v52 = vrot.slane %v2704_v17, 2  ;;  %v2832_v53 = vadd.f32 %v2831_v13, %v2830_v54  ;;  %v2817_v51 = vrot.slane %v2816_v0, 4 }
 0xc64   :  { %v2691_v40 = vrot.slane %v2690_v12, 2  ;;  %v2711_v28 = vadd.f32 %v2710_v18, %v2709_v49  ;;  %v2837_v11 = vsel %vm104_vm0, %v2779_v42, 0.0  ;;  %3899 = vpow2.f32 %v2638_v1 }
 0xc65   :  { %v2706_v31 = vadd.f32 %v2705_v52, %v2704_v17  ;;  %v2833_v62 = vrot.slane %v2832_v53, 2  ;;  %v2818_v45 = vadd.f32 %v2817_v51, %v2816_v0  ;;  %v2838_v41 = vrot.slane %v2837_v11, 4 }
 0xc66   :  { %v3892_v38 = vpop.eup %3891  ;;  %v2801_v46 = vadd.f32 %v2800_v26, %v2799_v36  ;;  %v2692_v37 = vadd.f32 %v2691_v40, %v2690_v12  ;;  %v2712_v57 = vrot.slane %v2711_v28, 2  ;;  %v2575_v47 = vrot.slane %v5016_v23, 1 }
 0xc67   :  { %v3894_v48 = vpop.eup %3893  ;;  %v5043_v24 = vmul.f32 %v3892_v38, %v2808_v25  ;;  %v2707_v21 = vrot.slane %v2706_v31, 1  ;;  %v2834_v19 = vadd.f32 %v2833_v62, %v2832_v53  ;;  %v2819_v43 = vrot.slane %v2818_v45, 2 }
 0xc68   :  { %v3896_v59 = vpop.eup %3895  ;;  %v2916_v2 = vmul.f32 %v3894_v48, %v2794_v39  ;;  %v2693_v61 = vrot.slane %v2692_v37, 1  ;;  %v2713_v1 = vadd.f32 %v2712_v57, %v2711_v28  ;;  %v2560_v15 = vmax.f32 %v5004_v44, %v2559_v30 }
 0xc69   :  { %v5048_v8 = vmul.f32 %v3896_v59, %v2815_v63  ;;  %v2708_v36 = vadd.f32 %v2707_v21, %v2706_v31  ;;  %v2835_v22 = vrot.slane %v2834_v19, 1  ;;  %v2839_v33 = vadd.f32 %v2838_v41, %v2837_v11 }
 0xc6a   :  { %v2936_v54 = vpack.c.bf16 %v2916_v2, %v2916_v2  ;;  %v2694_v35 = vadd.f32 %v2693_v61, %v2692_v37  ;;  %v2820_v25 = vadd.f32 %v2819_v43, %v2818_v45  ;;  %v2714_v9 = vrot.slane %v2713_v1, 1 }
 0xc6b   :  { %v3898_v49 = vpop.eup %3897  ;;  %v2938_v26 = vpack.c.bf16 %v5043_v24, %v5043_v24  ;;  %3901 = vrcp.f32 %v2708_v36  ;;  %v2563_v39 = vsel %vm104_vm0, %v5012_v5, -inf  ;;  %v5056_v44 = vadd.f32 %v4984_v32, %v4353_v55 }
 0xc6c   :  { %v2939_v30 = vpack.c.bf16 %v5048_v8, %v5048_v8  ;;  %v2917_v17 = vmul.f32 %v3898_v49, %v2801_v46  ;;  %v2836_v13 = vadd.f32 %v2835_v22, %v2834_v19  ;;  %3903 = vrcp.f32 %v2694_v35 }
 0xc6d   :  { %v2821_v12 = vrot.slane %v2820_v25, 1  ;;  %v2715_v0 = vadd.f32 %v2714_v9, %v2713_v1  ;;  %v2840_v18 = vrot.slane %v2839_v33, 2  ;;  %v2576_v42 = vmax.f32 %v5016_v23, %v2575_v47 }
 0xc6e   :  { %v3900_v63 = vpop.eup %3899  ;;  %v2968_v52 = vunpack.c.l.b16 %v2936_v54  ;;  %v2937_v53 = vpack.c.bf16 %v2917_v17, %v2917_v17  ;;  %v2561_v51 = vrot.slane %v2560_v15, 1  ;;  %v2581_v55 = vmax.f32 %v5006_v16, %v2580_v56 }
 0xc6f   :  { %v2841_v32 = vadd.f32 %v2840_v18, %v2839_v33  ;;  %3905 = vrcp.f32 %v2715_v0  ;;  %v2695_v40 = vsel %vm104_vm0, %v3900_v63, 0.0  ;;  %v2777_v28 = vmul.f32 %v3900_v63, %v4925_v14 }
 0xc70   :  { %v2969_v11 = vunpack.c.l.b16 %v2937_v53  ;;  %v2696_v31 = vrot.slane %v2695_v40, 4  ;;  %v2622_v62 = vsub.f32 %v4970_v60, %v2576_v42  ;;  %v2562_v45 = vmax.f32 %v2560_v15, %v2561_v51 }
 0xc71   :  { %v2822_v23 = vadd.f32 %v2821_v12, %v2820_v25  ;;  %v2823_v41 = vsel %vm104_vm0, %v2777_v28, 0.0  ;;  %v2582_v38 = vrot.slane %v2581_v55, 1  ;;  %v2564_v46 = vrot.slane %v2563_v39, 4 }
 0xc72   :  { %v2984_v37 = vsel %vm1479_vm8, %v2969_v11, %v2968_v52  ;;  %v2697_v57 = vadd.f32 %v2696_v31, %v2695_v40  ;;  %v2824_v16 = vrot.slane %v2823_v41, 4  ;;  %v2648_v56 = vmul.f32 1.442695, %v2622_v62 }
 0xc73   :  { %v2842_v47 = vrot.slane %v2841_v32, 1  ;;  %v2620_v48 = vsub.f32 %v4976_v34, %v2562_v45  ;;  %v2583_v21 = vmax.f32 %v2581_v55, %v2582_v38  ;;  %v2565_v14 = vmax.f32 %v2563_v39, %v2564_v46 }
 0xc74   :  { %v2698_v19 = vrot.slane %v2697_v57, 2  ;;  %v2825_v43 = vadd.f32 %v2824_v16, %v2823_v41  ;;  %3907 = vpow2.f32 %v2648_v56  ;;  %v2598_v60 = vsel %vm104_vm0, %v5056_v44, -inf }
 0xc75   :  { %v3902_v59 = vpop.eup %3901  ;;  %v2644_v2 = vmul.f32 1.442695, %v2620_v48  ;;  %v2623_v61 = vsub.f32 %v4982_v4, %v2583_v21  ;;  %v2566_v1 = vrot.slane %v2565_v14, 2  ;;  %v2599_v15 = vrot.slane %v2598_v60, 4 }
 0xc76   :  { %v3904_v36 = vpop.eup %3903  ;;  %v2922_v22 = vmul.f32 %v3902_v59, %v2836_v13  ;;  %v2699_v33 = vadd.f32 %v2698_v19, %v2697_v57  ;;  %v2826_v54 = vrot.slane %v2825_v43, 2  ;;  %v5075_v34 = vadd.f32 %v4993_v10, %v4355_v58 }
 0xc77   :  { %v2920_v35 = vmul.f32 %v3904_v36, %v2822_v23  ;;  %3909 = vpow2.f32 %v2644_v2  ;;  %v2650_v25 = vmul.f32 1.442695, %v2623_v61  ;;  %v2567_v9 = vmax.f32 %v2565_v14, %v2566_v1 }
 0xc78   :  { %v2843_v49 = vadd.f32 %v2842_v47, %v2841_v32  ;;  %v2700_v39 = vrot.slane %v2699_v33, 1  ;;  %v2827_v17 = vadd.f32 %v2826_v54, %v2825_v43  ;;  %v2600_v12 = vmax.f32 %v2598_v60, %v2599_v15 }
 0xc79   :  { %v3906_v0 = vpop.eup %3905  ;;  %3911 = vpow2.f32 %v2650_v25  ;;  %v2568_v4 = vrot.slane %v2567_v9, 1  ;;  %v2584_v13 = vsel %vm104_vm0, %v5075_v34, -inf  ;;  %v2942_v18 = vpack.c.bf16 %v2922_v22, %v2922_v22 }
 0xc7a   :  { %v2940_v42 = vpack.c.bf16 %v2920_v35, %v2920_v35  ;;  %v5079_v63 = vmul.f32 %v3906_v0, %v2843_v49  ;;  %v2701_v58 = vadd.f32 %v2700_v39, %v2699_v33  ;;  %v2970_v10 = vunpack.c.l.b16 %v2938_v26 }
 0xc7b   :  { %v2569_v52 = vmax.f32 %v2567_v9, %v2568_v4  ;;  %v2601_v53 = vrot.slane %v2600_v12, 2  ;;  %v2585_v51 = vrot.slane %v2584_v13, 4  ;;  %v5087_v55 = vunpack.c.l.b16 %v2939_v30 }
 0xc7c   :  { %v2828_v32 = vrot.slane %v2827_v17, 1  ;;  %3913 = vrcp.f32 %v2701_v58  ;;  %v2605_v40 = vsel %vm104_vm0, %v4998_v7, -inf  ;;  %v5092_v26 = vunpack.c.l.b16 %v2942_v18 }
 0xc7d   :  { %v2621_v28 = vsub.f32 %v5012_v5, %v2569_v52  ;;  %v2602_v11 = vmax.f32 %v2600_v12, %v2601_v53  ;;  %v2586_v31 = vmax.f32 %v2584_v13, %v2585_v51  ;;  %v2606_v62 = vrot.slane %v2605_v40, 4 }
 0xc7e   :  { %v3908_v24 = vpop.eup %3907  ;;  %v5094_v45 = vunpack.c.l.b16 %v2940_v42  ;;  %v5098_v8 = vadd.f32 %v5000_v50, %v4366_v6  ;;  %v5101_v30 = vsel %vm1481_vm10, %v2970_v10, %v2984_v37  ;;  %v2943_v46 = vpack.c.bf16 %v5079_v63, %v5079_v63 }
 0xc7f   :  { %v2730_v23 = vsel %vm104_vm0, %v3908_v24, 0.0  ;;  %v2782_v41 = vmul.f32 %v3908_v24, %v4927_v3  ;;  %v2646_v5 = vmul.f32 1.442695, %v2621_v28  ;;  %v2603_v38 = vrot.slane %v2602_v11, 1 }
 0xc80   :  { %v2829_v57 = vadd.f32 %v2828_v32, %v2827_v17  ;;  %v2731_v16 = vrot.slane %v2730_v23, 4  ;;  %v2587_v56 = vrot.slane %v2586_v31, 2  ;;  %v2607_v50 = vmax.f32 %v2605_v40, %v2606_v62 }
 0xc81   :  { %v3910_v47 = vpop.eup %3909  ;;  %v2858_v48 = vsel %vm104_vm0, %v2782_v41, 0.0  ;;  %3915 = vpow2.f32 %v2646_v5  ;;  %v2604_v6 = vmax.f32 %v2602_v11, %v2603_v38  ;;  %v2591_v61 = vsel %vm104_vm0, %v5098_v8, -inf }
 0xc82   :  { %v2732_v37 = vadd.f32 %v2731_v16, %v2730_v23  ;;  %v2859_v21 = vrot.slane %v2858_v48, 4  ;;  %v2716_v14 = vsel %vm104_vm0, %v3910_v47, 0.0  ;;  %v2780_v19 = vmul.f32 %v3910_v47, %v4927_v3 }
 0xc83   :  { %v3912_v43 = vpop.eup %3911  ;;  %v2717_v60 = vrot.slane %v2716_v14, 4  ;;  %v2626_v59 = vsub.f32 %v5056_v44, %v2604_v6  ;;  %v2588_v2 = vmax.f32 %v2586_v31, %v2587_v56  ;;  %v2608_v11 = vrot.slane %v2607_v50, 2 }
 0xc84   :  { %v2733_v1 = vrot.slane %v2732_v37, 2  ;;  %v2860_v15 = vadd.f32 %v2859_v21, %v2858_v48  ;;  %v2844_v36 = vsel %vm104_vm0, %v2780_v19, 0.0  ;;  %v2737_v22 = vsel %vm104_vm0, %v3912_v43, 0.0 }
 0xc85   :  { %v2718_v33 = vadd.f32 %v2717_v60, %v2716_v14  ;;  %v2845_v54 = vrot.slane %v2844_v36, 4  ;;  %v2738_v35 = vrot.slane %v2737_v22, 4  ;;  %v2783_v25 = vmul.f32 %v3912_v43, %v4927_v3 }
 0xc86   :  { %v3914_v9 = vpop.eup %3913  ;;  %v2734_v49 = vadd.f32 %v2733_v1, %v2732_v37  ;;  %v2861_v39 = vrot.slane %v2860_v15, 2  ;;  %v2656_v17 = vmul.f32 1.442695, %v2626_v59  ;;  %v2589_v44 = vrot.slane %v2588_v2, 1 }
 0xc87   :  { %v2921_v12 = vmul.f32 %v3914_v9, %v2829_v57  ;;  %v2719_v0 = vrot.slane %v2718_v33, 2  ;;  %v2846_v4 = vadd.f32 %v2845_v54, %v2844_v36  ;;  %v2739_v13 = vadd.f32 %v2738_v35, %v2737_v22 }
 0xc88   :  { %v2735_v18 = vrot.slane %v2734_v49, 1  ;;  %v2862_v42 = vadd.f32 %v2861_v39, %v2860_v15  ;;  %v2865_v58 = vsel %vm104_vm0, %v2783_v25, 0.0  ;;  %3917 = vpow2.f32 %v2656_v17 }
 0xc89   :  { %v2941_v10 = vpack.c.bf16 %v2921_v12, %v2921_v12  ;;  %v2720_v52 = vadd.f32 %v2719_v0, %v2718_v33  ;;  %v2847_v53 = vrot.slane %v2846_v4, 2  ;;  %v2740_v51 = vrot.slane %v2739_v13, 2 }
 0xc8a   :  { %v2736_v32 = vadd.f32 %v2735_v18, %v2734_v49  ;;  %v2866_v40 = vrot.slane %v2865_v58, 4  ;;  %v2590_v28 = vmax.f32 %v2588_v2, %v2589_v44  ;;  %v2863_v62 = vrot.slane %v2862_v42, 1 }
 0xc8b   :  { %v3916_v31 = vpop.eup %3915  ;;  %v2721_v24 = vrot.slane %v2720_v52, 1  ;;  %v2741_v23 = vadd.f32 %v2740_v51, %v2739_v13  ;;  %v2592_v41 = vrot.slane %v2591_v61, 4  ;;  %v2973_v5 = vunpack.c.l.b16 %v2941_v10 }
 0xc8c   :  { %3919 = vrcp.f32 %v2736_v32  ;;  %v2867_v38 = vadd.f32 %v2866_v40, %v2865_v58  ;;  %v2723_v57 = vsel %vm104_vm0, %v3916_v31, 0.0  ;;  %v2848_v56 = vadd.f32 %v2847_v53, %v2846_v4 }
 0xc8d   :  { %v2722_v16 = vadd.f32 %v2721_v24, %v2720_v52  ;;  %v2742_v47 = vrot.slane %v2741_v23, 1  ;;  %v2724_v48 = vrot.slane %v2723_v57, 4  ;;  %v2781_v37 = vmul.f32 %v3916_v31, %v4927_v3 }
 0xc8e   :  { %v2868_v6 = vrot.slane %v2867_v38, 2  ;;  %v2624_v21 = vsub.f32 %v5075_v34, %v2590_v28  ;;  %v2609_v14 = vmax.f32 %v2607_v50, %v2608_v11  ;;  %v2864_v19 = vadd.f32 %v2863_v62, %v2862_v42 }
 0xc8f   :  { %3921 = vrcp.f32 %v2722_v16  ;;  %v2743_v43 = vadd.f32 %v2742_v47, %v2741_v23  ;;  %v2725_v60 = vadd.f32 %v2724_v48, %v2723_v57  ;;  %v2851_v2 = vsel %vm104_vm0, %v2781_v37, 0.0 }
 0xc90   :  { %v2869_v59 = vadd.f32 %v2868_v6, %v2867_v38  ;;  %v2652_v1 = vmul.f32 1.442695, %v2624_v21  ;;  %v2610_v15 = vrot.slane %v2609_v14, 1  ;;  %v2852_v22 = vrot.slane %v2851_v2, 4 }
 0xc91   :  { %3923 = vrcp.f32 %v2743_v43  ;;  %v2726_v36 = vrot.slane %v2725_v60, 2  ;;  %v2593_v33 = vmax.f32 %v2591_v61, %v2592_v41  ;;  %v2849_v35 = vrot.slane %v2848_v56, 1 }
 0xc92   :  { %v3918_v54 = vpop.eup %3917  ;;  %3925 = vpow2.f32 %v2652_v1  ;;  %v2611_v25 = vmax.f32 %v2609_v14, %v2610_v15  ;;  %v2986_v34 = vsel %vm1483_vm11, %v5087_v55, %v5101_v30  ;;  %v2853_v9 = vadd.f32 %v2852_v22, %v2851_v2 }
 0xc93   :  { %v2727_v50 = vadd.f32 %v2726_v36, %v2725_v60  ;;  %v2758_v49 = vsel %vm104_vm0, %v3918_v54, 0.0  ;;  %v2786_v39 = vmul.f32 %v3918_v54, %v4927_v3  ;;  %v2870_v17 = vrot.slane %v2869_v59, 1 }
 0xc94   :  { %v2759_v44 = vrot.slane %v2758_v49, 4  ;;  %v2627_v12 = vsub.f32 %v4998_v7, %v2611_v25  ;;  %v2594_v0 = vrot.slane %v2593_v33, 2  ;;  %v2854_v4 = vrot.slane %v2853_v9, 2 }
 0xc95   :  { %v2728_v61 = vrot.slane %v2727_v50, 1  ;;  %v2886_v13 = vsel %vm104_vm0, %v2786_v39, 0.0  ;;  %v2987_v18 = vsel %vm1485_vm12, %v5094_v45, %v2986_v34  ;;  %v2975_v51 = vunpack.c.l.b16 %v2943_v46 }
 0xc96   :  { %v3920_v42 = vpop.eup %3919  ;;  %v2760_v55 = vadd.f32 %v2759_v44, %v2758_v49  ;;  %v2887_v30 = vrot.slane %v2886_v13, 4  ;;  %v2658_v58 = vmul.f32 1.442695, %v2627_v12  ;;  %v2595_v10 = vmax.f32 %v2593_v33, %v2594_v0 }
 0xc97   :  { %v2926_v52 = vmul.f32 %v3920_v42, %v2864_v19  ;;  %v2729_v53 = vadd.f32 %v2728_v61, %v2727_v50  ;;  %v2988_v7 = vsel %vm1487_vm13, %v2973_v5, %v2987_v18  ;;  %v2850_v32 = vadd.f32 %v2849_v35, %v2848_v56 }
 0xc98   :  { %v2761_v40 = vrot.slane %v2760_v55, 2  ;;  %3927 = vpow2.f32 %v2658_v58  ;;  %v2596_v28 = vrot.slane %v2595_v10, 1  ;;  %v2871_v31 = vadd.f32 %v2870_v17, %v2869_v59 }
 0xc99   :  { %v3922_v11 = vpop.eup %3921  ;;  %3929 = vrcp.f32 %v2729_v53  ;;  %v2888_v45 = vadd.f32 %v2887_v30, %v2886_v13  ;;  %v2989_v62 = vsel %vm1489_vm14, %v5092_v26, %v2988_v7  ;;  %v2855_v23 = vadd.f32 %v2854_v4, %v2853_v9 }
 0xc9a   :  { %v2924_v24 = vmul.f32 %v3922_v11, %v2850_v32  ;;  %v2762_v41 = vadd.f32 %v2761_v40, %v2760_v55  ;;  %v2597_v38 = vmax.f32 %v2595_v10, %v2596_v28  ;;  %v5137_v63 = vsel %vm1491_vm15, %v2975_v51, %v2989_v62 }
 0xc9b   :  { %v3924_v57 = vpop.eup %3923  ;;  %v2889_v56 = vrot.slane %v2888_v45, 2  ;;  %v2856_v37 = vrot.slane %v2855_v23, 1  ;;  %v2946_v34 = vpack.c.bf16 %v2926_v52, %v2926_v52 }
 0xc9c   :  { %v3926_v46 = vpop.eup %3925  ;;  %v2927_v5 = vmul.f32 %v3924_v57, %v2871_v31  ;;  %v2763_v16 = vrot.slane %v2762_v41, 1  ;;  %v2625_v6 = vsub.f32 %v5098_v8, %v2597_v38  ;;  %v2944_v8 = vpack.c.bf16 %v2924_v24, %v2924_v24 }
 0xc9d   :  { %v2744_v47 = vsel %vm104_vm0, %v3926_v46, 0.0  ;;  %v2784_v48 = vmul.f32 %v3926_v46, %v4927_v3  ;;  %v2890_v60 = vadd.f32 %v2889_v56, %v2888_v45  ;;  %v2857_v1 = vadd.f32 %v2856_v37, %v2855_v23 }
 0xc9e   :  { %v2764_v26 = vadd.f32 %v2763_v16, %v2762_v41  ;;  %v2745_v21 = vrot.slane %v2744_v47, 4  ;;  %v2654_v19 = vmul.f32 1.442695, %v2625_v6  ;;  %v2947_v12 = vpack.c.bf16 %v2927_v5, %v2927_v5 }
 0xc9f   :  { %v2872_v14 = vsel %vm104_vm0, %v2784_v48, 0.0  ;;  %v2891_v50 = vrot.slane %v2890_v60, 1  ;;  %v2976_v61 = vunpack.c.l.b16 %v2944_v8  ;;  %v2978_v42 = vunpack.c.l.b16 %v2946_v34 }
 0xca0   :  { %3931 = vrcp.f32 %v2764_v26  ;;  %v2873_v43 = vrot.slane %v2872_v14, 4  ;;  %v2746_v59 = vadd.f32 %v2745_v21, %v2744_v47  ;;  %v2979_v7 = vunpack.c.l.b16 %v2947_v12 }
 0xca1   :  { %3933 = vpow2.f32 %v2654_v19  ;;  %v2892_v55 = vadd.f32 %v2891_v50, %v2890_v60 }
 0xca2   :  { %v3928_v2 = vpop.eup %3927  ;;  %v2747_v36 = vrot.slane %v2746_v59, 2  ;;  %v2874_v35 = vadd.f32 %v2873_v43, %v2872_v14 }
 0xca3   :  { %v3930_v15 = vpop.eup %3929  ;;  %v2765_v22 = vsel %vm104_vm0, %v3928_v2, 0.0  ;;  %v2787_v33 = vmul.f32 %v3928_v2, %v4927_v3 }
 0xca4   :  { %v2925_v54 = vmul.f32 %v3930_v15, %v2857_v1  ;;  %v2766_v25 = vrot.slane %v2765_v22, 4  ;;  %v2748_v9 = vadd.f32 %v2747_v36, %v2746_v59  ;;  %v2875_v13 = vrot.slane %v2874_v35, 2 }
 0xca5   :  { %v2893_v49 = vsel %vm104_vm0, %v2787_v33, 0.0 }
 0xca6   :  { %v2945_v39 = vpack.c.bf16 %v2925_v54, %v2925_v54  ;;  %v2767_v17 = vadd.f32 %v2766_v25, %v2765_v22  ;;  %v2894_v44 = vrot.slane %v2893_v49, 4  ;;  %v2749_v0 = vrot.slane %v2748_v9, 1 }
 0xca7   :  { %v2876_v28 = vadd.f32 %v2875_v13, %v2874_v35 }
 0xca8   :  { %v2977_v4 = vunpack.c.l.b16 %v2945_v39  ;;  %v2768_v18 = vrot.slane %v2767_v17, 2  ;;  %v2750_v30 = vadd.f32 %v2749_v0, %v2748_v9  ;;  %v2895_v58 = vadd.f32 %v2894_v44, %v2893_v49 }
 0xca9   :  { %v2877_v5 = vrot.slane %v2876_v28, 1 }
 0xcaa   :  { %v3932_v10 = vpop.eup %3931  ;;  %v2991_v52 = vsel %vm1479_vm8, %v2977_v4, %v2976_v61  ;;  %v2769_v53 = vadd.f32 %v2768_v18, %v2767_v17  ;;  %3935 = vrcp.f32 %v2750_v30  ;;  %v2896_v62 = vrot.slane %v2895_v58, 2 }
 0xcab   :  { %v3934_v51 = vpop.eup %3933  ;;  %v2930_v32 = vmul.f32 %v3932_v10, %v2892_v55  ;;  %v2992_v40 = vsel %vm1481_vm10, %v2978_v42, %v2991_v52  ;;  %v2878_v6 = vadd.f32 %v2877_v5, %v2876_v28  ;;  %v3784_v28 = vld [vmem:[%s5258_s2 + $0x2e0] ss:$8 sps:$4 sm:$0xff]  }
 0xcac   :  { %v2770_v11 = vrot.slane %v2769_v53, 1  ;;  %v2751_v31 = vsel %vm104_vm0, %v3934_v51, 0.0  ;;  %v2785_v45 = vmul.f32 %v3934_v51, %v4927_v3  ;;  %v2993_v23 = vsel %vm1483_vm11, %v2979_v7, %v2992_v40  ;;  %v3783_v40 = vld [vmem:[%s5258_s2 + $0x2a0] ss:$8 sps:$4 sm:$0xff]  }
 0xcad   :  { %v2752_v24 = vrot.slane %v2751_v31, 4  ;;  %v2897_v16 = vadd.f32 %v2896_v62, %v2895_v58  ;;  %v2950_v35 = vpack.c.bf16 %v2930_v32, %v2930_v32  ;;  %3684 = vmatpush3.bf16.msra.mxu0 %v3783_v40 }
 0xcae   :  { %v2771_v41 = vadd.f32 %v2770_v11, %v2769_v53  ;;  %v2879_v38 = vsel %vm104_vm0, %v2785_v45, 0.0  ;;  %3685 = vmatprep.subr.bf16.mxu0 %v4022_v27  ;;  %v3785_v11 = vld [vmem:[%s5258_s2 + $0x2b0] ss:$8 sps:$4 sm:$0xff]  }
 0xcaf   :  { %v2753_v57 = vadd.f32 %v2752_v24, %v2751_v31  ;;  %v2880_v46 = vrot.slane %v2879_v38, 4  ;;  %v2898_v26 = vrot.slane %v2897_v16, 1  ;;  %v2982_v9 = vunpack.c.l.b16 %v2950_v35  ;;  %v3786_v31 = vld [vmem:[%s5258_s2 + $0x2f0] ss:$8 sps:$4 sm:$0xff]  }
 0xcb0   :  { %3937 = vrcp.f32 %v2771_v41 }
 0xcb1   :  { %v2754_v56 = vrot.slane %v2753_v57, 2  ;;  %v2881_v47 = vadd.f32 %v2880_v46, %v2879_v38  ;;  %v2899_v60 = vadd.f32 %v2898_v26, %v2897_v16  ;;  %3686 = vmatpush3.bf16.msra.mxu0 %v3785_v11  ;;  %v3092_v26 = vld [vmem:[%s5257_s1 + $0x80] sm:$0xff] }
 0xcb2   :  { %3699 = vmatprep.subr.bf16.mxu0 %v4022_v27 }
 0xcb3   :  { %v2755_v48 = vadd.f32 %v2754_v56, %v2753_v57  ;;  %v2882_v14 = vrot.slane %v2881_v47, 2 }
 0xcb4   :  { %v3936_v37 = vpop.eup %3935 }
 0xcb5   :  { %v2756_v21 = vrot.slane %v2755_v48, 1  ;;  %v2928_v3 = vmul.f32 %v3936_v37, %v2878_v6  ;;  %v2883_v1 = vadd.f32 %v2882_v14, %v2881_v47  ;;  %v3787_v47 = vld [vmem:[%s5258_s2 + $0x340] ss:$8 sps:$4 sm:$0xff]   ;;  %v3790_v37 = vld [vmem:[%s5258_s2 + $0x370] ss:$8 sps:$4 sm:$0xff]  }
 0xcb6   :  { %v3789_v6 = vld [vmem:[%s5258_s2 + $0x360] ss:$8 sps:$4 sm:$0xff]   ;;  %v3093_v14 = vld [vmem:[%s5257_s1 + $0x90] sm:$0xff] }
 0xcb7   :  { %v2757_v19 = vadd.f32 %v2756_v21, %v2755_v48  ;;  %v2948_v43 = vpack.c.bf16 %v2928_v3, %v2928_v3  ;;  %v2884_v22 = vrot.slane %v2883_v1, 1  ;;  %v3788_v48 = vld [vmem:[%s5258_s2 + $0x350] ss:$8 sps:$4 sm:$0xff]  }
 0xcb9   :  { %3939 = vrcp.f32 %v2757_v19  ;;  %v2980_v2 = vunpack.c.l.b16 %v2948_v43  ;;  %v2885_v33 = vadd.f32 %v2884_v22, %v2883_v1 }
 0xcba   :  { %v3938_v59 = vpop.eup %3937 }
 0xcbb   :  { %v2931_v15 = vmul.f32 %v3938_v59, %v2899_v60  ;;  %v2994_v36 = vsel %vm1485_vm12, %v2980_v2, %v2993_v23 }
 0xcbd   :  { %v2951_v25 = vpack.c.bf16 %v2931_v15, %v2931_v15 }
 0xcbf   :  { %v2983_v49 = vunpack.c.l.b16 %v2951_v25 }
 0xcc3   :  { %v3940_v8 = vpop.eup %3939 }
 0xcc4   :  { %v2929_v54 = vmul.f32 %v3940_v8, %v2885_v33 }
 0xcc6   :  { %v2949_v34 = vpack.c.bf16 %v2929_v54, %v2929_v54 }
 0xcc8   :  { %v2981_v50 = vunpack.c.l.b16 %v2949_v34  ;;  %v3094_v34 = vld [vmem:[%s5257_s1 + $0xc0] sm:$0xff] }
 0xcca   :  { %v2995_v39 = vsel %vm1487_vm13, %v2981_v50, %v2994_v36 }
 0xccb   :  { %v2996_v17 = vsel %vm1489_vm14, %v2982_v9, %v2995_v39  ;;  %v3095_v9 = vld [vmem:[%s5257_s1 + $0xd0] sm:$0xff] }
 0xccc   :  { %v2997_v44 = vsel %vm1491_vm15, %v2983_v49, %v2996_v17 }
 0xccd   :  { %v2998_v12 = vpack.c.b16 %v2997_v44, %v5137_v63 }
 0xccf   :  { %3680 = vmatmul.mubr.msk.bf16.vlgmr.msra.gmra.mrb[36].mxu1 %vm104_vm0, %v2998_v12 }
 0xcd0   :  { %3695 = vmatprep.mubr.msk.bf16.mxu1 %vm4023_vm9, %v4022_v27  ;;  %3692 = vmatpush3.bf16.msra.mxu1 %v3784_v28 }
 0xcd1   :  { %3693 = vmatprep.subr.bf16.mxu1 %v4022_v27 }
 0xcd4   :  { %3694 = vmatpush3.bf16.msra.mxu1 %v3786_v31  ;;  %v3791_v31 = vld [vmem:[%s5258_s2 + $0x380] ss:$8 sps:$4 sm:$0xff]  }
 0xcd5   :  { %3711 = vmatprep.subr.bf16.mxu1 %v4022_v27 }
 0xda2   :  { %v3048_v0 = vpop.f32.mrb[36].mxu1 }
 0xda3   :  { %v5161_v61 = vadd.f32 %v3048_v0, %v4704_v29  ;;  %v3681_v4 = vpop.f32.mrb[37].mxu1 }
 0xda4   :  { %v3051_v13 = vpop.f32.mrb[38].mxu1 }
 0xda5   :  { %v5164_v18 = vadd.f32 %v3051_v13, %v4707_v20  ;;  %v3682_v42 = vpop.f32.mrb[39].mxu1  ;;  %v3057_v55 = vsel %vm104_vm0, %v5161_v61, 0.0 }
 0xda6   :  { %3058 = vadd.xlane.f32.xlu0 %v3057_v55 }
 0xda7   :  { %v3060_v63 = vsel %vm104_vm0, %v5164_v18, 0.0 }
 0xda8   :  { %3061 = vadd.xlane.f32.xlu1 %v3060_v63 }
 0xe33   :  { %v3059_v30 = vpop.xlane.xlu0 %3058 }
 0xe34   :  { %v3063_v58 = vmul.f32 0.03125, %v3059_v30 }
 0xe35   :  { %v3062_v10 = vpop.xlane.xlu1 %3061 }
 0xe36   :  { %v3065_v29 = vsub.f32 %v5161_v61, %v3063_v58  ;;  %v3064_v52 = vmul.f32 0.03125, %v3062_v10 }
 0xe38   :  { %v3066_v53 = vsub.f32 %v5164_v18, %v3064_v52  ;;  %v3067_v51 = vmul.f32 %v3065_v29, %v3065_v29 }
 0xe3a   :  { %v3069_v20 = vsel %vm104_vm0, %v3067_v51, 0.0  ;;  %v3068_v7 = vmul.f32 %v3066_v53, %v3066_v53 }
 0xe3b   :  { %3070 = vadd.xlane.f32.xlu0 %v3069_v20 }
 0xe3c   :  { %v3072_v32 = vsel %vm104_vm0, %v3068_v7, 0.0 }
 0xe3d   :  { %3073 = vadd.xlane.f32.xlu1 %v3072_v32 }
 0xec8   :  { %v3071_v45 = vpop.xlane.xlu0 %3070 }
 0xec9   :  { %v3075_v62 = vmul.f32 0.03125, %v3071_v45  ;;  %v3792_v45 = vld [vmem:[%s5258_s2 + $0x390] ss:$8 sps:$4 sm:$0xff]   ;;  %s4024_s2 = smov [#allocation2]  }
 0xeca   :  { %v3074_v24 = vpop.xlane.xlu1 %3073  ;;  %s3396_s9 = sshll.u32 %s4024_s2, 4  ;;  %s3397_s9 = int_to_ptr.vmem [resolvable:$true] %s3396_s9 }
 0xecb   :  { %v3077_v23 = vadd.f32 1e-05, %v3075_v62  ;;  %v3076_v41 = vmul.f32 0.03125, %v3074_v24  ;;  %s3995_s12 = scalar_lea.vmem %s3397_s9, 256  ;;  %p4000_p1 = scmp.lt.s32.totalorder %s3397_s9, %s3397_s9 }
 0xecc   :  { %p3996_p0 = scmp.ne.s32.totalorder %s3397_s9, %s3995_s12  ;;  %p4001_p2 = scmp.lt.s32.totalorder %s3995_s12, %s3995_s12 }
 0xecd   :  { %3941 = vrsqrt.f32 %v3077_v23  ;;  %v3078_v38 = vadd.f32 1e-05, %v3076_v41 }
 0xece   :  { %p4002_p3 = por %p4001_p2, %p4000_p1 }
 0xecf   :  { %3943 = vrsqrt.f32 %v3078_v38 }
 0xed0   :  { %p4003_p4 = pnand %p4002_p3, %p3996_p0 }
 0xed7   :  { %v3942_v57 = vpop.eup %3941 }
 0xed8   :  { %v3081_v5 = vmul.f32 %v3942_v57, %v3065_v29 }
 0xed9   :  { %v3944_v46 = vpop.eup %3943 }
 0xeda   :  { %v3082_v16 = vmul.f32 %v3944_v46, %v3066_v53 }
 0xedc   :  { %v3083_v56 = vpack.c.bf16 %v3082_v16, %v3081_v5 }
 0xede   :  { %3688 = vmatmul.mubr.msk.bf16.vlgmr.msra.gmra.mrb[44].mxu0 %vm104_vm0, %v3083_v56  ;;  %3696 = vmatmul.mubr.msk.bf16.vlgmr.msra.gmra.mrb[40].mxu1 %vm104_vm0, %v3083_v56 }
 0xedf   :  { %3707 = vmatprep.mubr.msk.bf16.mxu0 %vm4023_vm9, %v4022_v27  ;;  %3715 = vmatprep.mubr.msk.bf16.mxu1 %vm4023_vm9, %v4022_v27 }
 0xee0   :  { %3700 = vmatpush3.bf16.msra.mxu0 %v3787_v47  ;;  %3712 = vmatpush3.bf16.msra.mxu1 %v3791_v31 }
 0xee1   :  { %3701 = vmatprep.subr.bf16.mxu0 %v4022_v27  ;;  %3713 = vmatprep.subr.bf16.mxu1 %v4022_v27 }
 0xee4   :  { %3702 = vmatpush3.bf16.msra.mxu0 %v3788_v48  ;;  %3714 = vmatpush3.bf16.msra.mxu1 %v3792_v45 }
 0xee5   :  { %3703 = vmatprep.subr.bf16.mxu0 %v4022_v27 }
 0xee8   :  { %3704 = vmatpush3.bf16.msra.mxu0 %v3789_v6  ;;  %v3332_v6 = vld [vmem:[%s5257_s1 + $0xf0] sm:$0xff] }
 0xee9   :  { %3705 = vmatprep.subr.bf16.mxu0 %v4022_v27  ;;  %v3331_v27 = vld [vmem:[%s5257_s1 + $0xe0] sm:$0xff] }
 0xeec   :  { %3706 = vmatpush3.bf16.msra.mxu0 %v3790_v37 }
 0xfb1   :  { %v3145_v21 = vpop.f32.mrb[44].mxu0  ;;  %v3198_v3 = vpop.f32.mrb[40].mxu1 }
 0xfb2   :  { %v3146_v19 = vadd.f32 %v3145_v21, %v3092_v26  ;;  %v3689_v43 = vpop.f32.mrb[45].mxu0  ;;  %v3697_v60 = vpop.f32.mrb[41].mxu1  ;;  %v3199_v39 = vadd.f32 %v3198_v3, %v3094_v34 }
 0xfb3   :  { %v3148_v59 = vpop.f32.mrb[46].mxu0  ;;  %v3201_v2 = vpop.f32.mrb[42].mxu1 }
 0xfb4   :  { %v3534_v1 = vmul.f32 -1.442695, %v3146_v19  ;;  %v3149_v15 = vadd.f32 %v3148_v59, %v3093_v14  ;;  %v3690_v36 = vpop.f32.mrb[47].mxu0  ;;  %v3698_v22 = vpop.f32.mrb[43].mxu1  ;;  %v3202_v0 = vadd.f32 %v3201_v2, %v3095_v9 }
 0xfb6   :  { %3945 = vpow2.f32 %v3534_v1  ;;  %v3535_v33 = vmul.f32 -1.442695, %v3149_v15 }
 0xfb8   :  { %3947 = vpow2.f32 %v3535_v33 }
 0xfc0   :  { %v3946_v8 = vpop.eup %3945 }
 0xfc1   :  { %v3211_v54 = vadd.f32 1.0, %v3946_v8 }
 0xfc2   :  { %v3948_v35 = vpop.eup %3947 }
 0xfc3   :  { %3949 = vrcp.f32 %v3211_v54  ;;  %v3212_v25 = vadd.f32 1.0, %v3948_v35 }
 0xfc5   :  { %3951 = vrcp.f32 %v3212_v25 }
 0xfcd   :  { %v3950_v50 = vpop.eup %3949 }
 0xfce   :  { %v3217_v49 = vmul.f32 %v3950_v50, %v3146_v19 }
 0xfcf   :  { %v3952_v17 = vpop.eup %3951 }
 0xfd0   :  { %v3219_v44 = vmul.f32 %v3217_v49, %v3199_v39  ;;  %v3218_v12 = vmul.f32 %v3952_v17, %v3149_v15 }
 0xfd2   :  { %v3220_v4 = vmul.f32 %v3218_v12, %v3202_v0 }
 0xfd4   :  { %v3229_v13 = vpack.c.bf16 %v3220_v4, %v3219_v44 }
 0xfd6   :  { %3708 = vmatmul.mubr.msk.bf16.vlgmr.msra.gmra.mrb[48].mxu0 %vm1756_vm1, %v3229_v13 }
0x10a9   :  { %v3291_v42 = vpop.f32.mrb[48].mxu0 }
0x10aa   :  { %v3298_v55 = vadd.f32 %v3291_v42, %v5161_v61  ;;  %v3709_v63 = vpop.f32.mrb[49].mxu0 }
0x10ab   :  { %v3294_v30 = vpop.f32.mrb[50].mxu0 }
0x10ac   :  { %v3299_v58 = vadd.f32 %v3294_v30, %v5164_v18  ;;  %v3710_v10 = vpop.f32.mrb[51].mxu0  ;;  %v3300_v29 = vsel %vm104_vm0, %v3298_v55, 0.0 }
0x10ad   :  { %3301 = vadd.xlane.f32.xlu0 %v3300_v29 }
0x10ae   :  { %v3303_v52 = vsel %vm104_vm0, %v3299_v58, 0.0 }
0x10af   :  { %3304 = vadd.xlane.f32.xlu1 %v3303_v52 }
0x113a   :  { %v3302_v53 = vpop.xlane.xlu0 %3301 }
0x113b   :  { %v3306_v51 = vmul.f32 0.03125, %v3302_v53 }
0x113c   :  { %v3305_v20 = vpop.xlane.xlu1 %3304 }
0x113d   :  { %v3308_v7 = vsub.f32 %v3298_v55, %v3306_v51  ;;  %v3307_v32 = vmul.f32 0.03125, %v3305_v20 }
0x113f   :  { %v3309_v40 = vsub.f32 %v3299_v58, %v3307_v32  ;;  %v3310_v28 = vmul.f32 %v3308_v7, %v3308_v7 }
0x1141   :  { %v3312_v61 = vsel %vm104_vm0, %v3310_v28, 0.0  ;;  %v3311_v11 = vmul.f32 %v3309_v40, %v3309_v40 }
0x1142   :  { %3313 = vadd.xlane.f32.xlu0 %v3312_v61 }
0x1143   :  { %v3315_v18 = vsel %vm104_vm0, %v3311_v11, 0.0 }
0x1144   :  { %3316 = vadd.xlane.f32.xlu1 %v3315_v18 }
0x11cf   :  { %v3314_v62 = vpop.xlane.xlu0 %3313 }
0x11d0   :  { %v3318_v24 = vmul.f32 0.03125, %v3314_v62 }
0x11d1   :  { %v3317_v23 = vpop.xlane.xlu1 %3316 }
0x11d2   :  { %v3320_v41 = vadd.f32 1e-05, %v3318_v24  ;;  %v3319_v38 = vmul.f32 0.03125, %v3317_v23 }
0x11d4   :  { %3953 = vrsqrt.f32 %v3320_v41  ;;  %v3321_v57 = vadd.f32 1e-05, %v3319_v38 }
0x11d6   :  { %3955 = vrsqrt.f32 %v3321_v57 }
0x11de   :  { %v3954_v46 = vpop.eup %3953 }
0x11df   :  { %v3324_v16 = vmul.f32 %v3954_v46, %v3308_v7 }
0x11e0   :  { %v3956_v5 = vpop.eup %3955 }
0x11e1   :  { %v3325_v56 = vmul.f32 %v3956_v5, %v3309_v40 }
0x11e3   :  { %v3326_v47 = vpack.c.bf16 %v3325_v56, %v3324_v16 }
0x11e5   :  { %3716 = vmatmul.mubr.msk.bf16.vlgmr.msra.gmra.mrb[44].mxu1 %vm104_vm0, %v3326_v47 }
0x12b8   :  { %v3382_v48 = vpop.f32.mrb[44].mxu1 }
0x12b9   :  { %v3383_v37 = vadd.f32 %v3382_v48, %v3331_v27  ;;  %v3717_v26 = vpop.f32.mrb[45].mxu1 }
0x12ba   :  { %v3385_v21 = vpop.f32.mrb[46].mxu1 }
0x12bb   :  { %3389 = vst [vmem:[#allocation2] sm:$0xff] %v3383_v37  ;;  %v3386_v3 = vadd.f32 %v3385_v21, %v3332_v6  ;;  %v3718_v14 = vpop.f32.mrb[47].mxu1 }
0x12bd   :  { %3390 = vst [vmem:[#allocation2 + $0x8] sm:$0xff] %v3386_v3 }
0x12be   :  { %4006 = shalt.err (!%p4003_p4)
}
0x12bf   :  { %s4007_s15 = scalar_lea.hbm %s5259_s3, 256 }
0x12c0   :  { %p4008_p5 = scmp.ne.s32.totalorder %s5259_s3, %s4007_s15  ;;  %p4011_p6 = scmp.lt.u32.totalorder %s4007_s15, %s5259_s3 }
0x12c2   :  { %p4013_p7 = pnand %p4011_p6, %p4008_p5 }
0x12c4   :  { %4016 = shalt.err (!%p4013_p7)
}
0x12c5   :  { %s4025_s19 = smov 128   ;;  %s4026_s20 = smov 8  }
0x12c6   :  { %3402 = dma.vmem_to_hbm [thread:$0]  %s3397_s9, 256, %s5259_s3, [#allocation3], %s4025_s19, %s4025_s19, %s4026_s20  }
0x12c7   :  { %4017 = dma.done.wait [#allocation3], 256  }
0x12c8   :  { %4018 = vsyncadd [#allocation3], 4294967040 }
0x12c9   :  { %3406 = vsyncpa [#allocation3], 1 }

</bundles_post_ra>
